<compile_context>
chip_gen: v6e
topology: v6e:2x2x1
jax: 0.10.0
libtpu: 0.0.40
codegen_flags: <defaults>
</compile_context>

<pallas_src>
import functools

import jax
import jax.numpy as jnp
from jax.experimental import pallas as pl
from jax.experimental.pallas import tpu as pltpu


def _round_up(v, m):
    return (v + m - 1) // m * m


def _make_gru_kernel(seq_len, chunk, padded_len):
    """Recurrent kernel factory.  seq_len=T, chunk=Tc, padded_len=Tp (static ints)."""
    need_mask = padded_len != seq_len

    def kernel(gx_ref, whh_ref, bhn_ref, h_ref):
        # gx_ref : (Bblk, Tc, 3*Hp)  pre-projected inputs (biases folded)
        # whh_ref: (Hp, 3*Hp)        recurrent weights, gate slabs 128-aligned
        # bhn_ref: (1, Hp)           recurrent bias of the n gate
        # h_ref  : (Bblk, Hp)        output block, reused as the carried hidden state
        c = pl.program_id(1)  # time-chunk axis (innermost, "arbitrary")

        @pl.when(c == 0)
        def _():
            h_ref[...] = jnp.zeros_like(h_ref)  # h0 = 0 (PyTorch default)

        hp = whh_ref.shape[0]
        whh = whh_ref[...]
        bhn = bhn_ref[...]
        h = h_ref[...]

        for i in range(chunk):  # static unroll of the in-chunk recurrence
            gx = gx_ref[:, i, :]                                   # (Bblk, 3*Hp)
            gh = jnp.dot(h, whh, preferred_element_type=jnp.float32)
            r = jax.nn.sigmoid(gx[:, :hp] + gh[:, :hp])
            z = jax.nn.sigmoid(gx[:, hp:2 * hp] + gh[:, hp:2 * hp])
            n = jnp.tanh(gx[:, 2 * hp:] + r * (gh[:, 2 * hp:] + bhn))
            h_new = n + z * (h - n)            # == (1-z)*n + z*h, one fewer mul
            if need_mask:                      # only emitted when T was padded
                h_new = jnp.where(c * chunk + i < seq_len, h_new, h)
            h = h_new

        h_ref[...] = h

    return kernel


def init_params(key, nbr_features, hidden_size):
    """Raw PyTorch-shaped parameters (same init ranges as nn.GRU / nn.Linear)."""
    k = jax.random.split(key, 6)
    s = 1.0 / jnp.sqrt(hidden_size)
    w_ih = jax.random.uniform(k[0], (3 * hidden_size, nbr_features), jnp.float32, -s, s)
    w_hh = jax.random.uniform(k[1], (3 * hidden_size, hidden_size), jnp.float32, -s, s)
    b_ih = jax.random.uniform(k[2], (3 * hidden_size,), jnp.float32, -s, s)
    b_hh = jax.random.uniform(k[3], (3 * hidden_size,), jnp.float32, -s, s)
    w_fc = jax.random.uniform(k[4], (1, hidden_size), jnp.float32, -s, s)
    b_fc = jax.random.uniform(k[5], (1,), jnp.float32, -s, s)
    return (w_ih, w_hh, b_ih, b_hh, w_fc, b_fc)


def prepare_params(raw):
    """Pad / transpose / bias-fold raw PyTorch params into the kernel layout."""
    w_ih, w_hh, b_ih, b_hh, w_fc, b_fc = raw
    F = w_ih.shape[1]
    H = w_hh.shape[1]
    Hp = max(128, _round_up(H, 128))   # each gate occupies a 128-lane-aligned slab
    G = 3 * Hp

    wih_t = w_ih.T  # (F, 3H)
    whh_t = w_hh.T  # (H, 3H)

    wih_p = jnp.zeros((F, G), jnp.float32)
    whh_p = jnp.zeros((Hp, G), jnp.float32)
    for g in range(3):  # gate order [r, z, n]
        wih_p = wih_p.at[:, g * Hp:g * Hp + H].set(wih_t[:, g * H:(g + 1) * H])
        whh_p = whh_p.at[:H, g * Hp:g * Hp + H].set(whh_t[:, g * H:(g + 1) * H])

    # Fold b_ih fully (all gates) and b_hh for r/z into the hoisted gx matmul;
    # keep b_hn separate because the GRU applies it inside r * (h W_hn^T + b_hn).
    bcomb = jnp.zeros((G,), jnp.float32)
    bcomb = bcomb.at[0 * Hp:0 * Hp + H].set(b_ih[0:H] + b_hh[0:H])          # r
    bcomb = bcomb.at[1 * Hp:1 * Hp + H].set(b_ih[H:2 * H] + b_hh[H:2 * H])  # z
    bcomb = bcomb.at[2 * Hp:2 * Hp + H].set(b_ih[2 * H:3 * H])              # n (input part)
    bhn_p = jnp.zeros((1, Hp), jnp.float32).at[0, :H].set(b_hh[2 * H:3 * H])

    return dict(wih_p=wih_p, whh_p=whh_p, bcomb=bcomb.reshape(1, G), bhn_p=bhn_p,
                w_fc_t=w_fc.T, b_fc=b_fc, H=H, Hp=Hp, F=F)


def gru_forward(x, prep, *, time_chunk=None, batch_block=None):
    """x: (B, T, F) float32 -> (B,) float32 (matches the PyTorch module output)."""
    B, T, F = x.shape
    H, Hp = prep["H"], prep["Hp"]
    G = 3 * Hp

    # Batch blocking / padding (>= 8 sublanes, "parallel" grid axis over blocks).
    Bblk = batch_block or min(_round_up(B, 8), 128)
    Bp = _round_up(B, Bblk)
    # Time chunking (multiple of 8; amortizes per-grid-step pipeline overhead).
    Tc = time_chunk or min(_round_up(T, 8), 32)
    Tp = _round_up(T, Tc)

    xp = x if Bp == B else jnp.pad(x, ((0, Bp - B), (0, 0), (0, 0)))

    # Hoisted input projection: one (Bp*T, F) x (F, 3Hp) matmul, biases folded,
    # output kept batch-first so x is never transposed through HBM.
    gx = jnp.einsum("btf,fg->btg", xp, prep["wih_p"]) + prep["bcomb"]
    if Tp != T:
        gx = jnp.pad(gx, ((0, 0), (0, Tp - T), (0, 0)))

    kernel = _make_gru_kernel(seq_len=T, chunk=Tc, padded_len=Tp)

    h_last = pl.pallas_call(
        kernel,
        out_shape=jax.ShapeDtypeStruct((Bp, Hp), jnp.float32),
        grid_spec=pltpu.PrefetchScalarGridSpec(
            num_scalar_prefetch=0,
            grid=(Bp // Bblk, Tp // Tc),  # (batch blocks, time chunks)
            in_specs=[
                pl.BlockSpec((Bblk, Tc, G), lambda b, c: (b, c, 0)),  # gx chunk
                pl.BlockSpec((Hp, G), lambda b, c: (0, 0)),           # W_hh^T (padded)
                pl.BlockSpec((1, Hp), lambda b, c: (0, 0)),           # b_hn
            ],
            out_specs=pl.BlockSpec((Bblk, Hp), lambda b, c: (b, 0)),  # last hidden state
        ),
        compiler_params=pltpu.CompilerParams(
            dimension_semantics=("parallel", "arbitrary")),
    )(gx, prep["whh_p"], prep["bhn_p"])

    # Final Linear(H,1) + Sigmoid on the last hidden state: lane-width-1 output,
    # intentionally kept in the wrapper (per perf review) on the unpadded slice.
    h = h_last[:B, :H]
    return jax.nn.sigmoid(h @ prep["w_fc_t"] + prep["b_fc"])[:, 0]


def gru_forward_ref(x, raw):
    """Pure-JAX reference using the raw (unpadded) PyTorch-shaped params."""
    w_ih, w_hh, b_ih, b_hh, w_fc, b_fc = raw
    B, T, F = x.shape
    H = w_hh.shape[1]
    h = jnp.zeros((B, H), jnp.float32)
    for t in range(T):
        gx = x[:, t, :] @ w_ih.T + b_ih
        gh = h @ w_hh.T + b_hh
        r = jax.nn.sigmoid(gx[:, :H] + gh[:, :H])
        z = jax.nn.sigmoid(gx[:, H:2 * H] + gh[:, H:2 * H])
        n = jnp.tanh(gx[:, 2 * H:] + r * gh[:, 2 * H:])
        h = (1.0 - z) * n + z * h
    return jax.nn.sigmoid(h @ w_fc.T + b_fc)[:, 0]


if __name__ == "__main__":
    B, T, F, H = 2, 8, 4, 32  # batch, seq len, nbr_features, hidden_size

    key = jax.random.PRNGKey(0)
    kx, kp = jax.random.split(key)
    x = jax.random.normal(kx, (B, T, F), jnp.float32)

    raw = init_params(kp, F, H)
    prep = prepare_params(raw)

    out = jax.block_until_ready(gru_forward(x, prep))
    ref = gru_forward_ref(x, raw)

    assert out.shape == (B,), out.shape
    assert jnp.allclose(out, ref, rtol=1e-4, atol=1e-4), (out, ref)

    print("KERNEL_OK")
</pallas_src>

<mosaic_0001>
module attributes {stable_mosaic.version = 11 : i64} {
  func.func @kernel(%arg0: i32, %arg1: i32, %arg2: memref<8x8x384xf32, #tpu.memory_space<vmem>>, %arg3: memref<128x384xf32, #tpu.memory_space<vmem>>, %arg4: memref<1x128xf32, #tpu.memory_space<vmem>>, %arg5: memref<8x128xf32, #tpu.memory_space<vmem>>) attributes {dimension_semantics = [#tpu.dimension_semantics<parallel>, #tpu.dimension_semantics<arbitrary>], iteration_bounds = array<i64: 1, 1>, scalar_prefetch = 0 : i64, scratch_operands = 0 : i64, tpu.core_type = #tpu.core_type<tc>, window_params = [{transform_indices = @transform_0, window_bounds = array<i64: 8, 8, 384>}, {pipeline_mode = #tpu.pipeline_mode<synchronous>, transform_indices = @transform_1, window_bounds = array<i64: 128, 384>}, {pipeline_mode = #tpu.pipeline_mode<synchronous>, transform_indices = @transform_2, window_bounds = array<i64: 1, 128>}, {transform_indices = @transform_3, window_bounds = array<i64: 8, 128>}]} {
    %c0_i32 = arith.constant 0 : i32
    %0 = arith.cmpi eq, %arg1, %c0_i32 : i32
    %1 = arith.extui %0 : i1 to i32
    %c0_i32_0 = arith.constant 0 : i32
    %2 = arith.cmpi ne, %1, %c0_i32_0 : i32
    scf.if %2 {
      %cst_48 = arith.constant 0.000000e+00 : f32
      %239 = vector.broadcast %cst_48 : f32 to vector<8x128xf32>
      %c0_49 = arith.constant 0 : index
      %c0_50 = arith.constant 0 : index
      %240 = vector.load %arg5[%c0_49, %c0_50] : memref<8x128xf32, #tpu.memory_space<vmem>>, vector<8x128xf32>
      tpu.vector_store %arg5[%c0_49, %c0_50], %239 {strides = array<i32>} : memref<8x128xf32, #tpu.memory_space<vmem>>, vector<8x128xf32>,
    } else {
    }
    %c0 = arith.constant 0 : index
    %c0_1 = arith.constant 0 : index
    %3 = vector.load %arg3[%c0, %c0_1] : memref<128x384xf32, #tpu.memory_space<vmem>>, vector<128x384xf32>
    %c0_2 = arith.constant 0 : index
    %c0_3 = arith.constant 0 : index
    %4 = vector.load %arg4[%c0_2, %c0_3] : memref<1x128xf32, #tpu.memory_space<vmem>>, vector<1x128xf32>
    %c0_4 = arith.constant 0 : index
    %c0_5 = arith.constant 0 : index
    %5 = vector.load %arg5[%c0_4, %c0_5] : memref<8x128xf32, #tpu.memory_space<vmem>>, vector<8x128xf32>
    %c0_6 = arith.constant 0 : index
    %c0_7 = arith.constant 0 : index
    %c0_8 = arith.constant 0 : index
    %6 = vector.load %arg2[%c0_6, %c0_7, %c0_8] : memref<8x8x384xf32, #tpu.memory_space<vmem>>, vector<8x1x384xf32>
    %7 = vector.shape_cast %6 : vector<8x1x384xf32> to vector<8x384xf32>
    %cst = arith.constant dense<0.000000e+00> : vector<8x384xf32>
    %8 = tpu.matmul %5, %3, %cst {dimension_numbers = #tpu.dot_dimension_numbers<[1], [0], [0], [1], [0, 0, 1, 1], [], []>} : vector<8x128xf32>, vector<128x384xf32>, vector<8x384xf32> -> vector<8x384xf32>
    %9 = vector.extract_strided_slice %7 {offsets = [0, 0], sizes = [8, 128], strides = [1, 1]} : vector<8x384xf32> to vector<8x128xf32>
    %10 = vector.extract_strided_slice %8 {offsets = [0, 0], sizes = [8, 128], strides = [1, 1]} : vector<8x384xf32> to vector<8x128xf32>
    %11 = arith.addf %9, %10 : vector<8x128xf32>
    %12 = arith.negf %11 : vector<8x128xf32>
    %13 = math.exp %12 : vector<8x128xf32>
    %cst_9 = arith.constant 1.000000e+00 : f32
    %14 = vector.broadcast %cst_9 : f32 to vector<8x128xf32>
    %15 = arith.addf %14, %13 : vector<8x128xf32>
    %16 = arith.divf %14, %15 : vector<8x128xf32>
    %17 = vector.extract_strided_slice %7 {offsets = [0, 128], sizes = [8, 128], strides = [1, 1]} : vector<8x384xf32> to vector<8x128xf32>
    %18 = vector.extract_strided_slice %8 {offsets = [0, 128], sizes = [8, 128], strides = [1, 1]} : vector<8x384xf32> to vector<8x128xf32>
    %19 = arith.addf %17, %18 : vector<8x128xf32>
    %20 = arith.negf %19 : vector<8x128xf32>
    %21 = math.exp %20 : vector<8x128xf32>
    %cst_10 = arith.constant 1.000000e+00 : f32
    %22 = vector.broadcast %cst_10 : f32 to vector<8x128xf32>
    %23 = arith.addf %22, %21 : vector<8x128xf32>
    %24 = arith.divf %22, %23 : vector<8x128xf32>
    %25 = vector.extract_strided_slice %7 {offsets = [0, 256], sizes = [8, 128], strides = [1, 1]} : vector<8x384xf32> to vector<8x128xf32>
    %26 = vector.extract_strided_slice %8 {offsets = [0, 256], sizes = [8, 128], strides = [1, 1]} : vector<8x384xf32> to vector<8x128xf32>
    %27 = vector.broadcast %4 : vector<1x128xf32> to vector<8x128xf32>
    %28 = arith.addf %26, %27 : vector<8x128xf32>
    %29 = arith.mulf %16, %28 : vector<8x128xf32>
    %30 = arith.addf %25, %29 : vector<8x128xf32>
    %31 = math.tanh %30 : vector<8x128xf32>
    %32 = arith.subf %5, %31 : vector<8x128xf32>
    %33 = arith.mulf %24, %32 : vector<8x128xf32>
    %34 = arith.addf %31, %33 : vector<8x128xf32>
    %c0_11 = arith.constant 0 : index
    %c1 = arith.constant 1 : index
    %c0_12 = arith.constant 0 : index
    %35 = vector.load %arg2[%c0_11, %c1, %c0_12] : memref<8x8x384xf32, #tpu.memory_space<vmem>>, vector<8x1x384xf32>
    %36 = vector.shape_cast %35 : vector<8x1x384xf32> to vector<8x384xf32>
    %cst_13 = arith.constant dense<0.000000e+00> : vector<8x384xf32>
    %37 = tpu.matmul %34, %3, %cst_13 {dimension_numbers = #tpu.dot_dimension_numbers<[1], [0], [0], [1], [0, 0, 1, 1], [], []>} : vector<8x128xf32>, vector<128x384xf32>, vector<8x384xf32> -> vector<8x384xf32>
    %38 = vector.extract_strided_slice %36 {offsets = [0, 0], sizes = [8, 128], strides = [1, 1]} : vector<8x384xf32> to vector<8x128xf32>
    %39 = vector.extract_strided_slice %37 {offsets = [0, 0], sizes = [8, 128], strides = [1, 1]} : vector<8x384xf32> to vector<8x128xf32>
    %40 = arith.addf %38, %39 : vector<8x128xf32>
    %41 = arith.negf %40 : vector<8x128xf32>
    %42 = math.exp %41 : vector<8x128xf32>
    %cst_14 = arith.constant 1.000000e+00 : f32
    %43 = vector.broadcast %cst_14 : f32 to vector<8x128xf32>
    %44 = arith.addf %43, %42 : vector<8x128xf32>
    %45 = arith.divf %43, %44 : vector<8x128xf32>
    %46 = vector.extract_strided_slice %36 {offsets = [0, 128], sizes = [8, 128], strides = [1, 1]} : vector<8x384xf32> to vector<8x128xf32>
    %47 = vector.extract_strided_slice %37 {offsets = [0, 128], sizes = [8, 128], strides = [1, 1]} : vector<8x384xf32> to vector<8x128xf32>
    %48 = arith.addf %46, %47 : vector<8x128xf32>
    %49 = arith.negf %48 : vector<8x128xf32>
    %50 = math.exp %49 : vector<8x128xf32>
    %cst_15 = arith.constant 1.000000e+00 : f32
    %51 = vector.broadcast %cst_15 : f32 to vector<8x128xf32>
    %52 = arith.addf %51, %50 : vector<8x128xf32>
    %53 = arith.divf %51, %52 : vector<8x128xf32>
    %54 = vector.extract_strided_slice %36 {offsets = [0, 256], sizes = [8, 128], strides = [1, 1]} : vector<8x384xf32> to vector<8x128xf32>
    %55 = vector.extract_strided_slice %37 {offsets = [0, 256], sizes = [8, 128], strides = [1, 1]} : vector<8x384xf32> to vector<8x128xf32>
    %56 = vector.broadcast %4 : vector<1x128xf32> to vector<8x128xf32>
    %57 = arith.addf %55, %56 : vector<8x128xf32>
    %58 = arith.mulf %45, %57 : vector<8x128xf32>
    %59 = arith.addf %54, %58 : vector<8x128xf32>
    %60 = math.tanh %59 : vector<8x128xf32>
    %61 = arith.subf %34, %60 : vector<8x128xf32>
    %62 = arith.mulf %53, %61 : vector<8x128xf32>
    %63 = arith.addf %60, %62 : vector<8x128xf32>
    %c0_16 = arith.constant 0 : index
    %c2 = arith.constant 2 : index
    %c0_17 = arith.constant 0 : index
    %64 = vector.load %arg2[%c0_16, %c2, %c0_17] : memref<8x8x384xf32, #tpu.memory_space<vmem>>, vector<8x1x384xf32>
    %65 = vector.shape_cast %64 : vector<8x1x384xf32> to vector<8x384xf32>
    %cst_18 = arith.constant dense<0.000000e+00> : vector<8x384xf32>
    %66 = tpu.matmul %63, %3, %cst_18 {dimension_numbers = #tpu.dot_dimension_numbers<[1], [0], [0], [1], [0, 0, 1, 1], [], []>} : vector<8x128xf32>, vector<128x384xf32>, vector<8x384xf32> -> vector<8x384xf32>
    %67 = vector.extract_strided_slice %65 {offsets = [0, 0], sizes = [8, 128], strides = [1, 1]} : vector<8x384xf32> to vector<8x128xf32>
    %68 = vector.extract_strided_slice %66 {offsets = [0, 0], sizes = [8, 128], strides = [1, 1]} : vector<8x384xf32> to vector<8x128xf32>
    %69 = arith.addf %67, %68 : vector<8x128xf32>
    %70 = arith.negf %69 : vector<8x128xf32>
    %71 = math.exp %70 : vector<8x128xf32>
    %cst_19 = arith.constant 1.000000e+00 : f32
    %72 = vector.broadcast %cst_19 : f32 to vector<8x128xf32>
    %73 = arith.addf %72, %71 : vector<8x128xf32>
    %74 = arith.divf %72, %73 : vector<8x128xf32>
    %75 = vector.extract_strided_slice %65 {offsets = [0, 128], sizes = [8, 128], strides = [1, 1]} : vector<8x384xf32> to vector<8x128xf32>
    %76 = vector.extract_strided_slice %66 {offsets = [0, 128], sizes = [8, 128], strides = [1, 1]} : vector<8x384xf32> to vector<8x128xf32>
    %77 = arith.addf %75, %76 : vector<8x128xf32>
    %78 = arith.negf %77 : vector<8x128xf32>
    %79 = math.exp %78 : vector<8x128xf32>
    %cst_20 = arith.constant 1.000000e+00 : f32
    %80 = vector.broadcast %cst_20 : f32 to vector<8x128xf32>
    %81 = arith.addf %80, %79 : vector<8x128xf32>
    %82 = arith.divf %80, %81 : vector<8x128xf32>
    %83 = vector.extract_strided_slice %65 {offsets = [0, 256], sizes = [8, 128], strides = [1, 1]} : vector<8x384xf32> to vector<8x128xf32>
    %84 = vector.extract_strided_slice %66 {offsets = [0, 256], sizes = [8, 128], strides = [1, 1]} : vector<8x384xf32> to vector<8x128xf32>
    %85 = vector.broadcast %4 : vector<1x128xf32> to vector<8x128xf32>
    %86 = arith.addf %84, %85 : vector<8x128xf32>
    %87 = arith.mulf %74, %86 : vector<8x128xf32>
    %88 = arith.addf %83, %87 : vector<8x128xf32>
    %89 = math.tanh %88 : vector<8x128xf32>
    %90 = arith.subf %63, %89 : vector<8x128xf32>
    %91 = arith.mulf %82, %90 : vector<8x128xf32>
    %92 = arith.addf %89, %91 : vector<8x128xf32>
    %c0_21 = arith.constant 0 : index
    %c3 = arith.constant 3 : index
    %c0_22 = arith.constant 0 : index
    %93 = vector.load %arg2[%c0_21, %c3, %c0_22] : memref<8x8x384xf32, #tpu.memory_space<vmem>>, vector<8x1x384xf32>
    %94 = vector.shape_cast %93 : vector<8x1x384xf32> to vector<8x384xf32>
    %cst_23 = arith.constant dense<0.000000e+00> : vector<8x384xf32>
    %95 = tpu.matmul %92, %3, %cst_23 {dimension_numbers = #tpu.dot_dimension_numbers<[1], [0], [0], [1], [0, 0, 1, 1], [], []>} : vector<8x128xf32>, vector<128x384xf32>, vector<8x384xf32> -> vector<8x384xf32>
    %96 = vector.extract_strided_slice %94 {offsets = [0, 0], sizes = [8, 128], strides = [1, 1]} : vector<8x384xf32> to vector<8x128xf32>
    %97 = vector.extract_strided_slice %95 {offsets = [0, 0], sizes = [8, 128], strides = [1, 1]} : vector<8x384xf32> to vector<8x128xf32>
    %98 = arith.addf %96, %97 : vector<8x128xf32>
    %99 = arith.negf %98 : vector<8x128xf32>
    %100 = math.exp %99 : vector<8x128xf32>
    %cst_24 = arith.constant 1.000000e+00 : f32
    %101 = vector.broadcast %cst_24 : f32 to vector<8x128xf32>
    %102 = arith.addf %101, %100 : vector<8x128xf32>
    %103 = arith.divf %101, %102 : vector<8x128xf32>
    %104 = vector.extract_strided_slice %94 {offsets = [0, 128], sizes = [8, 128], strides = [1, 1]} : vector<8x384xf32> to vector<8x128xf32>
    %105 = vector.extract_strided_slice %95 {offsets = [0, 128], sizes = [8, 128], strides = [1, 1]} : vector<8x384xf32> to vector<8x128xf32>
    %106 = arith.addf %104, %105 : vector<8x128xf32>
    %107 = arith.negf %106 : vector<8x128xf32>
    %108 = math.exp %107 : vector<8x128xf32>
    %cst_25 = arith.constant 1.000000e+00 : f32
    %109 = vector.broadcast %cst_25 : f32 to vector<8x128xf32>
    %110 = arith.addf %109, %108 : vector<8x128xf32>
    %111 = arith.divf %109, %110 : vector<8x128xf32>
    %112 = vector.extract_strided_slice %94 {offsets = [0, 256], sizes = [8, 128], strides = [1, 1]} : vector<8x384xf32> to vector<8x128xf32>
    %113 = vector.extract_strided_slice %95 {offsets = [0, 256], sizes = [8, 128], strides = [1, 1]} : vector<8x384xf32> to vector<8x128xf32>
    %114 = vector.broadcast %4 : vector<1x128xf32> to vector<8x128xf32>
    %115 = arith.addf %113, %114 : vector<8x128xf32>
    %116 = arith.mulf %103, %115 : vector<8x128xf32>
    %117 = arith.addf %112, %116 : vector<8x128xf32>
    %118 = math.tanh %117 : vector<8x128xf32>
    %119 = arith.subf %92, %118 : vector<8x128xf32>
    %120 = arith.mulf %111, %119 : vector<8x128xf32>
    %121 = arith.addf %118, %120 : vector<8x128xf32>
    %c0_26 = arith.constant 0 : index
    %c4 = arith.constant 4 : index
    %c0_27 = arith.constant 0 : index
    %122 = vector.load %arg2[%c0_26, %c4, %c0_27] : memref<8x8x384xf32, #tpu.memory_space<vmem>>, vector<8x1x384xf32>
    %123 = vector.shape_cast %122 : vector<8x1x384xf32> to vector<8x384xf32>
    %cst_28 = arith.constant dense<0.000000e+00> : vector<8x384xf32>
    %124 = tpu.matmul %121, %3, %cst_28 {dimension_numbers = #tpu.dot_dimension_numbers<[1], [0], [0], [1], [0, 0, 1, 1], [], []>} : vector<8x128xf32>, vector<128x384xf32>, vector<8x384xf32> -> vector<8x384xf32>
    %125 = vector.extract_strided_slice %123 {offsets = [0, 0], sizes = [8, 128], strides = [1, 1]} : vector<8x384xf32> to vector<8x128xf32>
    %126 = vector.extract_strided_slice %124 {offsets = [0, 0], sizes = [8, 128], strides = [1, 1]} : vector<8x384xf32> to vector<8x128xf32>
    %127 = arith.addf %125, %126 : vector<8x128xf32>
    %128 = arith.negf %127 : vector<8x128xf32>
    %129 = math.exp %128 : vector<8x128xf32>
    %cst_29 = arith.constant 1.000000e+00 : f32
    %130 = vector.broadcast %cst_29 : f32 to vector<8x128xf32>
    %131 = arith.addf %130, %129 : vector<8x128xf32>
    %132 = arith.divf %130, %131 : vector<8x128xf32>
    %133 = vector.extract_strided_slice %123 {offsets = [0, 128], sizes = [8, 128], strides = [1, 1]} : vector<8x384xf32> to vector<8x128xf32>
    %134 = vector.extract_strided_slice %124 {offsets = [0, 128], sizes = [8, 128], strides = [1, 1]} : vector<8x384xf32> to vector<8x128xf32>
    %135 = arith.addf %133, %134 : vector<8x128xf32>
    %136 = arith.negf %135 : vector<8x128xf32>
    %137 = math.exp %136 : vector<8x128xf32>
    %cst_30 = arith.constant 1.000000e+00 : f32
    %138 = vector.broadcast %cst_30 : f32 to vector<8x128xf32>
    %139 = arith.addf %138, %137 : vector<8x128xf32>
    %140 = arith.divf %138, %139 : vector<8x128xf32>
    %141 = vector.extract_strided_slice %123 {offsets = [0, 256], sizes = [8, 128], strides = [1, 1]} : vector<8x384xf32> to vector<8x128xf32>
    %142 = vector.extract_strided_slice %124 {offsets = [0, 256], sizes = [8, 128], strides = [1, 1]} : vector<8x384xf32> to vector<8x128xf32>
    %143 = vector.broadcast %4 : vector<1x128xf32> to vector<8x128xf32>
    %144 = arith.addf %142, %143 : vector<8x128xf32>
    %145 = arith.mulf %132, %144 : vector<8x128xf32>
    %146 = arith.addf %141, %145 : vector<8x128xf32>
    %147 = math.tanh %146 : vector<8x128xf32>
    %148 = arith.subf %121, %147 : vector<8x128xf32>
    %149 = arith.mulf %140, %148 : vector<8x128xf32>
    %150 = arith.addf %147, %149 : vector<8x128xf32>
    %c0_31 = arith.constant 0 : index
    %c5 = arith.constant 5 : index
    %c0_32 = arith.constant 0 : index
    %151 = vector.load %arg2[%c0_31, %c5, %c0_32] : memref<8x8x384xf32, #tpu.memory_space<vmem>>, vector<8x1x384xf32>
    %152 = vector.shape_cast %151 : vector<8x1x384xf32> to vector<8x384xf32>
    %cst_33 = arith.constant dense<0.000000e+00> : vector<8x384xf32>
    %153 = tpu.matmul %150, %3, %cst_33 {dimension_numbers = #tpu.dot_dimension_numbers<[1], [0], [0], [1], [0, 0, 1, 1], [], []>} : vector<8x128xf32>, vector<128x384xf32>, vector<8x384xf32> -> vector<8x384xf32>
    %154 = vector.extract_strided_slice %152 {offsets = [0, 0], sizes = [8, 128], strides = [1, 1]} : vector<8x384xf32> to vector<8x128xf32>
    %155 = vector.extract_strided_slice %153 {offsets = [0, 0], sizes = [8, 128], strides = [1, 1]} : vector<8x384xf32> to vector<8x128xf32>
    %156 = arith.addf %154, %155 : vector<8x128xf32>
    %157 = arith.negf %156 : vector<8x128xf32>
    %158 = math.exp %157 : vector<8x128xf32>
    %cst_34 = arith.constant 1.000000e+00 : f32
    %159 = vector.broadcast %cst_34 : f32 to vector<8x128xf32>
    %160 = arith.addf %159, %158 : vector<8x128xf32>
    %161 = arith.divf %159, %160 : vector<8x128xf32>
    %162 = vector.extract_strided_slice %152 {offsets = [0, 128], sizes = [8, 128], strides = [1, 1]} : vector<8x384xf32> to vector<8x128xf32>
    %163 = vector.extract_strided_slice %153 {offsets = [0, 128], sizes = [8, 128], strides = [1, 1]} : vector<8x384xf32> to vector<8x128xf32>
    %164 = arith.addf %162, %163 : vector<8x128xf32>
    %165 = arith.negf %164 : vector<8x128xf32>
    %166 = math.exp %165 : vector<8x128xf32>
    %cst_35 = arith.constant 1.000000e+00 : f32
    %167 = vector.broadcast %cst_35 : f32 to vector<8x128xf32>
    %168 = arith.addf %167, %166 : vector<8x128xf32>
    %169 = arith.divf %167, %168 : vector<8x128xf32>
    %170 = vector.extract_strided_slice %152 {offsets = [0, 256], sizes = [8, 128], strides = [1, 1]} : vector<8x384xf32> to vector<8x128xf32>
    %171 = vector.extract_strided_slice %153 {offsets = [0, 256], sizes = [8, 128], strides = [1, 1]} : vector<8x384xf32> to vector<8x128xf32>
    %172 = vector.broadcast %4 : vector<1x128xf32> to vector<8x128xf32>
    %173 = arith.addf %171, %172 : vector<8x128xf32>
    %174 = arith.mulf %161, %173 : vector<8x128xf32>
    %175 = arith.addf %170, %174 : vector<8x128xf32>
    %176 = math.tanh %175 : vector<8x128xf32>
    %177 = arith.subf %150, %176 : vector<8x128xf32>
    %178 = arith.mulf %169, %177 : vector<8x128xf32>
    %179 = arith.addf %176, %178 : vector<8x128xf32>
    %c0_36 = arith.constant 0 : index
    %c6 = arith.constant 6 : index
    %c0_37 = arith.constant 0 : index
    %180 = vector.load %arg2[%c0_36, %c6, %c0_37] : memref<8x8x384xf32, #tpu.memory_space<vmem>>, vector<8x1x384xf32>
    %181 = vector.shape_cast %180 : vector<8x1x384xf32> to vector<8x384xf32>
    %cst_38 = arith.constant dense<0.000000e+00> : vector<8x384xf32>
    %182 = tpu.matmul %179, %3, %cst_38 {dimension_numbers = #tpu.dot_dimension_numbers<[1], [0], [0], [1], [0, 0, 1, 1], [], []>} : vector<8x128xf32>, vector<128x384xf32>, vector<8x384xf32> -> vector<8x384xf32>
    %183 = vector.extract_strided_slice %181 {offsets = [0, 0], sizes = [8, 128], strides = [1, 1]} : vector<8x384xf32> to vector<8x128xf32>
    %184 = vector.extract_strided_slice %182 {offsets = [0, 0], sizes = [8, 128], strides = [1, 1]} : vector<8x384xf32> to vector<8x128xf32>
    %185 = arith.addf %183, %184 : vector<8x128xf32>
    %186 = arith.negf %185 : vector<8x128xf32>
    %187 = math.exp %186 : vector<8x128xf32>
    %cst_39 = arith.constant 1.000000e+00 : f32
    %188 = vector.broadcast %cst_39 : f32 to vector<8x128xf32>
    %189 = arith.addf %188, %187 : vector<8x128xf32>
    %190 = arith.divf %188, %189 : vector<8x128xf32>
    %191 = vector.extract_strided_slice %181 {offsets = [0, 128], sizes = [8, 128], strides = [1, 1]} : vector<8x384xf32> to vector<8x128xf32>
    %192 = vector.extract_strided_slice %182 {offsets = [0, 128], sizes = [8, 128], strides = [1, 1]} : vector<8x384xf32> to vector<8x128xf32>
    %193 = arith.addf %191, %192 : vector<8x128xf32>
    %194 = arith.negf %193 : vector<8x128xf32>
    %195 = math.exp %194 : vector<8x128xf32>
    %cst_40 = arith.constant 1.000000e+00 : f32
    %196 = vector.broadcast %cst_40 : f32 to vector<8x128xf32>
    %197 = arith.addf %196, %195 : vector<8x128xf32>
    %198 = arith.divf %196, %197 : vector<8x128xf32>
    %199 = vector.extract_strided_slice %181 {offsets = [0, 256], sizes = [8, 128], strides = [1, 1]} : vector<8x384xf32> to vector<8x128xf32>
    %200 = vector.extract_strided_slice %182 {offsets = [0, 256], sizes = [8, 128], strides = [1, 1]} : vector<8x384xf32> to vector<8x128xf32>
    %201 = vector.broadcast %4 : vector<1x128xf32> to vector<8x128xf32>
    %202 = arith.addf %200, %201 : vector<8x128xf32>
    %203 = arith.mulf %190, %202 : vector<8x128xf32>
    %204 = arith.addf %199, %203 : vector<8x128xf32>
    %205 = math.tanh %204 : vector<8x128xf32>
    %206 = arith.subf %179, %205 : vector<8x128xf32>
    %207 = arith.mulf %198, %206 : vector<8x128xf32>
    %208 = arith.addf %205, %207 : vector<8x128xf32>
    %c0_41 = arith.constant 0 : index
    %c7 = arith.constant 7 : index
    %c0_42 = arith.constant 0 : index
    %209 = vector.load %arg2[%c0_41, %c7, %c0_42] : memref<8x8x384xf32, #tpu.memory_space<vmem>>, vector<8x1x384xf32>
    %210 = vector.shape_cast %209 : vector<8x1x384xf32> to vector<8x384xf32>
    %cst_43 = arith.constant dense<0.000000e+00> : vector<8x384xf32>
    %211 = tpu.matmul %208, %3, %cst_43 {dimension_numbers = #tpu.dot_dimension_numbers<[1], [0], [0], [1], [0, 0, 1, 1], [], []>} : vector<8x128xf32>, vector<128x384xf32>, vector<8x384xf32> -> vector<8x384xf32>
    %212 = vector.extract_strided_slice %210 {offsets = [0, 0], sizes = [8, 128], strides = [1, 1]} : vector<8x384xf32> to vector<8x128xf32>
    %213 = vector.extract_strided_slice %211 {offsets = [0, 0], sizes = [8, 128], strides = [1, 1]} : vector<8x384xf32> to vector<8x128xf32>
    %214 = arith.addf %212, %213 : vector<8x128xf32>
    %215 = arith.negf %214 : vector<8x128xf32>
    %216 = math.exp %215 : vector<8x128xf32>
    %cst_44 = arith.constant 1.000000e+00 : f32
    %217 = vector.broadcast %cst_44 : f32 to vector<8x128xf32>
    %218 = arith.addf %217, %216 : vector<8x128xf32>
    %219 = arith.divf %217, %218 : vector<8x128xf32>
    %220 = vector.extract_strided_slice %210 {offsets = [0, 128], sizes = [8, 128], strides = [1, 1]} : vector<8x384xf32> to vector<8x128xf32>
    %221 = vector.extract_strided_slice %211 {offsets = [0, 128], sizes = [8, 128], strides = [1, 1]} : vector<8x384xf32> to vector<8x128xf32>
    %222 = arith.addf %220, %221 : vector<8x128xf32>
    %223 = arith.negf %222 : vector<8x128xf32>
    %224 = math.exp %223 : vector<8x128xf32>
    %cst_45 = arith.constant 1.000000e+00 : f32
    %225 = vector.broadcast %cst_45 : f32 to vector<8x128xf32>
    %226 = arith.addf %225, %224 : vector<8x128xf32>
    %227 = arith.divf %225, %226 : vector<8x128xf32>
    %228 = vector.extract_strided_slice %210 {offsets = [0, 256], sizes = [8, 128], strides = [1, 1]} : vector<8x384xf32> to vector<8x128xf32>
    %229 = vector.extract_strided_slice %211 {offsets = [0, 256], sizes = [8, 128], strides = [1, 1]} : vector<8x384xf32> to vector<8x128xf32>
    %230 = vector.broadcast %4 : vector<1x128xf32> to vector<8x128xf32>
    %231 = arith.addf %229, %230 : vector<8x128xf32>
    %232 = arith.mulf %219, %231 : vector<8x128xf32>
    %233 = arith.addf %228, %232 : vector<8x128xf32>
    %234 = math.tanh %233 : vector<8x128xf32>
    %235 = arith.subf %208, %234 : vector<8x128xf32>
    %236 = arith.mulf %227, %235 : vector<8x128xf32>
    %237 = arith.addf %234, %236 : vector<8x128xf32>
    %c0_46 = arith.constant 0 : index
    %c0_47 = arith.constant 0 : index
    %238 = vector.load %arg5[%c0_46, %c0_47] : memref<8x128xf32, #tpu.memory_space<vmem>>, vector<8x128xf32>
    tpu.vector_store %arg5[%c0_46, %c0_47], %237 {strides = array<i32>} : memref<8x128xf32, #tpu.memory_space<vmem>>, vector<8x128xf32>,
    return
  }
  func.func @transform_0(%arg0: i32, %arg1: i32) -> (i32, i32, i32) {
    %c0_i32 = arith.constant 0 : i32
    %c0_i32_0 = arith.constant 0 : i32
    return %arg0, %arg1, %c0_i32 : i32, i32, i32
  }
  func.func @transform_1(%arg0: i32, %arg1: i32) -> (i32, i32) {
    %c0_i32 = arith.constant 0 : i32
    %c0_i32_0 = arith.constant 0 : i32
    %c0_i32_1 = arith.constant 0 : i32
    return %c0_i32, %c0_i32_0 : i32, i32
  }
  func.func @transform_2(%arg0: i32, %arg1: i32) -> (i32, i32) {
    %c0_i32 = arith.constant 0 : i32
    %c0_i32_0 = arith.constant 0 : i32
    %c0_i32_1 = arith.constant 0 : i32
    return %c0_i32, %c0_i32_0 : i32, i32
  }
  func.func @transform_3(%arg0: i32, %arg1: i32) -> (i32, i32) {
    %c0_i32 = arith.constant 0 : i32
    %c0_i32_0 = arith.constant 0 : i32
    return %arg0, %c0_i32 : i32, i32
  }
}

</mosaic_0001>

<bundles_post_ra>
// kernel: tpu_custom_call.1
= control target key start
LH: loop header
LB: loop body
LE: loop exit
PB: predicated region body
PF: predicated region fallthrough
CT: control target
= control target key end

     0   :  { %8 = vsyncpa [#allocation3], 0  ;;  %s8002_s0 = inlined_call_operand.hbm [shape: f32[8,8,384], index: 0, kind: input, shape index: {}]   ;;  %s8003_s1 = inlined_call_operand.hbm [shape: f32[128,384], index: 1, kind: input, shape index: {}]   ;;  %s8004_s2 = inlined_call_operand.vmem [shape: f32[1,128], index: 2, kind: input, shape index: {}]   ;;  %s8005_s3 = inlined_call_operand.hbm [shape: f32[8,128], index: 3, kind: output, shape index: {}]  }
   0x1   :  { %9 = vsyncpa [#allocation6], 0 }
   0x2   :  { %10 = vsyncpa [#allocation4], 0  ;;  %s6355_s12 = smov [#allocation2]  }
   0x3   :  { %s16_s13 = sshll.u32 %s6355_s12, 4  ;;  %s17_s13 = int_to_ptr.vmem [resolvable:$true] %s16_s13 }
   0x4   :  { %s6297_s14 = scalar_lea.vmem %s17_s13, 3072  ;;  %p6302_p1 = scmp.lt.s32.totalorder %s17_s13, %s17_s13 }
   0x5   :  { %p6298_p0 = scmp.ne.s32.totalorder %s17_s13, %s6297_s14  ;;  %p6303_p2 = scmp.lt.s32.totalorder %s6297_s14, %s6297_s14 }
   0x7   :  { %p6304_p3 = por %p6303_p2, %p6302_p1 }
   0x9   :  { %p6305_p4 = pnand %p6304_p3, %p6298_p0 }
   0xb   :  { %6308 = shalt.err (!%p6305_p4)
}
   0xc   :  { %s6356_s15 = smov 384   ;;  %s6357_s16 = smov 24  }
   0xd   :  { %22 = dma.hbm_to_vmem [thread:$0]  %s8002_s0, 3072, %s17_s13, [#allocation3], %s6356_s15, %s6356_s15, %s6357_s16  }
   0xe   :  { %s6358_s19 = smov [#allocation5]  }
   0xf   :  { %s28_s20 = sshll.u32 %s6358_s19, 4  ;;  %s29_s20 = int_to_ptr.vmem [resolvable:$true] %s28_s20 }
  0x10   :  { %s6317_s21 = scalar_lea.vmem %s29_s20, 6144  ;;  %p6322_p6 = scmp.lt.s32.totalorder %s29_s20, %s29_s20 }
  0x11   :  { %p6318_p5 = scmp.ne.s32.totalorder %s29_s20, %s6317_s21  ;;  %p6323_p7 = scmp.lt.s32.totalorder %s6317_s21, %s6317_s21 }
  0x13   :  { %p6324_p8 = por %p6323_p7, %p6322_p6 }
  0x15   :  { %p6325_p9 = pnand %p6324_p8, %p6318_p5 }
  0x17   :  { %6328 = shalt.err (!%p6325_p9)
}
  0x18   :  { %34 = dma.hbm_to_vmem [thread:$0]  %s8003_s1, 6144, %s29_s20, [#allocation6], %s6356_s15, %s6356_s15, %s6357_s16  }
  0x19   :  { %6349 = dma.done.wait [#allocation3], 3072  }
  0x1a   :  { %6350 = vsyncadd [#allocation3], 4294964224 }
  0x1b   :  { %6351 = dma.done.wait [#allocation6], 6144  }
  0x1c   :  { %6352 = vsyncadd [#allocation6], 4294961152  ;;  %v8006_v0 = vmov 0.0   ;;  %vm6360_vm0 = vmmov 0   ;;  %v6393_v1 = vld [vmem:[#allocation5 + $0x170] sm:$0xff]  ;;  %v6395_v2 = vld [vmem:[#allocation5 + $0x168] sm:$0xff]  ;;  %v259_v51 = vlaneseq }
  0x1d   :  { %5214 = vmatprep.subr.mxu1 %v8006_v0  ;;  %177 = vmatprep.mubr.f32.mxu0 %v8006_v0  ;;  %v6397_v3 = vld [vmem:[#allocation5 + $0x158] sm:$0xff]  ;;  %v6400_v4 = vld [vmem:[#allocation5 + $0x150] sm:$0xff]  ;;  %v6403_v5 = vld [vmem:[#allocation5 + $0x140] sm:$0xff]  ;;  %v6361_v49 = vmov 1966171168  }
  0x1e   :  { %5246 = vmatprep.mubr.msk.f32.mxu1 %vm6360_vm0, %v8006_v0  ;;  %113 = vmatprep.subr.mxu0 %v6393_v1  ;;  %v6406_v6 = vld [vmem:[#allocation5 + $0x138] sm:$0xff]  ;;  %v6409_v7 = vld [vmem:[#allocation5 + $0x128] sm:$0xff]  ;;  %v6412_v8 = vld [vmem:[#allocation5 + $0x120] sm:$0xff]  ;;  %v257_v50 = vunpack.c.l.s4 %v6361_v49  ;;  %v260_v53 = vshrl.u32 %v259_v51, 7 }
  0x1f   :  { %114 = vmatpush1.msra.mxu0 %v6395_v2  ;;  %v6415_v9 = vld [vmem:[#allocation5 + $0x110] sm:$0xff]  ;;  %v6418_v10 = vld [vmem:[#allocation5 + $0x108] sm:$0xff]  ;;  %v6421_v11 = vld [vmem:[#allocation5 + $0xf8] sm:$0xff] }
  0x20   :  { %115 = vmatprep.subr.mxu0 %v6397_v3  ;;  %v6424_v12 = vld [vmem:[#allocation5 + $0xf0] sm:$0xff]  ;;  %v6427_v13 = vld [vmem:[#allocation5 + $0xe0] sm:$0xff]  ;;  %v6429_v14 = vld [vmem:[#allocation5 + $0x178] sm:$0xff]  ;;  %v258_v52 = vunpack.c.0.s8 %v257_v50 }
  0x21   :  { %116 = vmatpush1.msra.mxu0 %v6400_v4  ;;  %v6432_v15 = vld [vmem:[#allocation5 + $0xd8] sm:$0xff]  ;;  %5215 = vmatpush3.msra.mxu1 %v6429_v14  ;;  %v6435_v16 = vld [vmem:[#allocation5 + $0x160] sm:$0xff]  ;;  %v6438_v17 = vld [vmem:[#allocation5 + $0xc8] sm:$0xff] }
  0x22   :  { %117 = vmatprep.subr.mxu0 %v6403_v5  ;;  %5216 = vmatprep.subr.mxu1 %v8006_v0  ;;  %v6441_v18 = vld [vmem:[#allocation5 + $0x148] sm:$0xff]  ;;  %v6444_v19 = vld [vmem:[#allocation5 + $0xc0] sm:$0xff]  ;;  %v6448_v20 = vld [vmem:[#allocation5 + $0xb0] sm:$0xff]  ;;  %v6623_v54 = vsub.s32 %v258_v52, %v260_v53 }
  0x23   :  { %118 = vmatpush1.msra.mxu0 %v6406_v6  ;;  %5217 = vmatpush3.msra.mxu1 %v6435_v16  ;;  %8090 = vst [vmem:[#allocation11_spill] sm:$0xff] %v6448_v20  ;;  %v6451_v21 = vld [vmem:[#allocation5 + $0x130] sm:$0xff]  ;;  %v6454_v22 = vld [vmem:[#allocation5 + $0xa8] sm:$0xff]  ;;  %v6458_v23 = vld [vmem:[#allocation5 + $0x98] sm:$0xff] }
  0x24   :  { %119 = vmatprep.subr.mxu0 %v6409_v7  ;;  %5218 = vmatprep.subr.mxu1 %v8006_v0  ;;  %8091 = vst [vmem:[#allocation12_spill] sm:$0xff] %v6454_v22  ;;  %8092 = vst [vmem:[#allocation13_spill] sm:$0xff] %v6458_v23  ;;  %v6461_v24 = vld [vmem:[#allocation5 + $0x118] sm:$0xff]  ;;  %v6464_v25 = vld [vmem:[#allocation5 + $0x90] sm:$0xff] }
  0x25   :  { %120 = vmatpush1.msra.mxu0 %v6412_v8  ;;  %5219 = vmatpush3.msra.mxu1 %v6441_v18  ;;  %8093 = vst [vmem:[#allocation14_spill] sm:$0xff] %v6464_v25  ;;  %v6468_v26 = vld [vmem:[#allocation5 + $0x80] sm:$0xff]  ;;  %v6474_v28 = vld [vmem:[#allocation5 + $0x78] sm:$0xff]  ;;  %v6478_v29 = vld [vmem:[#allocation5 + $0x68] sm:$0xff] }
  0x26   :  { %121 = vmatprep.subr.mxu0 %v6415_v9  ;;  %5220 = vmatprep.subr.mxu1 %v8006_v0  ;;  %8094 = vst [vmem:[#allocation15_spill] sm:$0xff] %v6468_v26  ;;  %v6471_v27 = vld [vmem:[#allocation5 + $0x100] sm:$0xff]  ;;  %8095 = vst [vmem:[#allocation16_spill] sm:$0xff] %v6474_v28  ;;  %v6481_v30 = vld [vmem:[#allocation5 + $0xe8] sm:$0xff] }
  0x27   :  { %122 = vmatpush1.msra.mxu0 %v6418_v10  ;;  %5221 = vmatpush3.msra.mxu1 %v6451_v21  ;;  %8096 = vst [vmem:[#allocation17_spill] sm:$0xff] %v6478_v29  ;;  %v6484_v31 = vld [vmem:[#allocation5 + $0x60] sm:$0xff]  ;;  %v6488_v32 = vld [vmem:[#allocation5 + $0x50] sm:$0xff]  ;;  %v6494_v34 = vld [vmem:[#allocation5 + $0x48] sm:$0xff] }
  0x28   :  { %123 = vmatprep.subr.mxu0 %v6421_v11  ;;  %5222 = vmatprep.subr.mxu1 %v8006_v0  ;;  %8097 = vst [vmem:[#allocation18_spill] sm:$0xff] %v6484_v31  ;;  %8098 = vst [vmem:[#allocation19_spill] sm:$0xff] %v6488_v32  ;;  %v6491_v33 = vld [vmem:[#allocation5 + $0xd0] sm:$0xff]  ;;  %v6498_v35 = vld [vmem:[#allocation5 + $0x38] sm:$0xff] }
  0x29   :  { %124 = vmatpush1.msra.mxu0 %v6424_v12  ;;  %5223 = vmatpush3.msra.mxu1 %v6461_v24  ;;  %8099 = vst [vmem:[#allocation20_spill] sm:$0xff] %v6491_v33  ;;  %8100 = vst [vmem:[#allocation21_spill] sm:$0xff] %v6494_v34  ;;  %v6501_v36 = vld [vmem:[#allocation5 + $0xb8] sm:$0xff]  ;;  %v6504_v37 = vld [vmem:[#allocation5 + $0x30] sm:$0xff] }
  0x2a   :  { %125 = vmatprep.subr.mxu0 %v6427_v13  ;;  %5224 = vmatprep.subr.mxu1 %v8006_v0  ;;  %8101 = vst [vmem:[#allocation22_spill] sm:$0xff] %v6498_v35  ;;  %8102 = vst [vmem:[#allocation23_spill] sm:$0xff] %v6501_v36  ;;  %v6508_v38 = vld [vmem:[#allocation5 + $0x20] sm:$0xff]  ;;  %v6514_v40 = vld [vmem:[#allocation5 + $0x18] sm:$0xff] }
  0x2b   :  { %126 = vmatpush1.msra.mxu0 %v6432_v15  ;;  %5225 = vmatpush3.msra.mxu1 %v6471_v27  ;;  %8103 = vst [vmem:[#allocation24_spill] sm:$0xff] %v6504_v37  ;;  %8104 = vst [vmem:[#allocation25_spill] sm:$0xff] %v6508_v38  ;;  %v6511_v39 = vld [vmem:[#allocation5 + $0xa0] sm:$0xff]  ;;  %v6518_v41 = vld [vmem:[#allocation5 + $0x8] sm:$0xff] }
  0x2c   :  { %127 = vmatprep.subr.mxu0 %v6438_v17  ;;  %5226 = vmatprep.subr.mxu1 %v8006_v0  ;;  %8105 = vst [vmem:[#allocation26_spill] sm:$0xff] %v6511_v39  ;;  %8106 = vst [vmem:[#allocation27_spill] sm:$0xff] %v6514_v40  ;;  %v6521_v42 = vld [vmem:[#allocation5 + $0x88] sm:$0xff]  ;;  %v6524_v43 = vld [vmem:[#allocation5] sm:$0xff] }
  0x2d   :  { %128 = vmatpush1.msra.mxu0 %v6444_v19  ;;  %5227 = vmatpush3.msra.mxu1 %v6481_v30  ;;  %8107 = vst [vmem:[#allocation28_spill] sm:$0xff] %v6518_v41  ;;  %8108 = vst [vmem:[#allocation29_spill] sm:$0xff] %v6521_v42  ;;  %v6529_v44 = vld [vmem:[#allocation5 + $0x70] sm:$0xff]  ;;  %v6535_v45 = vld [vmem:[#allocation5 + $0x58] sm:$0xff] }
  0x2e   :  { %129 = vmatprep.subr.mxu0 %v6448_v20  ;;  %5228 = vmatprep.subr.mxu1 %v8006_v0  ;;  %8109 = vst [vmem:[#allocation30_spill] sm:$0xff] %v6524_v43  ;;  %8110 = vst [vmem:[#allocation31_spill] sm:$0xff] %v6529_v44  ;;  %v6540_v46 = vld [vmem:[#allocation5 + $0x40] sm:$0xff]  ;;  %v6546_v47 = vld [vmem:[#allocation5 + $0x28] sm:$0xff] }
  0x2f   :  { %130 = vmatpush1.msra.mxu0 %v6454_v22  ;;  %5229 = vmatpush3.msra.mxu1 %v6491_v33  ;;  %8111 = vst [vmem:[#allocation32_spill] sm:$0xff] %v6535_v45  ;;  %8112 = vst [vmem:[#allocation33_spill] sm:$0xff] %v6540_v46  ;;  %v6552_v48 = vld [vmem:[#allocation5 + $0x10] sm:$0xff]  ;;  %v6630_v62 = vld [vmem:[#allocation2 + $0x18] ss:$8 sm:$0x7] }
  0x30   :  { %131 = vmatprep.subr.mxu0 %v6458_v23  ;;  %5230 = vmatprep.subr.mxu1 %v8006_v0  ;;  %8113 = vst [vmem:[#allocation34_spill] sm:$0xff] %v6546_v47  ;;  %8114 = vst [vmem:[#allocation35_spill] sm:$0xff] %v6552_v48  ;;  %v6626_v58 = vld [vmem:[#allocation2] ss:$8 sm:$0x7] }
  0x31   :  { %132 = vmatpush1.msra.mxu0 %v6464_v25  ;;  %5231 = vmatpush3.msra.mxu1 %v6501_v36  ;;  %v6632_v63 = vld [vmem:[#allocation2 + $0x30] ss:$8 sm:$0x7] }
  0x32   :  { %133 = vmatprep.subr.mxu0 %v6468_v26  ;;  %5232 = vmatprep.subr.mxu1 %v8006_v0  ;;  %v6636_v49 = vld [vmem:[#allocation2 + $0x60] ss:$8 sm:$0x7] }
  0x33   :  { %134 = vmatpush1.msra.mxu0 %v6474_v28  ;;  %5233 = vmatpush3.msra.mxu1 %v6511_v39 }
  0x34   :  { %135 = vmatprep.subr.mxu0 %v6478_v29  ;;  %5234 = vmatprep.subr.mxu1 %v8006_v0 }
  0x35   :  { %136 = vmatpush1.msra.mxu0 %v6484_v31  ;;  %5235 = vmatpush3.msra.mxu1 %v6521_v42 }
  0x36   :  { %137 = vmatprep.subr.mxu0 %v6488_v32  ;;  %5236 = vmatprep.subr.mxu1 %v8006_v0 }
  0x37   :  { %138 = vmatpush1.msra.mxu0 %v6494_v34  ;;  %5237 = vmatpush3.msra.mxu1 %v6529_v44 }
  0x38   :  { %139 = vmatprep.subr.mxu0 %v6498_v35  ;;  %5238 = vmatprep.subr.mxu1 %v8006_v0 }
  0x39   :  { %140 = vmatpush1.msra.mxu0 %v6504_v37  ;;  %5239 = vmatpush3.msra.mxu1 %v6535_v45 }
  0x3a   :  { %141 = vmatprep.subr.mxu0 %v6508_v38  ;;  %5240 = vmatprep.subr.mxu1 %v8006_v0 }
  0x3b   :  { %142 = vmatpush1.msra.mxu0 %v6514_v40  ;;  %5241 = vmatpush3.msra.mxu1 %v6540_v46 }
  0x3c   :  { %143 = vmatprep.subr.mxu0 %v6518_v41  ;;  %5242 = vmatprep.subr.mxu1 %v8006_v0 }
  0x3d   :  { %144 = vmatpush1.msra.mxu0 %v6524_v43  ;;  %5243 = vmatpush3.msra.mxu1 %v6546_v47 }
  0x3e   :  { %178 = vmatmul.mubr.f32.vlgmr.msra.gmra.mxu0 %v8006_v0  ;;  %818 = vmatprep.subr.mxu0 %v6393_v1 }
  0x3f   :  { %819 = vmatpush1.msra.mxu0 %v6395_v2  ;;  %5244 = vmatprep.subr.mxu1 %v8006_v0 }
  0x40   :  { %820 = vmatprep.subr.mxu0 %v6397_v3  ;;  %5245 = vmatpush3.msra.mxu1 %v6552_v48 }
  0x41   :  { %821 = vmatpush1.msra.mxu0 %v6400_v4  ;;  %5247 = vmatmul.mubr.f32.vlgmr.msra.gmra.mxu1 %v8006_v0 }
  0x42   :  { %822 = vmatprep.subr.mxu0 %v6403_v5  ;;  %5249 = vmatprep.subr.mxu1 %v8006_v0 }
  0x43   :  { %823 = vmatpush1.msra.mxu0 %v6406_v6  ;;  %5250 = vmatpush3.msra.mxu1 %v6429_v14 }
  0x44   :  { %824 = vmatprep.subr.mxu0 %v6409_v7  ;;  %5251 = vmatprep.subr.mxu1 %v8006_v0 }
  0x45   :  { %825 = vmatpush1.msra.mxu0 %v6412_v8  ;;  %5252 = vmatpush3.msra.mxu1 %v6435_v16 }
  0x46   :  { %826 = vmatprep.subr.mxu0 %v6415_v9  ;;  %5253 = vmatprep.subr.mxu1 %v8006_v0 }
  0x47   :  { %827 = vmatpush1.msra.mxu0 %v6418_v10  ;;  %5254 = vmatpush3.msra.mxu1 %v6441_v18 }
  0x48   :  { %828 = vmatprep.subr.mxu0 %v6421_v11  ;;  %5255 = vmatprep.subr.mxu1 %v8006_v0 }
  0x49   :  { %829 = vmatpush1.msra.mxu0 %v6424_v12  ;;  %5256 = vmatpush3.msra.mxu1 %v6451_v21 }
  0x4a   :  { %830 = vmatprep.subr.mxu0 %v6427_v13  ;;  %5257 = vmatprep.subr.mxu1 %v8006_v0 }
  0x4b   :  { %831 = vmatpush1.msra.mxu0 %v6432_v15  ;;  %5258 = vmatpush3.msra.mxu1 %v6461_v24 }
  0x4c   :  { %832 = vmatprep.subr.mxu0 %v6438_v17  ;;  %5259 = vmatprep.subr.mxu1 %v8006_v0 }
  0x4d   :  { %833 = vmatpush1.msra.mxu0 %v6444_v19  ;;  %5260 = vmatpush3.msra.mxu1 %v6471_v27 }
  0x4e   :  { %834 = vmatprep.subr.mxu0 %v6448_v20  ;;  %5261 = vmatprep.subr.mxu1 %v8006_v0 }
  0x4f   :  { %835 = vmatpush1.msra.mxu0 %v6454_v22  ;;  %5262 = vmatpush3.msra.mxu1 %v6481_v30 }
  0x50   :  { %836 = vmatprep.subr.mxu0 %v6458_v23  ;;  %5263 = vmatprep.subr.mxu1 %v8006_v0 }
  0x51   :  { %837 = vmatpush1.msra.mxu0 %v6464_v25  ;;  %5264 = vmatpush3.msra.mxu1 %v6491_v33 }
  0x52   :  { %838 = vmatprep.subr.mxu0 %v6468_v26  ;;  %5265 = vmatprep.subr.mxu1 %v8006_v0 }
  0x53   :  { %839 = vmatpush1.msra.mxu0 %v6474_v28  ;;  %5266 = vmatpush3.msra.mxu1 %v6501_v36 }
  0x54   :  { %840 = vmatprep.subr.mxu0 %v6478_v29  ;;  %5267 = vmatprep.subr.mxu1 %v8006_v0 }
  0x55   :  { %841 = vmatpush1.msra.mxu0 %v6484_v31  ;;  %5268 = vmatpush3.msra.mxu1 %v6511_v39 }
  0x56   :  { %842 = vmatprep.subr.mxu0 %v6488_v32  ;;  %5269 = vmatprep.subr.mxu1 %v8006_v0 }
  0x57   :  { %843 = vmatpush1.msra.mxu0 %v6494_v34  ;;  %5270 = vmatpush3.msra.mxu1 %v6521_v42 }
  0x58   :  { %844 = vmatprep.subr.mxu0 %v6498_v35  ;;  %5271 = vmatprep.subr.mxu1 %v8006_v0 }
  0x59   :  { %845 = vmatpush1.msra.mxu0 %v6504_v37  ;;  %5272 = vmatpush3.msra.mxu1 %v6529_v44 }
  0x5a   :  { %846 = vmatprep.subr.mxu0 %v6508_v38  ;;  %5273 = vmatprep.subr.mxu1 %v8006_v0 }
  0x5b   :  { %847 = vmatpush1.msra.mxu0 %v6514_v40  ;;  %5274 = vmatpush3.msra.mxu1 %v6535_v45 }
  0x5c   :  { %848 = vmatprep.subr.mxu0 %v6518_v41  ;;  %882 = vmatprep.mubr.f32.mxu0 %v8006_v0 }
  0x5d   :  { %849 = vmatpush1.msra.mxu0 %v6524_v43  ;;  %5275 = vmatprep.subr.mxu1 %v8006_v0 }
  0x5e   :  { %5281 = vmatprep.mubr.msk.f32.mxu1 %vm6360_vm0, %v8006_v0  ;;  %5276 = vmatpush3.msra.mxu1 %v6540_v46 }
  0x5f   :  { %1408 = vmatprep.subr.mxu0 %v6393_v1  ;;  %5277 = vmatprep.subr.mxu1 %v8006_v0  ;;  %v6634_v1 = vld [vmem:[#allocation2 + $0x48] ss:$8 sm:$0x7] }
  0x60   :  { %5278 = vmatpush3.msra.mxu1 %v6546_v47  ;;  %v6647_v47 = vld [vmem:[#allocation2 + $0xa8] ss:$8 sm:$0x7] }
  0x61   :  { %5279 = vmatprep.subr.mxu1 %v8006_v0 }
  0x62   :  { %5280 = vmatpush3.msra.mxu1 %v6552_v48 }
  0x63   :  { %5284 = vmatprep.subr.mxu1 %v8006_v0 }
  0xfe   :  { %v179_v55 = vpop.f32.mrf.mxu0 }
  0xff   :  { %v255_v56 = vcombine.high %v179_v55, %v179_v55  ;;  %v262_v57 = vrot.slane %v179_v55, %v6623_v54  ;;  %v6640_v55 = vld [vmem:[#allocation2 + $0x78] ss:$8 sm:$0x7] }
 0x101   :  { %v269_v59 = vrot.slane %v255_v56, %v6623_v54  ;;  %v270_v60 = vcombine.high %v262_v57, %v262_v57  ;;  %v278_v61 = vrot.slane %v262_v57, %v6623_v54  ;;  %v6642_v56 = vld [vmem:[#allocation2 + $0x90] ss:$8 sm:$0x7]  ;;  %v250_v35 = vpop.f32.mrf.mxu1 }
 0x103   :  { %v271_v50 = vcombine.high %v269_v59, %v269_v59  ;;  %v285_v51 = vrot.slane %v269_v59, %v6623_v54  ;;  %v292_v52 = vrot.slane %v270_v60, %v6623_v54  ;;  %v300_v53 = vcombine.high %v278_v61, %v278_v61  ;;  %v5248_v44 = vpop.f32.mrf.mxu1 }
 0x104   :  { %v312_v57 = vadd.f32 %v278_v61, %v6626_v58 }
 0x105   :  { %v299_v0 = vrot.slane %v271_v50, %v6623_v54  ;;  %v301_v48 = vcombine.high %v285_v51, %v285_v51  ;;  %v302_v43 = vcombine.high %v292_v52, %v292_v52  ;;  %v313_v41 = vadd.f32 %v292_v52, %v6630_v62 }
 0x106   :  { %v314_v40 = vadd.f32 %v300_v53, %v6632_v63  ;;  %v316_v59 = vadd.f32 %v285_v51, %v6636_v49  ;;  %v4949_v60 = vmul.f32 -1.442695, %v312_v57 }
 0x107   :  { %v303_v38 = vcombine.high %v299_v0, %v299_v0  ;;  %v315_v46 = vadd.f32 %v302_v43, %v6634_v1  ;;  %v317_v37 = vadd.f32 %v299_v0, %v6640_v55  ;;  %v318_v61 = vadd.f32 %v301_v48, %v6642_v56  ;;  %v181_v43 = vpop.f32.mrf.mxu0 }
 0x108   :  { %5502 = vpow2.f32 %v4949_v60  ;;  %v4950_v50 = vmul.f32 -1.442695, %v313_v41  ;;  %v4951_v45 = vmul.f32 -1.442695, %v314_v40  ;;  %v4953_v32 = vmul.f32 -1.442695, %v316_v59 }
 0x109   :  { %v319_v52 = vadd.f32 %v303_v38, %v6647_v47  ;;  %v4952_v34 = vmul.f32 -1.442695, %v315_v46  ;;  %v4954_v53 = vmul.f32 -1.442695, %v317_v37  ;;  %v4955_v51 = vmul.f32 -1.442695, %v318_v61 }
 0x10a   :  { %5504 = vpow2.f32 %v4950_v50  ;;  %v393_v0 = vcombine.high %v181_v43, %v181_v43  ;;  %v400_v48 = vrot.slane %v181_v43, %v6623_v54  ;;  %v6660_v41 = vld [vmem:[%s8004_s2] ss:$0 sm:$0xff]  ;;  %v378_v60 = vrot.slane %v6632_v63, 1 }
 0x10b   :  { %5506 = vpow2.f32 %v4951_v45  ;;  %v4956_v57 = vmul.f32 -1.442695, %v319_v52  ;;  %8115 = vst [vmem:[#allocation36_spill] sm:$0xff] %v6660_v41  ;;  %v377_v45 = vrot.slane %v6630_v62, 1  ;;  %v512_v46 = vadd.f32 %v6660_v41, %v250_v35 }
 0x10c   :  { %5508 = vpow2.f32 %v4952_v34  ;;  %v407_v40 = vrot.slane %v393_v0, %v6623_v54  ;;  %v408_v38 = vcombine.high %v400_v48, %v400_v48  ;;  %v416_v34 = vrot.slane %v400_v48, %v6623_v54 }
 0x10d   :  { %5510 = vpow2.f32 %v4953_v32  ;;  %v376_v32 = vrot.slane %v6626_v58, 1  ;;  %v380_v61 = vrot.slane %v6636_v49, 1  ;;  %v382_v35 = vrot.slane %v6642_v56, 1 }
 0x10e   :  { %5512 = vpow2.f32 %v4954_v53  ;;  %v409_v50 = vcombine.high %v407_v40, %v407_v40  ;;  %v430_v52 = vrot.slane %v408_v38, %v6623_v54  ;;  %v423_v43 = vrot.slane %v407_v40, %v6623_v54 }
 0x10f   :  { %5514 = vpow2.f32 %v4955_v51  ;;  %v438_v41 = vcombine.high %v416_v34, %v416_v34  ;;  %v514_v42 = vcombine.high %v512_v46, %v512_v46  ;;  %v521_v38 = vrot.slane %v512_v46, %v6623_v54 }
 0x110   :  { %5516 = vpow2.f32 %v4956_v57  ;;  %v379_v57 = vrot.slane %v6634_v1, 1  ;;  %v440_v40 = vcombine.high %v430_v52, %v430_v52  ;;  %v439_v39 = vcombine.high %v423_v43, %v423_v43 }
 0x111   :  { %v450_v25 = vadd.f32 %v416_v34, %v376_v32  ;;  %v528_v46 = vrot.slane %v514_v42, %v6623_v54  ;;  %v537_v34 = vrot.slane %v521_v38, %v6623_v54  ;;  %v580_v42 = vrot.slane %v6630_v62, 2 }
 0x113   :  { %v530_v32 = vcombine.high %v528_v46, %v528_v46 }
 0x115   :  { %v5503_v37 = vpop.eup %5502 }
 0x116   :  { %v344_v44 = vadd.f32 1.0, %v5503_v37  ;;  %v381_v37 = vrot.slane %v6640_v55, 1 }
 0x117   :  { %v5505_v59 = vpop.eup %5504 }
 0x118   :  { %v5507_v53 = vpop.eup %5506  ;;  %v345_v51 = vadd.f32 1.0, %v5505_v59  ;;  %5518 = vrcp.f32 %v344_v44  ;;  %v6675_v44 = vrot.slane %v409_v50, %v6623_v54  ;;  %v454_v50 = vadd.f32 %v423_v43, %v380_v61 }
 0x119   :  { %v5509_v0 = vpop.eup %5508  ;;  %v346_v48 = vadd.f32 1.0, %v5507_v53  ;;  %v558_v43 = vrot.slane %v530_v32, %v6623_v54 }
 0x11a   :  { %v5511_v31 = vpop.eup %5510  ;;  %v347_v29 = vadd.f32 1.0, %v5509_v0  ;;  %5520 = vrcp.f32 %v345_v51  ;;  %v451_v0 = vadd.f32 %v430_v52, %v377_v45  ;;  %v452_v51 = vadd.f32 %v438_v41, %v378_v60 }
 0x11b   :  { %v5513_v28 = vpop.eup %5512  ;;  %v348_v59 = vadd.f32 1.0, %v5511_v31  ;;  %5522 = vrcp.f32 %v346_v48  ;;  %v529_v31 = vcombine.high %v521_v38, %v521_v38  ;;  %v453_v48 = vadd.f32 %v440_v40, %v379_v57 }
 0x11c   :  { %v5515_v26 = vpop.eup %5514  ;;  %v349_v53 = vadd.f32 1.0, %v5513_v28  ;;  %5524 = vrcp.f32 %v347_v29  ;;  %v455_v20 = vadd.f32 %v6675_v44, %v381_v37  ;;  %v4957_v28 = vmul.f32 -1.442695, %v450_v25 }
 0x11d   :  { %v5517_v23 = vpop.eup %5516  ;;  %v350_v36 = vadd.f32 1.0, %v5515_v26  ;;  %5526 = vrcp.f32 %v348_v59  ;;  %v456_v29 = vadd.f32 %v439_v39, %v382_v35  ;;  %v4958_v33 = vmul.f32 -1.442695, %v451_v0 }
 0x11e   :  { %v351_v22 = vadd.f32 1.0, %v5517_v23  ;;  %5528 = vrcp.f32 %v349_v53  ;;  %v4959_v26 = vmul.f32 -1.442695, %v452_v51  ;;  %v551_v41 = vrot.slane %v529_v31, %v6623_v54 }
 0x11f   :  { %5530 = vrcp.f32 %v350_v36  ;;  %v579_v23 = vrot.slane %v6626_v58, 2  ;;  %v383_v36 = vrot.slane %v6647_v47, 1  ;;  %v4960_v45 = vmul.f32 -1.442695, %v453_v48 }
 0x120   :  { %5532 = vrcp.f32 %v351_v22  ;;  %v581_v22 = vrot.slane %v6632_v63, 2  ;;  %v4961_v60 = vmul.f32 -1.442695, %v454_v50  ;;  %v4962_v25 = vmul.f32 -1.442695, %v455_v20 }
 0x121   :  { %5534 = vpow2.f32 %v4957_v28  ;;  %v4963_v61 = vmul.f32 -1.442695, %v456_v29  ;;  %v544_v52 = vrot.slane %v528_v46, %v6623_v54  ;;  %v559_v57 = vcombine.high %v537_v34, %v537_v34 }
 0x122   :  { %5536 = vpow2.f32 %v4958_v33  ;;  %v561_v58 = vcombine.high %v551_v41, %v551_v41  ;;  %v582_v35 = vrot.slane %v6634_v1, 2  ;;  %v583_v38 = vrot.slane %v6636_v49, 2 }
 0x123   :  { %5538 = vpow2.f32 %v4959_v26  ;;  %v584_v63 = vrot.slane %v6640_v55, 2  ;;  %v441_v33 = vcombine.high %v6675_v44, %v6675_v44  ;;  %v585_v0 = vrot.slane %v6642_v56, 2 }
 0x124   :  { %5540 = vpow2.f32 %v4960_v45  ;;  %v560_v51 = vcombine.high %v544_v52, %v544_v52  ;;  %v562_v1 = vcombine.high %v558_v43, %v558_v43  ;;  %v586_v50 = vrot.slane %v6647_v47, 2 }
 0x125   :  { %v5519_v39 = vpop.eup %5518  ;;  %5542 = vpow2.f32 %v4961_v60 }
 0x126   :  { %v571_v37 = vmul.f32 %v5519_v39, %v537_v34  ;;  %5544 = vpow2.f32 %v4962_v25  ;;  %v457_v34 = vadd.f32 %v441_v33, %v383_v36 }
 0x127   :  { %v5521_v62 = vpop.eup %5520  ;;  %5546 = vpow2.f32 %v4963_v61 }
 0x128   :  { %v5523_v20 = vpop.eup %5522  ;;  %v572_v59 = vmul.f32 %v5521_v62, %v551_v41  ;;  %v595_v40 = vadd.f32 %v579_v23, %v571_v37 }
 0x129   :  { %v5525_v53 = vpop.eup %5524  ;;  %v573_v46 = vmul.f32 %v5523_v20, %v559_v57 }
 0x12a   :  { %v5527_v31 = vpop.eup %5526  ;;  %v574_v49 = vmul.f32 %v5525_v53, %v561_v58  ;;  %v596_v48 = vadd.f32 %v580_v42, %v572_v59  ;;  %5548 = vtanh.f32 %v595_v40  ;;  %v4964_v42 = vmul.f32 -1.442695, %v457_v34 }
 0x12b   :  { %v5529_v55 = vpop.eup %5528  ;;  %v575_v28 = vmul.f32 %v5527_v31, %v544_v52  ;;  %v597_v29 = vadd.f32 %v581_v22, %v573_v46 }
 0x12c   :  { %v5531_v44 = vpop.eup %5530  ;;  %v576_v26 = vmul.f32 %v5529_v55, %v558_v43  ;;  %v598_v32 = vadd.f32 %v582_v35, %v574_v49  ;;  %5550 = vtanh.f32 %v596_v48 }
 0x12d   :  { %v5533_v56 = vpop.eup %5532  ;;  %v577_v41 = vmul.f32 %v5531_v44, %v560_v51  ;;  %v599_v23 = vadd.f32 %v583_v38, %v575_v28  ;;  %5552 = vtanh.f32 %v597_v29 }
 0x12e   :  { %v578_v45 = vmul.f32 %v5533_v56, %v562_v1  ;;  %v600_v60 = vadd.f32 %v584_v63, %v576_v26  ;;  %5554 = vtanh.f32 %v598_v32  ;;  %v5535_v47 = vpop.eup %5534 }
 0x12f   :  { %v601_v25 = vadd.f32 %v585_v0, %v577_v41  ;;  %5556 = vtanh.f32 %v599_v23  ;;  %v5537_v22 = vpop.eup %5536  ;;  %v482_v38 = vadd.f32 1.0, %v5535_v47 }
 0x130   :  { %v602_v39 = vadd.f32 %v586_v50, %v578_v45  ;;  %5558 = vtanh.f32 %v600_v60  ;;  %v5539_v36 = vpop.eup %5538  ;;  %v483_v20 = vadd.f32 1.0, %v5537_v22 }
 0x131   :  { %5560 = vtanh.f32 %v601_v25  ;;  %v5541_v61 = vpop.eup %5540  ;;  %v484_v53 = vadd.f32 1.0, %v5539_v36 }
 0x132   :  { %5562 = vtanh.f32 %v602_v39  ;;  %v5543_v52 = vpop.eup %5542  ;;  %v485_v1 = vadd.f32 1.0, %v5541_v61 }
 0x133   :  { %5564 = vpow2.f32 %v4964_v42  ;;  %v5545_v57 = vpop.eup %5544  ;;  %v486_v49 = vadd.f32 1.0, %v5543_v52 }
 0x134   :  { %v5547_v43 = vpop.eup %5546  ;;  %5566 = vrcp.f32 %v482_v38  ;;  %v487_v28 = vadd.f32 1.0, %v5545_v57 }
 0x135   :  { %5568 = vrcp.f32 %v483_v20  ;;  %v488_v29 = vadd.f32 1.0, %v5547_v43 }
 0x136   :  { %5570 = vrcp.f32 %v484_v53 }
 0x137   :  { %v6694_v58 = vpop.eup %5548  ;;  %5572 = vrcp.f32 %v485_v1 }
 0x138   :  { %5574 = vrcp.f32 %v486_v49 }
 0x139   :  { %v6696_v37 = vpop.eup %5550  ;;  %5576 = vrcp.f32 %v487_v28 }
 0x13a   :  { %v6698_v62 = vpop.eup %5552  ;;  %v619_v33 = vcombine.low %v6694_v58, %v6696_v37  ;;  %5578 = vrcp.f32 %v488_v29 }
 0x13b   :  { %v6700_v35 = vpop.eup %5554 }
 0x13c   :  { %v6702_v63 = vpop.eup %5556  ;;  %v620_v59 = vcombine.low %v6698_v62, %v6700_v35  ;;  %v629_v55 = vrot.slane %v619_v33, %v6623_v54 }
 0x13d   :  { %v6708_v40 = vpop.eup %5558 }
 0x13e   :  { %v6710_v0 = vpop.eup %5560  ;;  %v621_v51 = vcombine.low %v6702_v63, %v6708_v40  ;;  %v636_v46 = vrot.slane %v620_v59, %v6623_v54 }
 0x13f   :  { %v5563_v31 = vpop.eup %5562 }
 0x140   :  { %v622_v48 = vcombine.low %v6710_v0, %v5563_v31  ;;  %v5565_v50 = vpop.eup %5564  ;;  %v643_v44 = vrot.slane %v621_v51, %v6623_v54  ;;  %v651_v26 = vcombine.low %v629_v55, %v636_v46 }
 0x141   :  { %v489_v32 = vadd.f32 1.0, %v5565_v50  ;;  %v5567_v25 = vpop.eup %5566 }
 0x142   :  { %v650_v34 = vrot.slane %v622_v48, %v6623_v54  ;;  %v659_v41 = vrot.slane %v651_v26, %v6623_v54  ;;  %v5569_v47 = vpop.eup %5568 }
 0x143   :  { %5580 = vrcp.f32 %v489_v32  ;;  %v5571_v22 = vpop.eup %5570 }
 0x144   :  { %v652_v56 = vcombine.low %v643_v44, %v650_v34  ;;  %v5573_v57 = vpop.eup %5572 }
 0x145   :  { %v5575_v59 = vpop.eup %5574 }
 0x146   :  { %v666_v23 = vrot.slane %v652_v56, %v6623_v54  ;;  %v5577_v51 = vpop.eup %5576 }
 0x147   :  { %v5579_v55 = vpop.eup %5578 }
 0x148   :  { %v667_v45 = vcombine.low %v659_v41, %v666_v23 }
 0x14a   :  { %v669_v60 = vsub.f32 0.0, %v667_v45 }
 0x14c   :  { %v671_v42 = vcombine.high %v669_v60, %v669_v60  ;;  %v678_v39 = vrot.slane %v669_v60, %v6623_v54 }
 0x14e   :  { %v685_v36 = vrot.slane %v671_v42, %v6623_v54  ;;  %v686_v61 = vcombine.high %v678_v39, %v678_v39  ;;  %v694_v52 = vrot.slane %v678_v39, %v6623_v54 }
 0x150   :  { %v687_v43 = vcombine.high %v685_v36, %v685_v36  ;;  %v701_v38 = vrot.slane %v685_v36, %v6623_v54  ;;  %v708_v20 = vrot.slane %v686_v61, %v6623_v54  ;;  %v716_v33 = vcombine.high %v694_v52, %v694_v52  ;;  %v5581_v32 = vpop.eup %5580 }
 0x151   :  { %v728_v53 = vmul.f32 %v5567_v25, %v694_v52 }
 0x152   :  { %v715_v46 = vrot.slane %v687_v43, %v6623_v54  ;;  %v717_v1 = vcombine.high %v701_v38, %v701_v38  ;;  %v718_v49 = vcombine.high %v708_v20, %v708_v20  ;;  %v729_v48 = vmul.f32 %v5569_v47, %v708_v20  ;;  %v8140_v20 = vld [vmem:[#allocation30_spill] sm:$0xff] }
 0x153   :  { %v730_v50 = vmul.f32 %v5571_v22, %v716_v33  ;;  %v732_v28 = vmul.f32 %v5575_v59, %v701_v38  ;;  %v6728_v56 = vadd.f32 %v6694_v58, %v728_v53  ;;  %v8116_v43 = vmov 0.0   ;;  %v8139_v38 = vld [vmem:[#allocation28_spill] sm:$0xff]  ;;  %v8141_v33 = vld [vmem:[#allocation35_spill] sm:$0xff] }
 0x154   :  { %v719_v29 = vcombine.high %v715_v46, %v715_v46  ;;  %v731_v44 = vmul.f32 %v5573_v57, %v718_v49  ;;  %v733_v34 = vmul.f32 %v5577_v51, %v715_v46  ;;  %v734_v26 = vmul.f32 %v5579_v55, %v717_v1  ;;  %v6829_v59 = vld [vmem:[#allocation5 + $0x170] sm:$0xff] }
 0x155   :  { %v6731_v41 = vadd.f32 %v6696_v37, %v729_v48  ;;  %v6734_v23 = vadd.f32 %v6698_v62, %v730_v50  ;;  %v6740_v25 = vadd.f32 %v6702_v63, %v732_v28  ;;  %v6836_v48 = vld [vmem:[#allocation2 + $0x1] ss:$8 sm:$0x7] }
 0x156   :  { %v735_v45 = vmul.f32 %v5581_v32, %v719_v29  ;;  %v6737_v60 = vadd.f32 %v6700_v35, %v731_v44  ;;  %v6743_v42 = vadd.f32 %v6708_v40, %v733_v34  ;;  %v6748_v39 = vadd.f32 %v6710_v0, %v734_v26  ;;  %v6840_v29 = vld [vmem:[#allocation2 + $0x19] ss:$8 sm:$0x7] }
 0x157   :  { %v768_v58 = vcombine.low %v6728_v56, %v6731_v41  ;;  %v6842_v44 = vld [vmem:[#allocation2 + $0x31] ss:$8 sm:$0x7] }
 0x158   :  { %v6750_v37 = vadd.f32 %v5563_v31, %v735_v45  ;;  %v769_v62 = vcombine.low %v6734_v23, %v6737_v60  ;;  %v770_v35 = vcombine.low %v6740_v25, %v6743_v42  ;;  %v6844_v34 = vld [vmem:[#allocation2 + $0x49] ss:$8 sm:$0x7] }
 0x159   :  { %v778_v40 = vrot.slane %v768_v58, %v6623_v54  ;;  %v6846_v26 = vld [vmem:[#allocation2 + $0x61] ss:$8 sm:$0x7] }
 0x15a   :  { %v771_v63 = vcombine.low %v6748_v39, %v6750_v37  ;;  %v785_v47 = vrot.slane %v769_v62, %v6623_v54  ;;  %v792_v22 = vrot.slane %v770_v35, %v6623_v54 }
 0x15c   :  { %v799_v0 = vrot.slane %v771_v63, %v6623_v54  ;;  %v800_v36 = vcombine.low %v778_v40, %v785_v47  ;;  %v6850_v63 = vld [vmem:[#allocation2 + $0x79] ss:$8 sm:$0x7] }
 0x15d   :  { %v6852_v40 = vld [vmem:[#allocation2 + $0x91] ss:$8 sm:$0x7] }
 0x15e   :  { %v801_v31 = vcombine.low %v792_v22, %v799_v0  ;;  %v808_v61 = vrot.slane %v800_v36, %v6623_v54 }
 0x160   :  { %v815_v52 = vrot.slane %v801_v31, %v6623_v54 }
 0x162   :  { %v816_v57 = vcombine.low %v808_v61, %v815_v52  ;;  %v6857_v61 = vld [vmem:[#allocation2 + $0xa9] ss:$8 sm:$0x7] }
 0x164   :  { %883 = vmatmul.mubr.f32.vlgmr.msra.gmra.mxu0 %v816_v57  ;;  %5282 = vmatmul.mubr.f32.vlgmr.msra.gmra.mxu1 %v816_v57 }
 0x165   :  { %1409 = vmatpush1.msra.mxu0 %v6395_v2  ;;  %5285 = vmatpush3.msra.mxu1 %v6429_v14  ;;  %v8117_v2 = vld [vmem:[#allocation20_spill] sm:$0xff]  ;;  %v8129_v14 = vld [vmem:[#allocation31_spill] sm:$0xff] }
 0x166   :  { %1410 = vmatprep.subr.mxu0 %v6397_v3  ;;  %5286 = vmatprep.subr.mxu1 %v8116_v43  ;;  %v8118_v3 = vld [vmem:[#allocation11_spill] sm:$0xff] }
 0x167   :  { %1411 = vmatpush1.msra.mxu0 %v6400_v4  ;;  %5287 = vmatpush3.msra.mxu1 %v6435_v16  ;;  %v8119_v4 = vld [vmem:[#allocation12_spill] sm:$0xff]  ;;  %v8131_v16 = vld [vmem:[#allocation21_spill] sm:$0xff] }
 0x168   :  { %1412 = vmatprep.subr.mxu0 %v6403_v5  ;;  %5288 = vmatprep.subr.mxu1 %v8116_v43  ;;  %v8120_v5 = vld [vmem:[#allocation23_spill] sm:$0xff] }
 0x169   :  { %1413 = vmatpush1.msra.mxu0 %v6406_v6  ;;  %5289 = vmatpush3.msra.mxu1 %v6441_v18  ;;  %v8121_v6 = vld [vmem:[#allocation13_spill] sm:$0xff]  ;;  %v8133_v18 = vld [vmem:[#allocation22_spill] sm:$0xff] }
 0x16a   :  { %1414 = vmatprep.subr.mxu0 %v6409_v7  ;;  %5290 = vmatprep.subr.mxu1 %v8116_v43  ;;  %v8122_v7 = vld [vmem:[#allocation14_spill] sm:$0xff] }
 0x16b   :  { %1415 = vmatpush1.msra.mxu0 %v6412_v8  ;;  %5291 = vmatpush3.msra.mxu1 %v6451_v21  ;;  %v8123_v8 = vld [vmem:[#allocation26_spill] sm:$0xff]  ;;  %v8135_v21 = vld [vmem:[#allocation33_spill] sm:$0xff] }
 0x16c   :  { %1416 = vmatprep.subr.mxu0 %v6415_v9  ;;  %5292 = vmatprep.subr.mxu1 %v8116_v43  ;;  %v8124_v9 = vld [vmem:[#allocation15_spill] sm:$0xff] }
 0x16d   :  { %1417 = vmatpush1.msra.mxu0 %v6418_v10  ;;  %5293 = vmatpush3.msra.mxu1 %v6461_v24  ;;  %v8125_v10 = vld [vmem:[#allocation16_spill] sm:$0xff]  ;;  %v8136_v24 = vld [vmem:[#allocation25_spill] sm:$0xff] }
 0x16e   :  { %1418 = vmatprep.subr.mxu0 %v6421_v11  ;;  %5294 = vmatprep.subr.mxu1 %v8116_v43  ;;  %v8126_v11 = vld [vmem:[#allocation29_spill] sm:$0xff] }
 0x16f   :  { %1419 = vmatpush1.msra.mxu0 %v6424_v12  ;;  %5295 = vmatpush3.msra.mxu1 %v6471_v27  ;;  %v8127_v12 = vld [vmem:[#allocation17_spill] sm:$0xff]  ;;  %v8137_v27 = vld [vmem:[#allocation27_spill] sm:$0xff] }
 0x170   :  { %1420 = vmatprep.subr.mxu0 %v6427_v13  ;;  %5296 = vmatprep.subr.mxu1 %v8116_v43  ;;  %v8128_v13 = vld [vmem:[#allocation18_spill] sm:$0xff] }
 0x171   :  { %1421 = vmatpush1.msra.mxu0 %v6432_v15  ;;  %5297 = vmatpush3.msra.mxu1 %v6481_v30  ;;  %v8130_v15 = vld [vmem:[#allocation19_spill] sm:$0xff]  ;;  %v8138_v30 = vld [vmem:[#allocation34_spill] sm:$0xff] }
 0x172   :  { %1422 = vmatprep.subr.mxu0 %v6438_v17  ;;  %5298 = vmatprep.subr.mxu1 %v8116_v43  ;;  %v8132_v17 = vld [vmem:[#allocation32_spill] sm:$0xff] }
 0x173   :  { %1423 = vmatpush1.msra.mxu0 %v6444_v19  ;;  %5299 = vmatpush3.msra.mxu1 %v8117_v2  ;;  %v8134_v19 = vld [vmem:[#allocation24_spill] sm:$0xff] }
 0x174   :  { %1424 = vmatprep.subr.mxu0 %v8118_v3  ;;  %5300 = vmatprep.subr.mxu1 %v8116_v43 }
 0x175   :  { %1425 = vmatpush1.msra.mxu0 %v8119_v4  ;;  %5301 = vmatpush3.msra.mxu1 %v8120_v5 }
 0x176   :  { %1426 = vmatprep.subr.mxu0 %v8121_v6  ;;  %5302 = vmatprep.subr.mxu1 %v8116_v43 }
 0x177   :  { %1427 = vmatpush1.msra.mxu0 %v8122_v7  ;;  %5303 = vmatpush3.msra.mxu1 %v8123_v8 }
 0x178   :  { %1428 = vmatprep.subr.mxu0 %v8124_v9  ;;  %5304 = vmatprep.subr.mxu1 %v8116_v43 }
 0x179   :  { %1429 = vmatpush1.msra.mxu0 %v8125_v10  ;;  %5305 = vmatpush3.msra.mxu1 %v8126_v11 }
 0x17a   :  { %1430 = vmatprep.subr.mxu0 %v8127_v12  ;;  %5306 = vmatprep.subr.mxu1 %v8116_v43 }
 0x17b   :  { %1431 = vmatpush1.msra.mxu0 %v8128_v13  ;;  %5307 = vmatpush3.msra.mxu1 %v8129_v14 }
 0x17c   :  { %1432 = vmatprep.subr.mxu0 %v8130_v15  ;;  %5308 = vmatprep.subr.mxu1 %v8116_v43 }
 0x17d   :  { %1433 = vmatpush1.msra.mxu0 %v8131_v16  ;;  %5309 = vmatpush3.msra.mxu1 %v8132_v17  ;;  %v1081_v16 = vrot.slane %v6836_v48, 1 }
 0x17e   :  { %1434 = vmatprep.subr.mxu0 %v8133_v18  ;;  %5310 = vmatprep.subr.mxu1 %v8116_v43 }
 0x17f   :  { %1435 = vmatpush1.msra.mxu0 %v8134_v19  ;;  %5311 = vmatpush3.msra.mxu1 %v8135_v21  ;;  %v1082_v19 = vrot.slane %v6840_v29, 1  ;;  %v1083_v21 = vrot.slane %v6842_v44, 1 }
 0x180   :  { %1436 = vmatprep.subr.mxu0 %v8136_v24  ;;  %5312 = vmatprep.subr.mxu1 %v8116_v43  ;;  %v1085_v24 = vrot.slane %v6846_v26, 1 }
 0x181   :  { %1437 = vmatpush1.msra.mxu0 %v8137_v27  ;;  %5313 = vmatpush3.msra.mxu1 %v8138_v30 }
 0x182   :  { %1438 = vmatprep.subr.mxu0 %v8139_v38  ;;  %5314 = vmatprep.subr.mxu1 %v8116_v43  ;;  %v1084_v38 = vrot.slane %v6844_v34, 1 }
 0x183   :  { %1439 = vmatpush1.msra.mxu0 %v8140_v20  ;;  %1472 = vmatprep.mubr.f32.mxu0 %v8116_v43 }
 0x184   :  { %5315 = vmatpush3.msra.mxu1 %v8141_v33  ;;  %5316 = vmatprep.mubr.msk.f32.mxu1 %vm6360_vm0, %v8116_v43 }
 0x185   :  { %1998 = vmatprep.subr.mxu0 %v6829_v59  ;;  %5319 = vmatprep.subr.mxu1 %v8116_v43 }
 0x224   :  { %v884_v53 = vpop.f32.mrf.mxu0  ;;  %v6833_v51 = vpop.f32.mrf.mxu1 }
 0x225   :  { %v960_v46 = vcombine.high %v884_v53, %v884_v53  ;;  %v967_v1 = vrot.slane %v884_v53, %v6623_v54 }
 0x226   :  { %v5283_v49 = vpop.f32.mrf.mxu1  ;;  %v886_v35 = vpop.f32.mrf.mxu0 }
 0x227   :  { %v974_v55 = vrot.slane %v960_v46, %v6623_v54  ;;  %v975_v50 = vcombine.high %v967_v1, %v967_v1  ;;  %v983_v28 = vrot.slane %v967_v1, %v6623_v54  ;;  %v1098_v3 = vcombine.high %v886_v35, %v886_v35 }
 0x228   :  { %v1105_v13 = vrot.slane %v886_v35, %v6623_v54 }
 0x229   :  { %v976_v32 = vcombine.high %v974_v55, %v974_v55  ;;  %v990_v45 = vrot.slane %v974_v55, %v6623_v54  ;;  %v997_v58 = vrot.slane %v975_v50, %v6623_v54  ;;  %v1005_v62 = vcombine.high %v983_v28, %v983_v28 }
 0x22a   :  { %v1017_v47 = vadd.f32 %v983_v28, %v6836_v48  ;;  %v1112_v17 = vrot.slane %v1098_v3, %v6623_v54  ;;  %v1113_v27 = vcombine.high %v1105_v13, %v1105_v13  ;;  %v1121_v30 = vrot.slane %v1105_v13, %v6623_v54  ;;  %v8142_v3 = vld [vmem:[#allocation36_spill] sm:$0xff] }
 0x22b   :  { %v1004_v22 = vrot.slane %v976_v32, %v6623_v54  ;;  %v1006_v0 = vcombine.high %v990_v45, %v990_v45  ;;  %v1007_v36 = vcombine.high %v997_v58, %v997_v58  ;;  %v1018_v31 = vadd.f32 %v997_v58, %v6840_v29 }
 0x22c   :  { %v1019_v52 = vadd.f32 %v1005_v62, %v6842_v44  ;;  %v1021_v57 = vadd.f32 %v990_v45, %v6846_v26  ;;  %v4966_v2 = vmul.f32 -1.442695, %v1017_v47  ;;  %v1128_v20 = vrot.slane %v1112_v17, %v6623_v54 }
 0x22d   :  { %v1008_v4 = vcombine.high %v1004_v22, %v1004_v22  ;;  %v1020_v5 = vadd.f32 %v1007_v36, %v6844_v34  ;;  %v1022_v6 = vadd.f32 %v1004_v22, %v6850_v63  ;;  %v1023_v7 = vadd.f32 %v1006_v0, %v6852_v40 }
 0x22e   :  { %5582 = vpow2.f32 %v4966_v2  ;;  %v4967_v8 = vmul.f32 -1.442695, %v1018_v31  ;;  %v4968_v9 = vmul.f32 -1.442695, %v1019_v52  ;;  %v4970_v12 = vmul.f32 -1.442695, %v1021_v57 }
 0x22f   :  { %v1024_v10 = vadd.f32 %v1008_v4, %v6857_v61  ;;  %v4969_v11 = vmul.f32 -1.442695, %v1020_v5  ;;  %v4971_v14 = vmul.f32 -1.442695, %v1022_v6  ;;  %v4972_v15 = vmul.f32 -1.442695, %v1023_v7 }
 0x230   :  { %5584 = vpow2.f32 %v4967_v8  ;;  %v1114_v33 = vcombine.high %v1112_v17, %v1112_v17  ;;  %v1135_v53 = vrot.slane %v1113_v27, %v6623_v54  ;;  %v1143_v46 = vcombine.high %v1121_v30, %v1121_v30 }
 0x231   :  { %5586 = vpow2.f32 %v4968_v9  ;;  %v4973_v18 = vmul.f32 -1.442695, %v1024_v10  ;;  %v1155_v1 = vadd.f32 %v1121_v30, %v1081_v16  ;;  %v1159_v28 = vadd.f32 %v1128_v20, %v1085_v24 }
 0x232   :  { %5588 = vpow2.f32 %v4969_v11  ;;  %v1145_v49 = vcombine.high %v1135_v53, %v1135_v53  ;;  %v1156_v55 = vadd.f32 %v1135_v53, %v1082_v19  ;;  %v1157_v50 = vadd.f32 %v1143_v46, %v1083_v21 }
 0x233   :  { %5590 = vpow2.f32 %v4970_v12  ;;  %v4974_v32 = vmul.f32 -1.442695, %v1155_v1  ;;  %v1142_v45 = vrot.slane %v1114_v33, %v6623_v54  ;;  %v1086_v22 = vrot.slane %v6850_v63, 1 }
 0x234   :  { %5592 = vpow2.f32 %v4971_v14  ;;  %v1158_v58 = vadd.f32 %v1145_v49, %v1084_v38  ;;  %v4975_v62 = vmul.f32 -1.442695, %v1156_v55  ;;  %v4976_v35 = vmul.f32 -1.442695, %v1157_v50 }
 0x235   :  { %5594 = vpow2.f32 %v4972_v15  ;;  %v4978_v36 = vmul.f32 -1.442695, %v1159_v28  ;;  %v1087_v52 = vrot.slane %v6852_v40, 1  ;;  %v1144_v57 = vcombine.high %v1128_v20, %v1128_v20 }
 0x236   :  { %5596 = vpow2.f32 %v4973_v18  ;;  %v4977_v0 = vmul.f32 -1.442695, %v1158_v58  ;;  %v1211_v4 = vadd.f32 %v8142_v3, %v6833_v51  ;;  %v1088_v5 = vrot.slane %v6857_v61, 1 }
 0x237   :  { %5598 = vpow2.f32 %v4974_v32  ;;  %v1146_v6 = vcombine.high %v1142_v45, %v1142_v45  ;;  %v1160_v11 = vadd.f32 %v1142_v45, %v1086_v22  ;;  %v1161_v14 = vadd.f32 %v1144_v57, %v1087_v52 }
 0x238   :  { %5600 = vpow2.f32 %v4975_v62  ;;  %v1213_v17 = vcombine.high %v1211_v4, %v1211_v4  ;;  %v1220_v21 = vrot.slane %v1211_v4, %v6623_v54  ;;  %v1278_v62 = vrot.slane %v6836_v48, 2 }
 0x239   :  { %5602 = vpow2.f32 %v4976_v35  ;;  %v1162_v51 = vadd.f32 %v1146_v6, %v1088_v5  ;;  %v4979_v30 = vmul.f32 -1.442695, %v1160_v11  ;;  %v4980_v20 = vmul.f32 -1.442695, %v1161_v14 }
 0x23a   :  { %5604 = vpow2.f32 %v4977_v0  ;;  %v1227_v33 = vrot.slane %v1213_v17, %v6623_v54  ;;  %v1228_v46 = vcombine.high %v1220_v21, %v1220_v21  ;;  %v1236_v32 = vrot.slane %v1220_v21, %v6623_v54 }
 0x23b   :  { %v5583_v47 = vpop.eup %5582  ;;  %v4981_v53 = vmul.f32 -1.442695, %v1162_v51  ;;  %v1279_v0 = vrot.slane %v6840_v29, 2 }
 0x23c   :  { %v1049_v31 = vadd.f32 1.0, %v5583_v47  ;;  %v1229_v28 = vcombine.high %v1227_v33, %v1227_v33  ;;  %v1250_v35 = vrot.slane %v1228_v46, %v6623_v54  ;;  %v1243_v3 = vrot.slane %v1227_v33, %v6623_v54 }
 0x23d   :  { %v5585_v2 = vpop.eup %5584  ;;  %v1258_v6 = vcombine.high %v1236_v32, %v1236_v32 }
 0x23e   :  { %v5587_v7 = vpop.eup %5586  ;;  %v1050_v8 = vadd.f32 1.0, %v5585_v2  ;;  %5606 = vrcp.f32 %v1049_v31  ;;  %v1281_v31 = vrot.slane %v6844_v34, 2  ;;  %v1282_v2 = vrot.slane %v6846_v26, 2 }
 0x23f   :  { %v5589_v9 = vpop.eup %5588  ;;  %v1051_v10 = vadd.f32 1.0, %v5587_v7  ;;  %5608 = vpow2.f32 %v4978_v36  ;;  %v1280_v36 = vrot.slane %v6842_v44, 2  ;;  %v1257_v48 = vrot.slane %v1229_v28, %v6623_v54 }
 0x240   :  { %v5591_v12 = vpop.eup %5590  ;;  %v1052_v13 = vadd.f32 1.0, %v5589_v9  ;;  %5610 = vrcp.f32 %v1050_v8  ;;  %v1260_v29 = vcombine.high %v1250_v35, %v1250_v35  ;;  %v1284_v26 = vrot.slane %v6852_v40, 2 }
 0x241   :  { %v5593_v15 = vpop.eup %5592  ;;  %v1053_v16 = vadd.f32 1.0, %v5591_v12  ;;  %5612 = vrcp.f32 %v1051_v10  ;;  %v1283_v10 = vrot.slane %v6850_v63, 2  ;;  %v1259_v17 = vcombine.high %v1243_v3, %v1243_v3 }
 0x242   :  { %v5595_v18 = vpop.eup %5594  ;;  %v1054_v19 = vadd.f32 1.0, %v5593_v15  ;;  %5614 = vrcp.f32 %v1052_v13  ;;  %v1285_v13 = vrot.slane %v6857_v61, 2  ;;  %v1261_v21 = vcombine.high %v1257_v48, %v1257_v48 }
 0x243   :  { %v5597_v24 = vpop.eup %5596  ;;  %v1055_v27 = vadd.f32 1.0, %v5595_v18  ;;  %5616 = vrcp.f32 %v1053_v16 }
 0x244   :  { %v1056_v38 = vadd.f32 1.0, %v5597_v24  ;;  %5618 = vrcp.f32 %v1054_v19  ;;  %v5599_v1 = vpop.eup %5598 }
 0x245   :  { %5620 = vrcp.f32 %v1055_v27  ;;  %v5601_v49 = vpop.eup %5600  ;;  %v1187_v55 = vadd.f32 1.0, %v5599_v1 }
 0x246   :  { %5622 = vrcp.f32 %v1056_v38  ;;  %v5603_v50 = vpop.eup %5602  ;;  %v1188_v45 = vadd.f32 1.0, %v5601_v49 }
 0x247   :  { %5624 = vpow2.f32 %v4979_v30  ;;  %v5605_v58 = vpop.eup %5604  ;;  %v1189_v47 = vadd.f32 1.0, %v5603_v50 }
 0x248   :  { %5626 = vpow2.f32 %v4980_v20  ;;  %v1190_v52 = vadd.f32 1.0, %v5605_v58 }
 0x249   :  { %5628 = vpow2.f32 %v4981_v53 }
 0x24a   :  { %5630 = vrcp.f32 %v1187_v55 }
 0x24b   :  { %v5607_v22 = vpop.eup %5606  ;;  %5632 = vrcp.f32 %v1188_v45 }
 0x24c   :  { %v5609_v57 = vpop.eup %5608  ;;  %v1270_v4 = vmul.f32 %v5607_v22, %v1236_v32  ;;  %5634 = vrcp.f32 %v1189_v47 }
 0x24d   :  { %v5611_v5 = vpop.eup %5610  ;;  %v1191_v7 = vadd.f32 1.0, %v5609_v57  ;;  %5636 = vrcp.f32 %v1190_v52 }
 0x24e   :  { %v5613_v8 = vpop.eup %5612  ;;  %v1271_v9 = vmul.f32 %v5611_v5, %v1250_v35  ;;  %v1294_v44 = vadd.f32 %v1278_v62, %v1270_v4 }
 0x24f   :  { %v5615_v34 = vpop.eup %5614  ;;  %v1272_v11 = vmul.f32 %v5613_v8, %v1258_v6 }
 0x250   :  { %v5617_v12 = vpop.eup %5616  ;;  %v1273_v14 = vmul.f32 %v5615_v34, %v1260_v29  ;;  %v1295_v15 = vadd.f32 %v1279_v0, %v1271_v9  ;;  %5638 = vtanh.f32 %v1294_v44 }
 0x251   :  { %v5619_v16 = vpop.eup %5618  ;;  %v1274_v51 = vmul.f32 %v5617_v12, %v1243_v3  ;;  %v1296_v18 = vadd.f32 %v1280_v36, %v1272_v11  ;;  %5640 = vrcp.f32 %v1191_v7 }
 0x252   :  { %v5621_v19 = vpop.eup %5620  ;;  %v1275_v24 = vmul.f32 %v5619_v16, %v1257_v48  ;;  %v1297_v27 = vadd.f32 %v1281_v31, %v1273_v14  ;;  %5642 = vtanh.f32 %v1295_v15 }
 0x253   :  { %v5623_v63 = vpop.eup %5622  ;;  %v1276_v40 = vmul.f32 %v5621_v19, %v1259_v17  ;;  %v1298_v30 = vadd.f32 %v1282_v2, %v1274_v51  ;;  %5644 = vtanh.f32 %v1296_v18 }
 0x254   :  { %v5625_v38 = vpop.eup %5624  ;;  %v1277_v20 = vmul.f32 %v5623_v63, %v1261_v21  ;;  %v1299_v61 = vadd.f32 %v1283_v10, %v1275_v24  ;;  %5646 = vtanh.f32 %v1297_v27 }
 0x255   :  { %v5627_v33 = vpop.eup %5626  ;;  %v1300_v53 = vadd.f32 %v1284_v26, %v1276_v40  ;;  %5648 = vtanh.f32 %v1298_v30  ;;  %v1192_v46 = vadd.f32 1.0, %v5625_v38 }
 0x256   :  { %v5629_v1 = vpop.eup %5628  ;;  %v1301_v49 = vadd.f32 %v1285_v13, %v1277_v20  ;;  %5650 = vtanh.f32 %v1299_v61  ;;  %v1193_v55 = vadd.f32 1.0, %v5627_v33  ;;  %v6933_v61 = vld [vmem:[#allocation5 + $0x168] sm:$0xff]  ;;  %v6936_v33 = vld [vmem:[#allocation5 + $0x178] sm:$0xff] }
 0x257   :  { %5652 = vtanh.f32 %v1300_v53  ;;  %v1194_v50 = vadd.f32 1.0, %v5629_v1  ;;  %v5631_v28 = vpop.eup %5630  ;;  %v6939_v53 = vld [vmem:[#allocation5 + $0x158] sm:$0xff]  ;;  %v6946_v1 = vld [vmem:[#allocation5 + $0x160] sm:$0xff] }
 0x258   :  { %5654 = vtanh.f32 %v1301_v49  ;;  %v5633_v32 = vpop.eup %5632  ;;  %v6949_v49 = vld [vmem:[#allocation5 + $0x140] sm:$0xff] }
 0x259   :  { %5656 = vrcp.f32 %v1192_v46  ;;  %v5635_v45 = vpop.eup %5634  ;;  %v6943_v46 = vld [vmem:[#allocation5 + $0x150] sm:$0xff] }
 0x25a   :  { %5658 = vrcp.f32 %v1193_v55  ;;  %v5637_v58 = vpop.eup %5636  ;;  %v6953_v55 = vld [vmem:[#allocation5 + $0x138] sm:$0xff] }
 0x25b   :  { %5660 = vrcp.f32 %v1194_v50  ;;  %v6956_v50 = vld [vmem:[#allocation5 + $0x148] sm:$0xff] }
 0x25d   :  { %v5639_v62 = vpop.eup %5638 }
 0x25e   :  { %v5641_v35 = vpop.eup %5640  ;;  %v1310_v22 = vsub.f32 %v6728_v56, %v5639_v62 }
 0x25f   :  { %v5643_v47 = vpop.eup %5642 }
 0x260   :  { %v5645_v0 = vpop.eup %5644  ;;  %v1311_v36 = vsub.f32 %v6731_v41, %v5643_v47  ;;  %v1318_v48 = vmul.f32 %v5631_v28, %v1310_v22  ;;  %v6959_v28 = vld [vmem:[#allocation5 + $0x128] sm:$0xff]  ;;  %v6983_v22 = vld [vmem:[#allocation5 + $0xf0] sm:$0xff] }
 0x261   :  { %v5647_v31 = vpop.eup %5646  ;;  %v1312_v52 = vsub.f32 %v6734_v23, %v5645_v0 }
 0x262   :  { %v5649_v57 = vpop.eup %5648  ;;  %v1313_v2 = vsub.f32 %v6737_v60, %v5647_v31  ;;  %v1319_v3 = vmul.f32 %v5633_v32, %v1311_v36  ;;  %v6909_v11 = vadd.f32 %v5639_v62, %v1318_v48  ;;  %v6963_v32 = vld [vmem:[#allocation5 + $0x120] sm:$0xff]  ;;  %v6973_v62 = vld [vmem:[#allocation5 + $0x108] sm:$0xff]  ;;  %v7016_v48 = vld [vmem:[#allocation5 + $0xb8] sm:$0xff] }
 0x263   :  { %v5651_v4 = vpop.eup %5650  ;;  %v1314_v5 = vsub.f32 %v6740_v25, %v5649_v57  ;;  %v1320_v6 = vmul.f32 %v5635_v45, %v1312_v52  ;;  %v6966_v45 = vld [vmem:[#allocation5 + $0x130] sm:$0xff]  ;;  %v6989_v36 = vld [vmem:[#allocation5 + $0xe0] sm:$0xff]  ;;  %v6996_v52 = vld [vmem:[#allocation5 + $0xe8] sm:$0xff]  ;;  %8149 = vst [vmem:[#allocation26_spill] sm:$0xff] %v7016_v48 }
 0x264   :  { %v5653_v7 = vpop.eup %5652  ;;  %v1315_v8 = vsub.f32 %v6743_v42, %v5651_v4  ;;  %v1321_v29 = vmul.f32 %v5637_v58, %v1313_v2  ;;  %v6902_v44 = vadd.f32 %v5643_v47, %v1319_v3  ;;  %v6969_v58 = vld [vmem:[#allocation5 + $0x110] sm:$0xff]  ;;  %v6979_v47 = vld [vmem:[#allocation5 + $0xf8] sm:$0xff]  ;;  %8143 = vst [vmem:[#allocation20_spill] sm:$0xff] %v6996_v52  ;;  %v7003_v2 = vld [vmem:[#allocation5 + $0xc0] sm:$0xff] }
 0x265   :  { %v5655_v56 = vpop.eup %5654  ;;  %v1316_v9 = vsub.f32 %v6748_v39, %v5653_v7  ;;  %v1322_v41 = vmul.f32 %v5641_v35, %v1314_v5  ;;  %v6905_v60 = vadd.f32 %v5645_v0, %v1320_v6  ;;  %v6976_v35 = vld [vmem:[#allocation5 + $0x118] sm:$0xff]  ;;  %v6986_v0 = vld [vmem:[#allocation5 + $0x100] sm:$0xff]  ;;  %8145 = vst [vmem:[#allocation12_spill] sm:$0xff] %v7003_v2  ;;  %v7006_v3 = vld [vmem:[#allocation5 + $0xd0] sm:$0xff] }
 0x266   :  { %v5657_v23 = vpop.eup %5656  ;;  %v1317_v34 = vsub.f32 %v6750_v37, %v5655_v56  ;;  %v6907_v10 = vadd.f32 %v5647_v31, %v1321_v29  ;;  %v1358_v37 = vcombine.low %v6909_v11, %v6902_v44  ;;  %v6993_v31 = vld [vmem:[#allocation5 + $0xd8] sm:$0xff]  ;;  %8146 = vst [vmem:[#allocation23_spill] sm:$0xff] %v7006_v3  ;;  %v7013_v5 = vld [vmem:[#allocation5 + $0xa8] sm:$0xff]  ;;  %v7029_v29 = vld [vmem:[#allocation5 + $0x80] sm:$0xff] }
 0x267   :  { %v5659_v25 = vpop.eup %5658  ;;  %v1323_v26 = vmul.f32 %v5657_v23, %v1315_v8  ;;  %v6913_v14 = vadd.f32 %v5649_v57, %v1322_v41  ;;  %v6999_v57 = vld [vmem:[#allocation5 + $0xc8] sm:$0xff]  ;;  %8148 = vst [vmem:[#allocation14_spill] sm:$0xff] %v7013_v5  ;;  %v7019_v6 = vld [vmem:[#allocation5 + $0x98] sm:$0xff]  ;;  %v7026_v8 = vld [vmem:[#allocation5 + $0xa0] sm:$0xff] }
 0x268   :  { %v5661_v12 = vpop.eup %5660  ;;  %v1324_v42 = vmul.f32 %v5659_v25, %v1316_v9  ;;  %v1359_v13 = vcombine.low %v6905_v60, %v6907_v10  ;;  %v1368_v21 = vrot.slane %v1358_v37, %v6623_v54  ;;  %8144 = vst [vmem:[#allocation11_spill] sm:$0xff] %v6999_v57  ;;  %8150 = vst [vmem:[#allocation15_spill] sm:$0xff] %v7019_v6  ;;  %v7036_v9 = vld [vmem:[#allocation5 + $0x88] sm:$0xff]  ;;  %v7043_v23 = vld [vmem:[#allocation5 + $0x60] sm:$0xff] }
 0x269   :  { %v1325_v39 = vmul.f32 %v5661_v12, %v1317_v34  ;;  %v6915_v15 = vadd.f32 %v5651_v4, %v1323_v26  ;;  %v7009_v4 = vld [vmem:[#allocation5 + $0xb0] sm:$0xff]  ;;  %8152 = vst [vmem:[#allocation29_spill] sm:$0xff] %v7026_v8  ;;  %8153 = vst [vmem:[#allocation17_spill] sm:$0xff] %v7029_v29  ;;  %v7039_v41 = vld [vmem:[#allocation5 + $0x68] sm:$0xff] }
 0x26a   :  { %v6919_v16 = vadd.f32 %v5653_v7, %v1324_v42  ;;  %v1375_v18 = vrot.slane %v1359_v13, %v6623_v54  ;;  %8147 = vst [vmem:[#allocation13_spill] sm:$0xff] %v7009_v4  ;;  %v7023_v7 = vld [vmem:[#allocation5 + $0x90] sm:$0xff]  ;;  %8155 = vst [vmem:[#allocation31_spill] sm:$0xff] %v7036_v9  ;;  %v7053_v26 = vld [vmem:[#allocation5 + $0x48] sm:$0xff] }
 0x26b   :  { %v6921_v17 = vadd.f32 %v5655_v56, %v1325_v39  ;;  %v1360_v51 = vcombine.low %v6913_v14, %v6915_v15  ;;  %8151 = vst [vmem:[#allocation16_spill] sm:$0xff] %v7023_v7  ;;  %v7033_v56 = vld [vmem:[#allocation5 + $0x78] sm:$0xff]  ;;  %8156 = vst [vmem:[#allocation19_spill] sm:$0xff] %v7039_v41  ;;  %v7046_v34 = vld [vmem:[#allocation5 + $0x70] sm:$0xff] }
 0x26c   :  { %v1390_v63 = vcombine.low %v1368_v21, %v1375_v18  ;;  %8154 = vst [vmem:[#allocation18_spill] sm:$0xff] %v7033_v56  ;;  %8157 = vst [vmem:[#allocation21_spill] sm:$0xff] %v7043_v23  ;;  %v7049_v25 = vld [vmem:[#allocation5 + $0x50] sm:$0xff]  ;;  %v7056_v12 = vld [vmem:[#allocation5 + $0x58] sm:$0xff] }
 0x26d   :  { %v1361_v19 = vcombine.low %v6919_v16, %v6921_v17  ;;  %v1382_v24 = vrot.slane %v1360_v51, %v6623_v54  ;;  %8158 = vst [vmem:[#allocation32_spill] sm:$0xff] %v7046_v34  ;;  %8159 = vst [vmem:[#allocation22_spill] sm:$0xff] %v7049_v25  ;;  %v7059_v42 = vld [vmem:[#allocation5 + $0x38] sm:$0xff]  ;;  %v7063_v13 = vld [vmem:[#allocation5 + $0x30] sm:$0xff] }
 0x26e   :  { %v1398_v30 = vrot.slane %v1390_v63, %v6623_v54  ;;  %8160 = vst [vmem:[#allocation24_spill] sm:$0xff] %v7053_v26  ;;  %8161 = vst [vmem:[#allocation33_spill] sm:$0xff] %v7056_v12  ;;  %v7066_v39 = vld [vmem:[#allocation5 + $0x40] sm:$0xff]  ;;  %v7073_v51 = vld [vmem:[#allocation5 + $0x18] sm:$0xff] }
 0x26f   :  { %v1389_v27 = vrot.slane %v1361_v19, %v6623_v54  ;;  %8162 = vst [vmem:[#allocation25_spill] sm:$0xff] %v7059_v42  ;;  %8163 = vst [vmem:[#allocation27_spill] sm:$0xff] %v7063_v13  ;;  %v7069_v37 = vld [vmem:[#allocation5 + $0x20] sm:$0xff]  ;;  %v7076_v18 = vld [vmem:[#allocation5 + $0x28] sm:$0xff] }
 0x270   :  { %8164 = vst [vmem:[#allocation34_spill] sm:$0xff] %v7066_v39  ;;  %8165 = vst [vmem:[#allocation28_spill] sm:$0xff] %v7069_v37  ;;  %v7079_v19 = vld [vmem:[#allocation5 + $0x8] sm:$0xff]  ;;  %v7083_v21 = vld [vmem:[#allocation5] sm:$0xff] }
 0x271   :  { %v1391_v40 = vcombine.low %v1382_v24, %v1389_v27  ;;  %8166 = vst [vmem:[#allocation30_spill] sm:$0xff] %v7073_v51  ;;  %8167 = vst [vmem:[#allocation35_spill] sm:$0xff] %v7076_v18  ;;  %v7087_v24 = vld [vmem:[#allocation5 + $0x10] sm:$0xff] }
 0x272   :  { %8168 = vst [vmem:[#allocation36_spill] sm:$0xff] %v7079_v19  ;;  %8169 = vst [vmem:[#allocation37_spill] sm:$0xff] %v7083_v21 }
 0x273   :  { %v1405_v38 = vrot.slane %v1391_v40, %v6623_v54  ;;  %8170 = vst [vmem:[#allocation38_spill] sm:$0xff] %v7087_v24 }
 0x275   :  { %v1406_v20 = vcombine.low %v1398_v30, %v1405_v38 }
 0x277   :  { %1473 = vmatmul.mubr.f32.vlgmr.msra.gmra.mxu0 %v1406_v20  ;;  %5317 = vmatmul.mubr.f32.vlgmr.msra.gmra.mxu1 %v1406_v20  ;;  %v7097_v20 = vld [vmem:[#allocation2 + $0x2] ss:$8 sm:$0x7] }
 0x278   :  { %1999 = vmatpush1.msra.mxu0 %v6933_v61  ;;  %5320 = vmatpush3.msra.mxu1 %v6936_v33 }
 0x279   :  { %2000 = vmatprep.subr.mxu0 %v6939_v53  ;;  %5321 = vmatprep.subr.mxu1 %v8116_v43 }
 0x27a   :  { %2001 = vmatpush1.msra.mxu0 %v6943_v46  ;;  %5322 = vmatpush3.msra.mxu1 %v6946_v1 }
 0x27b   :  { %2002 = vmatprep.subr.mxu0 %v6949_v49  ;;  %5323 = vmatprep.subr.mxu1 %v8116_v43 }
 0x27c   :  { %2003 = vmatpush1.msra.mxu0 %v6953_v55  ;;  %5324 = vmatpush3.msra.mxu1 %v6956_v50 }
 0x27d   :  { %2004 = vmatprep.subr.mxu0 %v6959_v28  ;;  %5325 = vmatprep.subr.mxu1 %v8116_v43 }
 0x27e   :  { %2005 = vmatpush1.msra.mxu0 %v6963_v32  ;;  %5326 = vmatpush3.msra.mxu1 %v6966_v45 }
 0x27f   :  { %2006 = vmatprep.subr.mxu0 %v6969_v58  ;;  %5327 = vmatprep.subr.mxu1 %v8116_v43 }
 0x280   :  { %2007 = vmatpush1.msra.mxu0 %v6973_v62  ;;  %5328 = vmatpush3.msra.mxu1 %v6976_v35 }
 0x281   :  { %2008 = vmatprep.subr.mxu0 %v6979_v47  ;;  %5329 = vmatprep.subr.mxu1 %v8116_v43 }
 0x282   :  { %2009 = vmatpush1.msra.mxu0 %v6983_v22  ;;  %5330 = vmatpush3.msra.mxu1 %v6986_v0 }
 0x283   :  { %2010 = vmatprep.subr.mxu0 %v6989_v36  ;;  %5331 = vmatprep.subr.mxu1 %v8116_v43 }
 0x284   :  { %2011 = vmatpush1.msra.mxu0 %v6993_v31  ;;  %5332 = vmatpush3.msra.mxu1 %v6996_v52 }
 0x285   :  { %2012 = vmatprep.subr.mxu0 %v6999_v57  ;;  %5333 = vmatprep.subr.mxu1 %v8116_v43 }
 0x286   :  { %2013 = vmatpush1.msra.mxu0 %v7003_v2  ;;  %5334 = vmatpush3.msra.mxu1 %v7006_v3 }
 0x287   :  { %2014 = vmatprep.subr.mxu0 %v7009_v4  ;;  %5335 = vmatprep.subr.mxu1 %v8116_v43  ;;  %v1671_v4 = vrot.slane %v7097_v20, 1 }
 0x288   :  { %2015 = vmatpush1.msra.mxu0 %v7013_v5  ;;  %5336 = vmatpush3.msra.mxu1 %v7016_v48 }
 0x289   :  { %2016 = vmatprep.subr.mxu0 %v7019_v6  ;;  %5337 = vmatprep.subr.mxu1 %v8116_v43 }
 0x28a   :  { %2017 = vmatpush1.msra.mxu0 %v7023_v7  ;;  %5338 = vmatpush3.msra.mxu1 %v7026_v8 }
 0x28b   :  { %2018 = vmatprep.subr.mxu0 %v7029_v29  ;;  %5339 = vmatprep.subr.mxu1 %v8116_v43 }
 0x28c   :  { %2019 = vmatpush1.msra.mxu0 %v7033_v56  ;;  %5340 = vmatpush3.msra.mxu1 %v7036_v9 }
 0x28d   :  { %2020 = vmatprep.subr.mxu0 %v7039_v41  ;;  %5341 = vmatprep.subr.mxu1 %v8116_v43  ;;  %v7118_v41 = vld [vmem:[#allocation2 + $0xaa] ss:$8 sm:$0x7] }
 0x28e   :  { %2021 = vmatpush1.msra.mxu0 %v7043_v23  ;;  %5342 = vmatpush3.msra.mxu1 %v7046_v34 }
 0x28f   :  { %2022 = vmatprep.subr.mxu0 %v7049_v25  ;;  %5343 = vmatprep.subr.mxu1 %v8116_v43 }
 0x290   :  { %2023 = vmatpush1.msra.mxu0 %v7053_v26  ;;  %5344 = vmatpush3.msra.mxu1 %v7056_v12  ;;  %v7111_v12 = vld [vmem:[#allocation2 + $0x7a] ss:$8 sm:$0x7] }
 0x291   :  { %2024 = vmatprep.subr.mxu0 %v7059_v42  ;;  %5345 = vmatprep.subr.mxu1 %v8116_v43 }
 0x292   :  { %2025 = vmatpush1.msra.mxu0 %v7063_v13  ;;  %5346 = vmatpush3.msra.mxu1 %v7066_v39 }
 0x293   :  { %2026 = vmatprep.subr.mxu0 %v7069_v37  ;;  %5347 = vmatprep.subr.mxu1 %v8116_v43  ;;  %v7107_v37 = vld [vmem:[#allocation2 + $0x62] ss:$8 sm:$0x7] }
 0x294   :  { %2027 = vmatpush1.msra.mxu0 %v7073_v51  ;;  %5348 = vmatpush3.msra.mxu1 %v7076_v18  ;;  %v7101_v18 = vld [vmem:[#allocation2 + $0x1a] ss:$8 sm:$0x7] }
 0x295   :  { %2028 = vmatprep.subr.mxu0 %v7079_v19  ;;  %5349 = vmatprep.subr.mxu1 %v8116_v43  ;;  %v7103_v51 = vld [vmem:[#allocation2 + $0x32] ss:$8 sm:$0x7] }
 0x296   :  { %2029 = vmatpush1.msra.mxu0 %v7083_v21  ;;  %2062 = vmatprep.mubr.f32.mxu0 %v8116_v43 }
 0x297   :  { %5350 = vmatpush3.msra.mxu1 %v7087_v24  ;;  %5351 = vmatprep.mubr.msk.f32.mxu1 %vm6360_vm0, %v8116_v43 }
 0x298   :  { %2588 = vmatprep.subr.mxu0 %v6829_v59  ;;  %5354 = vmatprep.subr.mxu1 %v8116_v43  ;;  %v7105_v59 = vld [vmem:[#allocation2 + $0x4a] ss:$8 sm:$0x7] }
 0x337   :  { %v1474_v27 = vpop.f32.mrf.mxu0  ;;  %v7094_v63 = vpop.f32.mrf.mxu1 }
 0x338   :  { %v1550_v40 = vcombine.high %v1474_v27, %v1474_v27  ;;  %v1557_v30 = vrot.slane %v1474_v27, %v6623_v54 }
 0x339   :  { %v5318_v38 = vpop.f32.mrf.mxu1  ;;  %v1476_v42 = vpop.f32.mrf.mxu0 }
 0x33a   :  { %v1564_v21 = vrot.slane %v1550_v40, %v6623_v54  ;;  %v1565_v19 = vcombine.high %v1557_v30, %v1557_v30  ;;  %v1573_v24 = vrot.slane %v1557_v30, %v6623_v54  ;;  %v7113_v40 = vld [vmem:[#allocation2 + $0x92] ss:$8 sm:$0x7]  ;;  %v1688_v56 = vcombine.high %v1476_v42, %v1476_v42 }
 0x33c   :  { %v1566_v39 = vcombine.high %v1564_v21, %v1564_v21  ;;  %v1580_v13 = vrot.slane %v1564_v21, %v6623_v54  ;;  %v1587_v27 = vrot.slane %v1565_v19, %v6623_v54  ;;  %v1595_v38 = vcombine.high %v1573_v24, %v1573_v24 }
 0x33d   :  { %v1607_v30 = vadd.f32 %v1573_v24, %v7097_v20 }
 0x33e   :  { %v1594_v26 = vrot.slane %v1566_v39, %v6623_v54  ;;  %v1596_v25 = vcombine.high %v1580_v13, %v1580_v13  ;;  %v1597_v34 = vcombine.high %v1587_v27, %v1587_v27  ;;  %v1608_v23 = vadd.f32 %v1587_v27, %v7101_v18 }
 0x33f   :  { %v1609_v21 = vadd.f32 %v1595_v38, %v7103_v51  ;;  %v1611_v19 = vadd.f32 %v1580_v13, %v7107_v37  ;;  %v4982_v9 = vmul.f32 -1.442695, %v1607_v30  ;;  %v1695_v38 = vrot.slane %v1476_v42, %v6623_v54 }
 0x340   :  { %v1598_v29 = vcombine.high %v1594_v26, %v1594_v26  ;;  %v1610_v8 = vadd.f32 %v1597_v34, %v7105_v59  ;;  %v1612_v7 = vadd.f32 %v1594_v26, %v7111_v12  ;;  %v1613_v24 = vadd.f32 %v1596_v25, %v7113_v40 }
 0x341   :  { %5662 = vpow2.f32 %v4982_v9  ;;  %v4983_v39 = vmul.f32 -1.442695, %v1608_v23  ;;  %v4984_v6 = vmul.f32 -1.442695, %v1609_v21  ;;  %v4986_v5 = vmul.f32 -1.442695, %v1611_v19 }
 0x342   :  { %v1614_v27 = vadd.f32 %v1598_v29, %v7118_v41  ;;  %v4985_v48 = vmul.f32 -1.442695, %v1610_v8  ;;  %v4987_v13 = vmul.f32 -1.442695, %v1612_v7  ;;  %v4988_v30 = vmul.f32 -1.442695, %v1613_v24 }
 0x343   :  { %5664 = vpow2.f32 %v4983_v39  ;;  %v1702_v34 = vrot.slane %v1688_v56, %v6623_v54  ;;  %v1672_v9 = vrot.slane %v7101_v18, 1  ;;  %v1673_v23 = vrot.slane %v7103_v51, 1 }
 0x344   :  { %5666 = vpow2.f32 %v4984_v6  ;;  %v4989_v26 = vmul.f32 -1.442695, %v1614_v27  ;;  %v1675_v8 = vrot.slane %v7107_v37, 1  ;;  %v1703_v29 = vcombine.high %v1695_v38, %v1695_v38 }
 0x345   :  { %5668 = vpow2.f32 %v4985_v48  ;;  %v1711_v25 = vrot.slane %v1695_v38, %v6623_v54  ;;  %v1674_v6 = vrot.slane %v7105_v59, 1  ;;  %v1718_v7 = vrot.slane %v1702_v34, %v6623_v54 }
 0x346   :  { %5670 = vpow2.f32 %v4986_v5  ;;  %v1704_v42 = vcombine.high %v1702_v34, %v1702_v34  ;;  %v1725_v48 = vrot.slane %v1703_v29, %v6623_v54 }
 0x347   :  { %5672 = vpow2.f32 %v4987_v13  ;;  %v1733_v56 = vcombine.high %v1711_v25, %v1711_v25  ;;  %v1745_v21 = vadd.f32 %v1711_v25, %v1671_v4  ;;  %v1749_v39 = vadd.f32 %v1718_v7, %v1675_v8 }
 0x348   :  { %5674 = vpow2.f32 %v4988_v30  ;;  %v1735_v19 = vcombine.high %v1725_v48, %v1725_v48  ;;  %v1746_v24 = vadd.f32 %v1725_v48, %v1672_v9  ;;  %v1732_v3 = vrot.slane %v1704_v42, %v6623_v54 }
 0x349   :  { %5676 = vpow2.f32 %v4989_v26  ;;  %v1747_v5 = vadd.f32 %v1733_v56, %v1673_v23  ;;  %v4990_v27 = vmul.f32 -1.442695, %v1745_v21  ;;  %v1676_v30 = vrot.slane %v7111_v12, 1  ;;  %v7142_v23 = vld [vmem:[%s8004_s2] ss:$0 sm:$0xff] }
 0x34a   :  { %v1748_v38 = vadd.f32 %v1735_v19, %v1674_v6  ;;  %v4991_v13 = vmul.f32 -1.442695, %v1746_v24  ;;  %v4994_v29 = vmul.f32 -1.442695, %v1749_v39  ;;  %v1677_v4 = vrot.slane %v7113_v40, 1 }
 0x34b   :  { %v4992_v2 = vmul.f32 -1.442695, %v1747_v5  ;;  %5678 = vpow2.f32 %v4990_v27  ;;  %v1734_v26 = vcombine.high %v1718_v7, %v1718_v7  ;;  %v1801_v8 = vadd.f32 %v7142_v23, %v7094_v63 }
 0x34c   :  { %5680 = vpow2.f32 %v4991_v13  ;;  %v4993_v34 = vmul.f32 -1.442695, %v1748_v38  ;;  %v1678_v25 = vrot.slane %v7118_v41, 1  ;;  %v1736_v6 = vcombine.high %v1732_v3, %v1732_v3 }
 0x34d   :  { %5682 = vpow2.f32 %v4992_v2  ;;  %v1750_v7 = vadd.f32 %v1732_v3, %v1676_v30  ;;  %v1751_v19 = vadd.f32 %v1734_v26, %v1677_v4  ;;  %v1803_v39 = vcombine.high %v1801_v8, %v1801_v8 }
 0x34e   :  { %v5663_v57 = vpop.eup %5662  ;;  %5684 = vpow2.f32 %v4993_v34  ;;  %v1752_v63 = vadd.f32 %v1736_v6, %v1678_v25  ;;  %v1810_v13 = vrot.slane %v1801_v8, %v6623_v54 }
 0x34f   :  { %v1639_v52 = vadd.f32 1.0, %v5663_v57  ;;  %v4996_v30 = vmul.f32 -1.442695, %v1751_v19 }
 0x350   :  { %v5665_v9 = vpop.eup %5664  ;;  %v4997_v4 = vmul.f32 -1.442695, %v1752_v63  ;;  %v1818_v26 = vcombine.high %v1810_v13, %v1810_v13  ;;  %v1871_v63 = vrot.slane %v7105_v59, 2 }
 0x351   :  { %v5667_v42 = vpop.eup %5666  ;;  %v1640_v48 = vadd.f32 1.0, %v5665_v9  ;;  %5686 = vrcp.f32 %v1639_v52  ;;  %v4995_v9 = vmul.f32 -1.442695, %v1750_v7 }
 0x352   :  { %v5669_v57 = vpop.eup %5668  ;;  %v1641_v56 = vadd.f32 1.0, %v5667_v42  ;;  %5688 = vpow2.f32 %v4994_v29  ;;  %v1817_v29 = vrot.slane %v1803_v39, %v6623_v54  ;;  %v1870_v39 = vrot.slane %v7103_v51, 2 }
 0x353   :  { %v5671_v2 = vpop.eup %5670  ;;  %v1642_v21 = vadd.f32 1.0, %v5669_v57  ;;  %5690 = vrcp.f32 %v1640_v48  ;;  %v1826_v57 = vrot.slane %v1810_v13, %v6623_v54 }
 0x354   :  { %v5673_v24 = vpop.eup %5672  ;;  %v1643_v5 = vadd.f32 1.0, %v5671_v2  ;;  %5692 = vrcp.f32 %v1641_v56  ;;  %v1819_v8 = vcombine.high %v1817_v29, %v1817_v29  ;;  %v1868_v2 = vrot.slane %v7097_v20, 2 }
 0x355   :  { %v5675_v27 = vpop.eup %5674  ;;  %v1644_v38 = vadd.f32 1.0, %v5673_v24  ;;  %5694 = vrcp.f32 %v1642_v21  ;;  %v1840_v21 = vrot.slane %v1818_v26, %v6623_v54  ;;  %v1833_v13 = vrot.slane %v1817_v29, %v6623_v54 }
 0x356   :  { %v5677_v34 = vpop.eup %5676  ;;  %v1645_v52 = vadd.f32 1.0, %v5675_v27  ;;  %5696 = vrcp.f32 %v1643_v5  ;;  %v1869_v5 = vrot.slane %v7101_v18, 2  ;;  %v1847_v20 = vrot.slane %v1819_v8, %v6623_v54 }
 0x357   :  { %v1646_v3 = vadd.f32 1.0, %v5677_v34  ;;  %5698 = vrcp.f32 %v1644_v38  ;;  %v1872_v34 = vrot.slane %v7107_v37, 2  ;;  %v1850_v18 = vcombine.high %v1840_v21, %v1840_v21 }
 0x358   :  { %5700 = vrcp.f32 %v1645_v52  ;;  %v5679_v42 = vpop.eup %5678  ;;  %v1874_v37 = vrot.slane %v7113_v40, 2 }
 0x359   :  { %5702 = vrcp.f32 %v1646_v3  ;;  %v5681_v25 = vpop.eup %5680  ;;  %v1777_v6 = vadd.f32 1.0, %v5679_v42  ;;  %v1848_v3 = vcombine.high %v1826_v57, %v1826_v57  ;;  %v1873_v42 = vrot.slane %v7111_v12, 2 }
 0x35a   :  { %5704 = vpow2.f32 %v4995_v9  ;;  %v5683_v48 = vpop.eup %5682  ;;  %v1778_v56 = vadd.f32 1.0, %v5681_v25 }
 0x35b   :  { %5706 = vpow2.f32 %v4996_v30  ;;  %v5685_v7 = vpop.eup %5684  ;;  %v1779_v19 = vadd.f32 1.0, %v5683_v48 }
 0x35c   :  { %5708 = vpow2.f32 %v4997_v4  ;;  %v1780_v27 = vadd.f32 1.0, %v5685_v7 }
 0x35d   :  { %5710 = vrcp.f32 %v1777_v6  ;;  %v1875_v6 = vrot.slane %v7118_v41, 2 }
 0x35e   :  { %v5687_v24 = vpop.eup %5686  ;;  %5712 = vrcp.f32 %v1778_v56  ;;  %v1849_v56 = vcombine.high %v1833_v13, %v1833_v13 }
 0x35f   :  { %v5689_v38 = vpop.eup %5688  ;;  %v1860_v52 = vmul.f32 %v5687_v24, %v1826_v57  ;;  %5714 = vrcp.f32 %v1779_v19 }
 0x360   :  { %v5691_v9 = vpop.eup %5690  ;;  %v1781_v30 = vadd.f32 1.0, %v5689_v38  ;;  %5716 = vrcp.f32 %v1780_v27 }
 0x361   :  { %v5693_v4 = vpop.eup %5692  ;;  %v1861_v26 = vmul.f32 %v5691_v9, %v1840_v21  ;;  %v1884_v51 = vadd.f32 %v1868_v2, %v1860_v52  ;;  %v1851_v21 = vcombine.high %v1847_v20, %v1847_v20 }
 0x362   :  { %v5695_v59 = vpop.eup %5694  ;;  %v1862_v25 = vmul.f32 %v5693_v4, %v1848_v3 }
 0x363   :  { %v5697_v29 = vpop.eup %5696  ;;  %v1863_v48 = vmul.f32 %v5695_v59, %v1850_v18  ;;  %v1885_v8 = vadd.f32 %v1869_v5, %v1861_v26  ;;  %5718 = vtanh.f32 %v1884_v51 }
 0x364   :  { %v5699_v57 = vpop.eup %5698  ;;  %v1864_v7 = vmul.f32 %v5697_v29, %v1833_v13  ;;  %v1886_v24 = vadd.f32 %v1870_v39, %v1862_v25  ;;  %5720 = vrcp.f32 %v1781_v30 }
 0x365   :  { %v5701_v2 = vpop.eup %5700  ;;  %v1865_v19 = vmul.f32 %v5699_v57, %v1847_v20  ;;  %v1887_v38 = vadd.f32 %v1871_v63, %v1863_v48  ;;  %5722 = vtanh.f32 %v1885_v8 }
 0x366   :  { %v5703_v12 = vpop.eup %5702  ;;  %v1866_v40 = vmul.f32 %v5701_v2, %v1849_v56  ;;  %v1888_v52 = vadd.f32 %v1872_v34, %v1864_v7  ;;  %5724 = vtanh.f32 %v1886_v24 }
 0x367   :  { %v5705_v27 = vpop.eup %5704  ;;  %v1867_v9 = vmul.f32 %v5703_v12, %v1851_v21  ;;  %v1889_v41 = vadd.f32 %v1873_v42, %v1865_v19  ;;  %5726 = vtanh.f32 %v1887_v38 }
 0x368   :  { %v5707_v5 = vpop.eup %5706  ;;  %v1890_v3 = vadd.f32 %v1874_v37, %v1866_v40  ;;  %5728 = vtanh.f32 %v1888_v52  ;;  %v1782_v4 = vadd.f32 1.0, %v5705_v27 }
 0x369   :  { %v5709_v13 = vpop.eup %5708  ;;  %v1891_v39 = vadd.f32 %v1875_v6, %v1867_v9  ;;  %5730 = vtanh.f32 %v1889_v41  ;;  %v1783_v30 = vadd.f32 1.0, %v5707_v5 }
 0x36a   :  { %5732 = vtanh.f32 %v1890_v3  ;;  %v1784_v20 = vadd.f32 1.0, %v5709_v13  ;;  %v5711_v63 = vpop.eup %5710 }
 0x36b   :  { %5734 = vtanh.f32 %v1891_v39  ;;  %v5713_v18 = vpop.eup %5712 }
 0x36c   :  { %5736 = vrcp.f32 %v1782_v4  ;;  %v5715_v34 = vpop.eup %5714 }
 0x36d   :  { %5738 = vrcp.f32 %v1783_v30  ;;  %v5717_v26 = vpop.eup %5716 }
 0x36e   :  { %5740 = vrcp.f32 %v1784_v20 }
 0x370   :  { %v5719_v51 = vpop.eup %5718 }
 0x371   :  { %v5721_v59 = vpop.eup %5720  ;;  %v1900_v37 = vsub.f32 %v6909_v11, %v5719_v51 }
 0x372   :  { %v5723_v42 = vpop.eup %5722 }
 0x373   :  { %v5725_v25 = vpop.eup %5724  ;;  %v1901_v29 = vsub.f32 %v6902_v44, %v5723_v42  ;;  %v1908_v2 = vmul.f32 %v5711_v63, %v1900_v37 }
 0x374   :  { %v5727_v6 = vpop.eup %5726  ;;  %v1902_v48 = vsub.f32 %v6905_v60, %v5725_v25 }
 0x375   :  { %v5729_v8 = vpop.eup %5728  ;;  %v1903_v57 = vsub.f32 %v6907_v10, %v5727_v6  ;;  %v1909_v56 = vmul.f32 %v5713_v18, %v1901_v29  ;;  %v7175_v5 = vadd.f32 %v5719_v51, %v1908_v2  ;;  %v8196_v2 = vld [vmem:[#allocation36_spill] sm:$0xff] }
 0x376   :  { %v5731_v7 = vpop.eup %5730  ;;  %v1904_v24 = vsub.f32 %v6913_v14, %v5729_v8  ;;  %v1910_v21 = vmul.f32 %v5715_v34, %v1902_v48  ;;  %v8190_v48 = vld [vmem:[#allocation25_spill] sm:$0xff] }
 0x377   :  { %v5733_v19 = vpop.eup %5732  ;;  %v1905_v38 = vsub.f32 %v6915_v15, %v5731_v7  ;;  %v1911_v12 = vmul.f32 %v5717_v26, %v1903_v57  ;;  %v7168_v52 = vadd.f32 %v5723_v42, %v1909_v56  ;;  %v8192_v57 = vld [vmem:[#allocation34_spill] sm:$0xff]  ;;  %v8193_v56 = vld [vmem:[#allocation28_spill] sm:$0xff] }
 0x378   :  { %v5735_v11 = vpop.eup %5734  ;;  %v1906_v40 = vsub.f32 %v6919_v16, %v5733_v19  ;;  %v1912_v44 = vmul.f32 %v5721_v59, %v1904_v24  ;;  %v7171_v10 = vadd.f32 %v5725_v25, %v1910_v21  ;;  %v8195_v24 = vld [vmem:[#allocation35_spill] sm:$0xff]  ;;  %v8197_v21 = vld [vmem:[#allocation37_spill] sm:$0xff] }
 0x379   :  { %v5737_v60 = vpop.eup %5736  ;;  %v1907_v27 = vsub.f32 %v6921_v17, %v5735_v11  ;;  %v7173_v9 = vadd.f32 %v5727_v6, %v1911_v12  ;;  %v1948_v17 = vcombine.low %v7175_v5, %v7168_v52 }
 0x37a   :  { %v5739_v14 = vpop.eup %5738  ;;  %v1913_v41 = vmul.f32 %v5737_v60, %v1905_v38  ;;  %v7179_v13 = vadd.f32 %v5729_v8, %v1912_v44  ;;  %v8191_v8 = vld [vmem:[#allocation27_spill] sm:$0xff]  ;;  %v7264_v38 = vld [vmem:[#allocation5 + $0x170] sm:$0xff] }
 0x37b   :  { %v5741_v3 = vpop.eup %5740  ;;  %v1914_v15 = vmul.f32 %v5739_v14, %v1906_v40  ;;  %v1949_v4 = vcombine.low %v7171_v10, %v7173_v9  ;;  %v1958_v26 = vrot.slane %v1948_v17, %v6623_v54  ;;  %v7281_v17 = vld [vmem:[#allocation2 + $0x63] ss:$8 sm:$0x7] }
 0x37c   :  { %v1915_v16 = vmul.f32 %v5741_v3, %v1907_v27  ;;  %v7181_v39 = vadd.f32 %v5731_v7, %v1913_v41  ;;  %v8194_v7 = vld [vmem:[#allocation30_spill] sm:$0xff] }
 0x37d   :  { %v7185_v30 = vadd.f32 %v5733_v19, %v1914_v15  ;;  %v1965_v18 = vrot.slane %v1949_v4, %v6623_v54  ;;  %v8198_v19 = vld [vmem:[#allocation38_spill] sm:$0xff] }
 0x37e   :  { %v7187_v20 = vadd.f32 %v5735_v11, %v1915_v16  ;;  %v1950_v63 = vcombine.low %v7179_v13, %v7181_v39  ;;  %v7271_v27 = vld [vmem:[#allocation2 + $0x3] ss:$8 sm:$0x7] }
 0x37f   :  { %v1980_v42 = vcombine.low %v1958_v26, %v1965_v18  ;;  %v7275_v15 = vld [vmem:[#allocation2 + $0x1b] ss:$8 sm:$0x7] }
 0x380   :  { %v1951_v34 = vcombine.low %v7185_v30, %v7187_v20  ;;  %v1972_v51 = vrot.slane %v1950_v63, %v6623_v54  ;;  %v7277_v4 = vld [vmem:[#allocation2 + $0x33] ss:$8 sm:$0x7] }
 0x381   :  { %v1988_v25 = vrot.slane %v1980_v42, %v6623_v54  ;;  %v7279_v16 = vld [vmem:[#allocation2 + $0x4b] ss:$8 sm:$0x7] }
 0x382   :  { %v1979_v59 = vrot.slane %v1951_v34, %v6623_v54  ;;  %v7287_v42 = vld [vmem:[#allocation2 + $0x93] ss:$8 sm:$0x7] }
 0x384   :  { %v1981_v37 = vcombine.low %v1972_v51, %v1979_v59  ;;  %v7285_v59 = vld [vmem:[#allocation2 + $0x7b] ss:$8 sm:$0x7] }
 0x386   :  { %v1995_v29 = vrot.slane %v1981_v37, %v6623_v54 }
 0x388   :  { %v1996_v6 = vcombine.low %v1988_v25, %v1995_v29 }
 0x38a   :  { %2063 = vmatmul.mubr.f32.vlgmr.msra.gmra.mxu0 %v1996_v6  ;;  %5352 = vmatmul.mubr.f32.vlgmr.msra.gmra.mxu1 %v1996_v6 }
 0x38b   :  { %2589 = vmatpush1.msra.mxu0 %v6933_v61  ;;  %5355 = vmatpush3.msra.mxu1 %v6936_v33  ;;  %v8171_v61 = vld [vmem:[#allocation20_spill] sm:$0xff]  ;;  %v8172_v33 = vld [vmem:[#allocation11_spill] sm:$0xff] }
 0x38c   :  { %2590 = vmatprep.subr.mxu0 %v6939_v53  ;;  %5356 = vmatprep.subr.mxu1 %v8116_v43  ;;  %v8173_v53 = vld [vmem:[#allocation12_spill] sm:$0xff] }
 0x38d   :  { %2591 = vmatpush1.msra.mxu0 %v6943_v46  ;;  %5357 = vmatpush3.msra.mxu1 %v6946_v1  ;;  %v8174_v46 = vld [vmem:[#allocation23_spill] sm:$0xff]  ;;  %v8175_v1 = vld [vmem:[#allocation13_spill] sm:$0xff] }
 0x38e   :  { %2592 = vmatprep.subr.mxu0 %v6949_v49  ;;  %5358 = vmatprep.subr.mxu1 %v8116_v43  ;;  %v8176_v49 = vld [vmem:[#allocation14_spill] sm:$0xff] }
 0x38f   :  { %2593 = vmatpush1.msra.mxu0 %v6953_v55  ;;  %5359 = vmatpush3.msra.mxu1 %v6956_v50  ;;  %v8177_v55 = vld [vmem:[#allocation26_spill] sm:$0xff]  ;;  %v8178_v50 = vld [vmem:[#allocation15_spill] sm:$0xff] }
 0x390   :  { %2594 = vmatprep.subr.mxu0 %v6959_v28  ;;  %5360 = vmatprep.subr.mxu1 %v8116_v43  ;;  %v8179_v28 = vld [vmem:[#allocation16_spill] sm:$0xff] }
 0x391   :  { %2595 = vmatpush1.msra.mxu0 %v6963_v32  ;;  %5361 = vmatpush3.msra.mxu1 %v6966_v45  ;;  %v8180_v32 = vld [vmem:[#allocation29_spill] sm:$0xff] }
 0x392   :  { %2596 = vmatprep.subr.mxu0 %v6969_v58  ;;  %5362 = vmatprep.subr.mxu1 %v8116_v43  ;;  %v8181_v45 = vld [vmem:[#allocation17_spill] sm:$0xff]  ;;  %v8182_v58 = vld [vmem:[#allocation18_spill] sm:$0xff] }
 0x393   :  { %2597 = vmatpush1.msra.mxu0 %v6973_v62  ;;  %5363 = vmatpush3.msra.mxu1 %v6976_v35  ;;  %v8183_v62 = vld [vmem:[#allocation31_spill] sm:$0xff] }
 0x394   :  { %2598 = vmatprep.subr.mxu0 %v6979_v47  ;;  %5364 = vmatprep.subr.mxu1 %v8116_v43  ;;  %v8184_v35 = vld [vmem:[#allocation19_spill] sm:$0xff]  ;;  %v8185_v47 = vld [vmem:[#allocation21_spill] sm:$0xff] }
 0x395   :  { %2599 = vmatpush1.msra.mxu0 %v6983_v22  ;;  %5365 = vmatpush3.msra.mxu1 %v6986_v0  ;;  %v8186_v22 = vld [vmem:[#allocation32_spill] sm:$0xff]  ;;  %v8187_v0 = vld [vmem:[#allocation22_spill] sm:$0xff] }
 0x396   :  { %2600 = vmatprep.subr.mxu0 %v6989_v36  ;;  %5366 = vmatprep.subr.mxu1 %v8116_v43  ;;  %v8188_v36 = vld [vmem:[#allocation24_spill] sm:$0xff] }
 0x397   :  { %2601 = vmatpush1.msra.mxu0 %v6993_v31  ;;  %5367 = vmatpush3.msra.mxu1 %v8171_v61  ;;  %v8189_v31 = vld [vmem:[#allocation33_spill] sm:$0xff] }
 0x398   :  { %2602 = vmatprep.subr.mxu0 %v8172_v33  ;;  %5368 = vmatprep.subr.mxu1 %v8116_v43  ;;  %v7292_v33 = vld [vmem:[#allocation2 + $0xab] ss:$8 sm:$0x7] }
 0x399   :  { %2603 = vmatpush1.msra.mxu0 %v8173_v53  ;;  %5369 = vmatpush3.msra.mxu1 %v8174_v46 }
 0x39a   :  { %2604 = vmatprep.subr.mxu0 %v8175_v1  ;;  %5370 = vmatprep.subr.mxu1 %v8116_v43 }
 0x39b   :  { %2605 = vmatpush1.msra.mxu0 %v8176_v49  ;;  %5371 = vmatpush3.msra.mxu1 %v8177_v55 }
 0x39c   :  { %2606 = vmatprep.subr.mxu0 %v8178_v50  ;;  %5372 = vmatprep.subr.mxu1 %v8116_v43 }
 0x39d   :  { %2607 = vmatpush1.msra.mxu0 %v8179_v28  ;;  %5373 = vmatpush3.msra.mxu1 %v8180_v32 }
 0x39e   :  { %2608 = vmatprep.subr.mxu0 %v8181_v45  ;;  %5374 = vmatprep.subr.mxu1 %v8116_v43 }
 0x39f   :  { %2609 = vmatpush1.msra.mxu0 %v8182_v58  ;;  %5375 = vmatpush3.msra.mxu1 %v8183_v62 }
 0x3a0   :  { %2610 = vmatprep.subr.mxu0 %v8184_v35  ;;  %5376 = vmatprep.subr.mxu1 %v8116_v43 }
 0x3a1   :  { %2611 = vmatpush1.msra.mxu0 %v8185_v47  ;;  %5377 = vmatpush3.msra.mxu1 %v8186_v22 }
 0x3a2   :  { %2612 = vmatprep.subr.mxu0 %v8187_v0  ;;  %5378 = vmatprep.subr.mxu1 %v8116_v43 }
 0x3a3   :  { %2613 = vmatpush1.msra.mxu0 %v8188_v36  ;;  %5379 = vmatpush3.msra.mxu1 %v8189_v31  ;;  %v2261_v31 = vrot.slane %v7271_v27, 1 }
 0x3a4   :  { %2614 = vmatprep.subr.mxu0 %v8190_v48  ;;  %5380 = vmatprep.subr.mxu1 %v8116_v43 }
 0x3a5   :  { %2615 = vmatpush1.msra.mxu0 %v8191_v8  ;;  %5381 = vmatpush3.msra.mxu1 %v8192_v57  ;;  %v2262_v57 = vrot.slane %v7275_v15, 1 }
 0x3a6   :  { %2616 = vmatprep.subr.mxu0 %v8193_v56  ;;  %5382 = vmatprep.subr.mxu1 %v8116_v43  ;;  %v2263_v56 = vrot.slane %v7277_v4, 1 }
 0x3a7   :  { %2617 = vmatpush1.msra.mxu0 %v8194_v7  ;;  %5383 = vmatpush3.msra.mxu1 %v8195_v24  ;;  %v2265_v7 = vrot.slane %v7281_v17, 1 }
 0x3a8   :  { %2618 = vmatprep.subr.mxu0 %v8196_v2  ;;  %5384 = vmatprep.subr.mxu1 %v8116_v43 }
 0x3a9   :  { %2619 = vmatpush1.msra.mxu0 %v8197_v21  ;;  %2652 = vmatprep.mubr.f32.mxu0 %v8116_v43  ;;  %v2264_v21 = vrot.slane %v7279_v16, 1 }
 0x3aa   :  { %5385 = vmatpush3.msra.mxu1 %v8198_v19  ;;  %5386 = vmatprep.mubr.msk.f32.mxu1 %vm6360_vm0, %v8116_v43 }
 0x3ab   :  { %3178 = vmatprep.subr.mxu0 %v7264_v38  ;;  %5389 = vmatprep.subr.mxu1 %v8116_v43 }
 0x44a   :  { %v2064_v12 = vpop.f32.mrf.mxu0  ;;  %v7268_v11 = vpop.f32.mrf.mxu1 }
 0x44b   :  { %v2140_v40 = vcombine.high %v2064_v12, %v2064_v12  ;;  %v2147_v44 = vrot.slane %v2064_v12, %v6623_v54 }
 0x44c   :  { %v5353_v60 = vpop.f32.mrf.mxu1  ;;  %v2066_v51 = vpop.f32.mrf.mxu0 }
 0x44d   :  { %v2154_v14 = vrot.slane %v2140_v40, %v6623_v54  ;;  %v2155_v41 = vcombine.high %v2147_v44, %v2147_v44  ;;  %v2163_v3 = vrot.slane %v2147_v44, %v6623_v54  ;;  %v2278_v49 = vcombine.high %v2066_v51, %v2066_v51 }
 0x44e   :  { %v2285_v22 = vrot.slane %v2066_v51, %v6623_v54 }
 0x44f   :  { %v2156_v63 = vcombine.high %v2154_v14, %v2154_v14  ;;  %v2170_v18 = vrot.slane %v2154_v14, %v6623_v54  ;;  %v2177_v34 = vrot.slane %v2155_v41, %v6623_v54  ;;  %v2185_v26 = vcombine.high %v2163_v3, %v2163_v3 }
 0x450   :  { %v2197_v37 = vadd.f32 %v2163_v3, %v7271_v27  ;;  %v2292_v48 = vrot.slane %v2278_v49, %v6623_v54  ;;  %v2293_v24 = vcombine.high %v2285_v22, %v2285_v22  ;;  %v2301_v2 = vrot.slane %v2285_v22, %v6623_v54 }
 0x451   :  { %v2184_v25 = vrot.slane %v2156_v63, %v6623_v54  ;;  %v2186_v29 = vcombine.high %v2170_v18, %v2170_v18  ;;  %v2187_v6 = vcombine.high %v2177_v34, %v2177_v34  ;;  %v2198_v61 = vadd.f32 %v2177_v34, %v7275_v15 }
 0x452   :  { %v2199_v53 = vadd.f32 %v2185_v26, %v7277_v4  ;;  %v2201_v46 = vadd.f32 %v2170_v18, %v7281_v17  ;;  %v4998_v1 = vmul.f32 -1.442695, %v2197_v37  ;;  %v2308_v19 = vrot.slane %v2292_v48, %v6623_v54 }
 0x453   :  { %v2188_v55 = vcombine.high %v2184_v25, %v2184_v25  ;;  %v2200_v50 = vadd.f32 %v2187_v6, %v7279_v16  ;;  %v2202_v28 = vadd.f32 %v2184_v25, %v7285_v59  ;;  %v2203_v32 = vadd.f32 %v2186_v29, %v7287_v42 }
 0x454   :  { %5742 = vpow2.f32 %v4998_v1  ;;  %v4999_v45 = vmul.f32 -1.442695, %v2198_v61  ;;  %v5000_v58 = vmul.f32 -1.442695, %v2199_v53  ;;  %v5002_v47 = vmul.f32 -1.442695, %v2201_v46 }
 0x455   :  { %v2204_v62 = vadd.f32 %v2188_v55, %v7292_v33  ;;  %v5001_v35 = vmul.f32 -1.442695, %v2200_v50  ;;  %v5003_v0 = vmul.f32 -1.442695, %v2202_v28  ;;  %v5004_v36 = vmul.f32 -1.442695, %v2203_v32 }
 0x456   :  { %5744 = vpow2.f32 %v4999_v45  ;;  %v2294_v12 = vcombine.high %v2292_v48, %v2292_v48  ;;  %v2315_v40 = vrot.slane %v2293_v24, %v6623_v54  ;;  %v2323_v44 = vcombine.high %v2301_v2, %v2301_v2 }
 0x457   :  { %5746 = vpow2.f32 %v5000_v58  ;;  %v5005_v8 = vmul.f32 -1.442695, %v2204_v62  ;;  %v2335_v60 = vadd.f32 %v2301_v2, %v2261_v31  ;;  %v2339_v63 = vadd.f32 %v2308_v19, %v2265_v7 }
 0x458   :  { %5748 = vpow2.f32 %v5001_v35  ;;  %v2325_v14 = vcombine.high %v2315_v40, %v2315_v40  ;;  %v2336_v41 = vadd.f32 %v2315_v40, %v2262_v57  ;;  %v2337_v3 = vadd.f32 %v2323_v44, %v2263_v56 }
 0x459   :  { %5750 = vpow2.f32 %v5002_v47  ;;  %v5006_v18 = vmul.f32 -1.442695, %v2335_v60  ;;  %v2322_v34 = vrot.slane %v2294_v12, %v6623_v54  ;;  %v2266_v29 = vrot.slane %v7285_v59, 1 }
 0x45a   :  { %5752 = vpow2.f32 %v5003_v0  ;;  %v2338_v26 = vadd.f32 %v2325_v14, %v2264_v21  ;;  %v5007_v51 = vmul.f32 -1.442695, %v2336_v41  ;;  %v5008_v37 = vmul.f32 -1.442695, %v2337_v3 }
 0x45b   :  { %5754 = vpow2.f32 %v5004_v36  ;;  %v5010_v61 = vmul.f32 -1.442695, %v2339_v63  ;;  %v2267_v46 = vrot.slane %v7287_v42, 1  ;;  %v2324_v1 = vcombine.high %v2308_v19, %v2308_v19 }
 0x45c   :  { %5756 = vpow2.f32 %v5005_v8  ;;  %v5009_v6 = vmul.f32 -1.442695, %v2338_v26  ;;  %v2391_v55 = vadd.f32 %v7142_v23, %v7268_v11  ;;  %v2268_v50 = vrot.slane %v7292_v33, 1 }
 0x45d   :  { %5758 = vpow2.f32 %v5006_v18  ;;  %v2326_v28 = vcombine.high %v2322_v34, %v2322_v34  ;;  %v2340_v35 = vadd.f32 %v2322_v34, %v2266_v29  ;;  %v2341_v0 = vadd.f32 %v2324_v1, %v2267_v46 }
 0x45e   :  { %5760 = vpow2.f32 %v5007_v51  ;;  %v2393_v48 = vcombine.high %v2391_v55, %v2391_v55  ;;  %v2400_v57 = vrot.slane %v2391_v55, %v6623_v54  ;;  %v2458_v26 = vrot.slane %v7271_v27, 2 }
 0x45f   :  { %5762 = vpow2.f32 %v5008_v37  ;;  %v2342_v23 = vadd.f32 %v2326_v28, %v2268_v50  ;;  %v5011_v24 = vmul.f32 -1.442695, %v2340_v35  ;;  %v5012_v21 = vmul.f32 -1.442695, %v2341_v0 }
 0x460   :  { %5764 = vpow2.f32 %v5009_v6  ;;  %v2407_v19 = vrot.slane %v2393_v48, %v6623_v54  ;;  %v2408_v40 = vcombine.high %v2400_v57, %v2400_v57  ;;  %v2416_v63 = vrot.slane %v2400_v57, %v6623_v54 }
 0x461   :  { %v5743_v25 = vpop.eup %5742  ;;  %v5013_v12 = vmul.f32 -1.442695, %v2342_v23  ;;  %v2459_v29 = vrot.slane %v7275_v15, 2  ;;  %v2460_v6 = vrot.slane %v7277_v4, 2  ;;  %v2462_v1 = vrot.slane %v7281_v17, 2 }
 0x462   :  { %v2229_v53 = vadd.f32 1.0, %v5743_v25  ;;  %v2409_v3 = vcombine.high %v2407_v19, %v2407_v19  ;;  %v2430_v51 = vrot.slane %v2408_v40, %v6623_v54  ;;  %v2438_v28 = vcombine.high %v2416_v63, %v2416_v63 }
 0x463   :  { %v5745_v49 = vpop.eup %5744  ;;  %v2464_v17 = vrot.slane %v7287_v42, 2 }
 0x464   :  { %v5747_v32 = vpop.eup %5746  ;;  %v2230_v45 = vadd.f32 1.0, %v5745_v49  ;;  %5766 = vrcp.f32 %v2229_v53  ;;  %v2423_v49 = vrot.slane %v2407_v19, %v6623_v54  ;;  %v2437_v27 = vrot.slane %v2409_v3, %v6623_v54 }
 0x465   :  { %v5749_v58 = vpop.eup %5748  ;;  %v2231_v62 = vadd.f32 1.0, %v5747_v32  ;;  %5768 = vpow2.f32 %v5010_v61  ;;  %v2461_v61 = vrot.slane %v7279_v16, 2  ;;  %v2440_v15 = vcombine.high %v2430_v51, %v2430_v51 }
 0x466   :  { %v5751_v47 = vpop.eup %5750  ;;  %v2232_v22 = vadd.f32 1.0, %v5749_v58  ;;  %5770 = vrcp.f32 %v2230_v45  ;;  %v2439_v48 = vcombine.high %v2423_v49, %v2423_v49  ;;  %v2441_v57 = vcombine.high %v2437_v27, %v2437_v27 }
 0x467   :  { %v5753_v36 = vpop.eup %5752  ;;  %v2233_v31 = vadd.f32 1.0, %v5751_v47  ;;  %5772 = vrcp.f32 %v2231_v62  ;;  %v2463_v62 = vrot.slane %v7285_v59, 2 }
 0x468   :  { %v5755_v11 = vpop.eup %5754  ;;  %v2234_v8 = vadd.f32 1.0, %v5753_v36  ;;  %5774 = vrcp.f32 %v2232_v22  ;;  %v2465_v22 = vrot.slane %v7292_v33, 2 }
 0x469   :  { %v5757_v56 = vpop.eup %5756  ;;  %v2235_v7 = vadd.f32 1.0, %v5755_v11  ;;  %5776 = vrcp.f32 %v2233_v31 }
 0x46a   :  { %v2236_v2 = vadd.f32 1.0, %v5757_v56  ;;  %5778 = vrcp.f32 %v2234_v8  ;;  %v5759_v44 = vpop.eup %5758 }
 0x46b   :  { %5780 = vrcp.f32 %v2235_v7  ;;  %v5761_v60 = vpop.eup %5760  ;;  %v2367_v14 = vadd.f32 1.0, %v5759_v44 }
 0x46c   :  { %5782 = vrcp.f32 %v2236_v2  ;;  %v5763_v41 = vpop.eup %5762  ;;  %v2368_v18 = vadd.f32 1.0, %v5761_v60 }
 0x46d   :  { %5784 = vpow2.f32 %v5011_v24  ;;  %v5765_v34 = vpop.eup %5764  ;;  %v2369_v37 = vadd.f32 1.0, %v5763_v41 }
 0x46e   :  { %5786 = vpow2.f32 %v5012_v21  ;;  %v2370_v53 = vadd.f32 1.0, %v5765_v34 }
 0x46f   :  { %5788 = vpow2.f32 %v5013_v12 }
 0x470   :  { %5790 = vrcp.f32 %v2367_v14 }
 0x471   :  { %v5767_v25 = vpop.eup %5766  ;;  %5792 = vrcp.f32 %v2368_v18 }
 0x472   :  { %v5769_v46 = vpop.eup %5768  ;;  %v2450_v55 = vmul.f32 %v5767_v25, %v2416_v63  ;;  %5794 = vrcp.f32 %v2369_v37 }
 0x473   :  { %v5771_v50 = vpop.eup %5770  ;;  %v2371_v32 = vadd.f32 1.0, %v5769_v46  ;;  %5796 = vrcp.f32 %v2370_v53 }
 0x474   :  { %v5773_v45 = vpop.eup %5772  ;;  %v2451_v58 = vmul.f32 %v5771_v50, %v2430_v51  ;;  %v2474_v4 = vadd.f32 %v2458_v26, %v2450_v55 }
 0x475   :  { %v5775_v16 = vpop.eup %5774  ;;  %v2452_v35 = vmul.f32 %v5773_v45, %v2438_v28 }
 0x476   :  { %v5777_v47 = vpop.eup %5776  ;;  %v2453_v0 = vmul.f32 %v5775_v16, %v2440_v15  ;;  %v2475_v36 = vadd.f32 %v2459_v29, %v2451_v58  ;;  %5798 = vtanh.f32 %v2474_v4 }
 0x477   :  { %v5779_v31 = vpop.eup %5778  ;;  %v2454_v23 = vmul.f32 %v5777_v47, %v2423_v49  ;;  %v2476_v11 = vadd.f32 %v2460_v6, %v2452_v35  ;;  %5800 = vrcp.f32 %v2371_v32 }
 0x478   :  { %v5781_v8 = vpop.eup %5780  ;;  %v2455_v56 = vmul.f32 %v5779_v31, %v2437_v27  ;;  %v2477_v7 = vadd.f32 %v2461_v61, %v2453_v0  ;;  %5802 = vtanh.f32 %v2475_v36 }
 0x479   :  { %v5783_v59 = vpop.eup %5782  ;;  %v2456_v42 = vmul.f32 %v5781_v8, %v2439_v48  ;;  %v2478_v24 = vadd.f32 %v2462_v1, %v2454_v23  ;;  %5804 = vtanh.f32 %v2476_v11 }
 0x47a   :  { %v5785_v2 = vpop.eup %5784  ;;  %v2457_v21 = vmul.f32 %v5783_v59, %v2441_v57  ;;  %v2479_v33 = vadd.f32 %v2463_v62, %v2455_v56  ;;  %5806 = vtanh.f32 %v2477_v7 }
 0x47b   :  { %v5787_v19 = vpop.eup %5786  ;;  %v2480_v12 = vadd.f32 %v2464_v17, %v2456_v42  ;;  %5808 = vtanh.f32 %v2478_v24  ;;  %v2372_v40 = vadd.f32 1.0, %v5785_v2 }
 0x47c   :  { %v5789_v44 = vpop.eup %5788  ;;  %v2481_v60 = vadd.f32 %v2465_v22, %v2457_v21  ;;  %5810 = vtanh.f32 %v2479_v33  ;;  %v2373_v14 = vadd.f32 1.0, %v5787_v19  ;;  %v7368_v33 = vld [vmem:[#allocation5 + $0x168] sm:$0xff]  ;;  %v7371_v19 = vld [vmem:[#allocation5 + $0x178] sm:$0xff] }
 0x47d   :  { %5812 = vtanh.f32 %v2480_v12  ;;  %v2374_v41 = vadd.f32 1.0, %v5789_v44  ;;  %v5791_v3 = vpop.eup %5790  ;;  %v7374_v12 = vld [vmem:[#allocation5 + $0x158] sm:$0xff]  ;;  %v7381_v44 = vld [vmem:[#allocation5 + $0x160] sm:$0xff] }
 0x47e   :  { %5814 = vtanh.f32 %v2481_v60  ;;  %v5793_v63 = vpop.eup %5792  ;;  %v7384_v60 = vld [vmem:[#allocation5 + $0x140] sm:$0xff] }
 0x47f   :  { %5816 = vrcp.f32 %v2372_v40  ;;  %v5795_v18 = vpop.eup %5794  ;;  %v7378_v40 = vld [vmem:[#allocation5 + $0x150] sm:$0xff] }
 0x480   :  { %5818 = vrcp.f32 %v2373_v14  ;;  %v5797_v34 = vpop.eup %5796  ;;  %v7388_v14 = vld [vmem:[#allocation5 + $0x138] sm:$0xff] }
 0x481   :  { %5820 = vrcp.f32 %v2374_v41  ;;  %v7391_v41 = vld [vmem:[#allocation5 + $0x148] sm:$0xff] }
 0x483   :  { %v5799_v26 = vpop.eup %5798 }
 0x484   :  { %v5801_v51 = vpop.eup %5800  ;;  %v2490_v25 = vsub.f32 %v7175_v5, %v5799_v26 }
 0x485   :  { %v5803_v37 = vpop.eup %5802 }
 0x486   :  { %v5805_v29 = vpop.eup %5804  ;;  %v2491_v6 = vsub.f32 %v7168_v52, %v5803_v37  ;;  %v2498_v27 = vmul.f32 %v5791_v3, %v2490_v25  ;;  %v7394_v3 = vld [vmem:[#allocation5 + $0x128] sm:$0xff]  ;;  %v7418_v25 = vld [vmem:[#allocation5 + $0xf0] sm:$0xff] }
 0x487   :  { %v5807_v61 = vpop.eup %5806  ;;  %v2492_v53 = vsub.f32 %v7171_v10, %v5805_v29 }
 0x488   :  { %v5809_v46 = vpop.eup %5808  ;;  %v2493_v1 = vsub.f32 %v7173_v9, %v5807_v61  ;;  %v2499_v49 = vmul.f32 %v5793_v63, %v2491_v6  ;;  %v7344_v35 = vadd.f32 %v5799_v26, %v2498_v27  ;;  %v7398_v63 = vld [vmem:[#allocation5 + $0x120] sm:$0xff]  ;;  %v7408_v26 = vld [vmem:[#allocation5 + $0x108] sm:$0xff]  ;;  %v7451_v27 = vld [vmem:[#allocation5 + $0xb8] sm:$0xff] }
 0x489   :  { %v5811_v55 = vpop.eup %5810  ;;  %v2494_v50 = vsub.f32 %v7179_v13, %v5809_v46  ;;  %v2500_v28 = vmul.f32 %v5795_v18, %v2492_v53  ;;  %v7401_v18 = vld [vmem:[#allocation5 + $0x130] sm:$0xff]  ;;  %v7424_v6 = vld [vmem:[#allocation5 + $0xe0] sm:$0xff]  ;;  %v7431_v53 = vld [vmem:[#allocation5 + $0xe8] sm:$0xff]  ;;  %8205 = vst [vmem:[#allocation26_spill] sm:$0xff] %v7451_v27 }
 0x48a   :  { %v5813_v32 = vpop.eup %5812  ;;  %v2495_v45 = vsub.f32 %v7181_v39, %v5811_v55  ;;  %v2501_v15 = vmul.f32 %v5797_v34, %v2493_v1  ;;  %v7337_v4 = vadd.f32 %v5803_v37, %v2499_v49  ;;  %v7404_v34 = vld [vmem:[#allocation5 + $0x110] sm:$0xff]  ;;  %v7414_v37 = vld [vmem:[#allocation5 + $0xf8] sm:$0xff]  ;;  %8199 = vst [vmem:[#allocation20_spill] sm:$0xff] %v7431_v53  ;;  %v7438_v1 = vld [vmem:[#allocation5 + $0xc0] sm:$0xff] }
 0x48b   :  { %v5815_v5 = vpop.eup %5814  ;;  %v2496_v58 = vsub.f32 %v7185_v30, %v5813_v32  ;;  %v2502_v52 = vmul.f32 %v5801_v51, %v2494_v50  ;;  %v7340_v9 = vadd.f32 %v5805_v29, %v2500_v28  ;;  %v7411_v51 = vld [vmem:[#allocation5 + $0x118] sm:$0xff]  ;;  %v7421_v29 = vld [vmem:[#allocation5 + $0x100] sm:$0xff]  ;;  %8201 = vst [vmem:[#allocation12_spill] sm:$0xff] %v7438_v1  ;;  %v7441_v49 = vld [vmem:[#allocation5 + $0xd0] sm:$0xff] }
 0x48c   :  { %v5817_v10 = vpop.eup %5816  ;;  %v2497_v16 = vsub.f32 %v7187_v20, %v5815_v5  ;;  %v7342_v62 = vadd.f32 %v5807_v61, %v2501_v15  ;;  %v2538_v20 = vcombine.low %v7344_v35, %v7337_v4  ;;  %v7428_v61 = vld [vmem:[#allocation5 + $0xd8] sm:$0xff]  ;;  %8202 = vst [vmem:[#allocation23_spill] sm:$0xff] %v7441_v49  ;;  %v7448_v50 = vld [vmem:[#allocation5 + $0xa8] sm:$0xff]  ;;  %v7464_v15 = vld [vmem:[#allocation5 + $0x80] sm:$0xff] }
 0x48d   :  { %v5819_v13 = vpop.eup %5818  ;;  %v2503_v17 = vmul.f32 %v5817_v10, %v2495_v45  ;;  %v7348_v0 = vadd.f32 %v5809_v46, %v2502_v52  ;;  %v7434_v46 = vld [vmem:[#allocation5 + $0xc8] sm:$0xff]  ;;  %8204 = vst [vmem:[#allocation14_spill] sm:$0xff] %v7448_v50  ;;  %v7454_v28 = vld [vmem:[#allocation5 + $0x98] sm:$0xff]  ;;  %v7461_v45 = vld [vmem:[#allocation5 + $0xa0] sm:$0xff] }
 0x48e   :  { %v5821_v47 = vpop.eup %5820  ;;  %v2504_v39 = vmul.f32 %v5819_v13, %v2496_v58  ;;  %v2539_v22 = vcombine.low %v7340_v9, %v7342_v62  ;;  %v2548_v57 = vrot.slane %v2538_v20, %v6623_v54  ;;  %8200 = vst [vmem:[#allocation11_spill] sm:$0xff] %v7434_v46  ;;  %8206 = vst [vmem:[#allocation15_spill] sm:$0xff] %v7454_v28  ;;  %v7471_v58 = vld [vmem:[#allocation5 + $0x88] sm:$0xff]  ;;  %v7478_v10 = vld [vmem:[#allocation5 + $0x60] sm:$0xff] }
 0x48f   :  { %v2505_v30 = vmul.f32 %v5821_v47, %v2497_v16  ;;  %v7350_v36 = vadd.f32 %v5811_v55, %v2503_v17  ;;  %v7444_v55 = vld [vmem:[#allocation5 + $0xb0] sm:$0xff]  ;;  %8208 = vst [vmem:[#allocation29_spill] sm:$0xff] %v7461_v45  ;;  %8209 = vst [vmem:[#allocation17_spill] sm:$0xff] %v7464_v15  ;;  %v7474_v52 = vld [vmem:[#allocation5 + $0x68] sm:$0xff] }
 0x490   :  { %v7354_v31 = vadd.f32 %v5813_v32, %v2504_v39  ;;  %v2555_v11 = vrot.slane %v2539_v22, %v6623_v54  ;;  %8203 = vst [vmem:[#allocation13_spill] sm:$0xff] %v7444_v55  ;;  %v7458_v32 = vld [vmem:[#allocation5 + $0x90] sm:$0xff]  ;;  %8211 = vst [vmem:[#allocation31_spill] sm:$0xff] %v7471_v58  ;;  %v7488_v17 = vld [vmem:[#allocation5 + $0x48] sm:$0xff] }
 0x491   :  { %v7356_v48 = vadd.f32 %v5815_v5, %v2505_v30  ;;  %v2540_v23 = vcombine.low %v7348_v0, %v7350_v36  ;;  %8207 = vst [vmem:[#allocation16_spill] sm:$0xff] %v7458_v32  ;;  %v7468_v5 = vld [vmem:[#allocation5 + $0x78] sm:$0xff]  ;;  %8212 = vst [vmem:[#allocation19_spill] sm:$0xff] %v7474_v52  ;;  %v7481_v16 = vld [vmem:[#allocation5 + $0x70] sm:$0xff] }
 0x492   :  { %v2570_v59 = vcombine.low %v2548_v57, %v2555_v11  ;;  %8210 = vst [vmem:[#allocation18_spill] sm:$0xff] %v7468_v5  ;;  %8213 = vst [vmem:[#allocation21_spill] sm:$0xff] %v7478_v10  ;;  %v7484_v13 = vld [vmem:[#allocation5 + $0x50] sm:$0xff]  ;;  %v7491_v47 = vld [vmem:[#allocation5 + $0x58] sm:$0xff] }
 0x493   :  { %v2541_v8 = vcombine.low %v7354_v31, %v7356_v48  ;;  %v2562_v56 = vrot.slane %v2540_v23, %v6623_v54  ;;  %8214 = vst [vmem:[#allocation32_spill] sm:$0xff] %v7481_v16  ;;  %8215 = vst [vmem:[#allocation22_spill] sm:$0xff] %v7484_v13  ;;  %v7494_v39 = vld [vmem:[#allocation5 + $0x38] sm:$0xff]  ;;  %v7498_v22 = vld [vmem:[#allocation5 + $0x30] sm:$0xff] }
 0x494   :  { %v2578_v24 = vrot.slane %v2570_v59, %v6623_v54  ;;  %8216 = vst [vmem:[#allocation24_spill] sm:$0xff] %v7488_v17  ;;  %8217 = vst [vmem:[#allocation33_spill] sm:$0xff] %v7491_v47  ;;  %v7501_v30 = vld [vmem:[#allocation5 + $0x40] sm:$0xff]  ;;  %v7508_v23 = vld [vmem:[#allocation5 + $0x18] sm:$0xff] }
 0x495   :  { %v2569_v7 = vrot.slane %v2541_v8, %v6623_v54  ;;  %8218 = vst [vmem:[#allocation25_spill] sm:$0xff] %v7494_v39  ;;  %8219 = vst [vmem:[#allocation27_spill] sm:$0xff] %v7498_v22  ;;  %v7504_v20 = vld [vmem:[#allocation5 + $0x20] sm:$0xff]  ;;  %v7511_v11 = vld [vmem:[#allocation5 + $0x28] sm:$0xff] }
 0x496   :  { %8220 = vst [vmem:[#allocation34_spill] sm:$0xff] %v7501_v30  ;;  %8221 = vst [vmem:[#allocation28_spill] sm:$0xff] %v7504_v20  ;;  %v7514_v8 = vld [vmem:[#allocation5 + $0x8] sm:$0xff]  ;;  %v7518_v57 = vld [vmem:[#allocation5] sm:$0xff] }
 0x497   :  { %v2571_v42 = vcombine.low %v2562_v56, %v2569_v7  ;;  %8222 = vst [vmem:[#allocation30_spill] sm:$0xff] %v7508_v23  ;;  %8223 = vst [vmem:[#allocation35_spill] sm:$0xff] %v7511_v11  ;;  %v7522_v56 = vld [vmem:[#allocation5 + $0x10] sm:$0xff] }
 0x498   :  { %8224 = vst [vmem:[#allocation36_spill] sm:$0xff] %v7514_v8  ;;  %8225 = vst [vmem:[#allocation37_spill] sm:$0xff] %v7518_v57 }
 0x499   :  { %v2585_v2 = vrot.slane %v2571_v42, %v6623_v54  ;;  %8226 = vst [vmem:[#allocation38_spill] sm:$0xff] %v7522_v56 }
 0x49b   :  { %v2586_v21 = vcombine.low %v2578_v24, %v2585_v2 }
 0x49d   :  { %2653 = vmatmul.mubr.f32.vlgmr.msra.gmra.mxu0 %v2586_v21  ;;  %5387 = vmatmul.mubr.f32.vlgmr.msra.gmra.mxu1 %v2586_v21  ;;  %v7532_v21 = vld [vmem:[#allocation2 + $0x4] ss:$8 sm:$0x7] }
 0x49e   :  { %3179 = vmatpush1.msra.mxu0 %v7368_v33  ;;  %5390 = vmatpush3.msra.mxu1 %v7371_v19 }
 0x49f   :  { %3180 = vmatprep.subr.mxu0 %v7374_v12  ;;  %5391 = vmatprep.subr.mxu1 %v8116_v43 }
 0x4a0   :  { %3181 = vmatpush1.msra.mxu0 %v7378_v40  ;;  %5392 = vmatpush3.msra.mxu1 %v7381_v44 }
 0x4a1   :  { %3182 = vmatprep.subr.mxu0 %v7384_v60  ;;  %5393 = vmatprep.subr.mxu1 %v8116_v43 }
 0x4a2   :  { %3183 = vmatpush1.msra.mxu0 %v7388_v14  ;;  %5394 = vmatpush3.msra.mxu1 %v7391_v41 }
 0x4a3   :  { %3184 = vmatprep.subr.mxu0 %v7394_v3  ;;  %5395 = vmatprep.subr.mxu1 %v8116_v43 }
 0x4a4   :  { %3185 = vmatpush1.msra.mxu0 %v7398_v63  ;;  %5396 = vmatpush3.msra.mxu1 %v7401_v18 }
 0x4a5   :  { %3186 = vmatprep.subr.mxu0 %v7404_v34  ;;  %5397 = vmatprep.subr.mxu1 %v8116_v43 }
 0x4a6   :  { %3187 = vmatpush1.msra.mxu0 %v7408_v26  ;;  %5398 = vmatpush3.msra.mxu1 %v7411_v51 }
 0x4a7   :  { %3188 = vmatprep.subr.mxu0 %v7414_v37  ;;  %5399 = vmatprep.subr.mxu1 %v8116_v43 }
 0x4a8   :  { %3189 = vmatpush1.msra.mxu0 %v7418_v25  ;;  %5400 = vmatpush3.msra.mxu1 %v7421_v29 }
 0x4a9   :  { %3190 = vmatprep.subr.mxu0 %v7424_v6  ;;  %5401 = vmatprep.subr.mxu1 %v8116_v43 }
 0x4aa   :  { %3191 = vmatpush1.msra.mxu0 %v7428_v61  ;;  %5402 = vmatpush3.msra.mxu1 %v7431_v53 }
 0x4ab   :  { %3192 = vmatprep.subr.mxu0 %v7434_v46  ;;  %5403 = vmatprep.subr.mxu1 %v8116_v43 }
 0x4ac   :  { %3193 = vmatpush1.msra.mxu0 %v7438_v1  ;;  %5404 = vmatpush3.msra.mxu1 %v7441_v49 }
 0x4ad   :  { %3194 = vmatprep.subr.mxu0 %v7444_v55  ;;  %5405 = vmatprep.subr.mxu1 %v8116_v43  ;;  %v2851_v55 = vrot.slane %v7532_v21, 1 }
 0x4ae   :  { %3195 = vmatpush1.msra.mxu0 %v7448_v50  ;;  %5406 = vmatpush3.msra.mxu1 %v7451_v27 }
 0x4af   :  { %3196 = vmatprep.subr.mxu0 %v7454_v28  ;;  %5407 = vmatprep.subr.mxu1 %v8116_v43 }
 0x4b0   :  { %3197 = vmatpush1.msra.mxu0 %v7458_v32  ;;  %5408 = vmatpush3.msra.mxu1 %v7461_v45 }
 0x4b1   :  { %3198 = vmatprep.subr.mxu0 %v7464_v15  ;;  %5409 = vmatprep.subr.mxu1 %v8116_v43 }
 0x4b2   :  { %3199 = vmatpush1.msra.mxu0 %v7468_v5  ;;  %5410 = vmatpush3.msra.mxu1 %v7471_v58 }
 0x4b3   :  { %3200 = vmatprep.subr.mxu0 %v7474_v52  ;;  %5411 = vmatprep.subr.mxu1 %v8116_v43  ;;  %v7553_v52 = vld [vmem:[#allocation2 + $0xac] ss:$8 sm:$0x7] }
 0x4b4   :  { %3201 = vmatpush1.msra.mxu0 %v7478_v10  ;;  %5412 = vmatpush3.msra.mxu1 %v7481_v16 }
 0x4b5   :  { %3202 = vmatprep.subr.mxu0 %v7484_v13  ;;  %5413 = vmatprep.subr.mxu1 %v8116_v43 }
 0x4b6   :  { %3203 = vmatpush1.msra.mxu0 %v7488_v17  ;;  %5414 = vmatpush3.msra.mxu1 %v7491_v47  ;;  %v7546_v47 = vld [vmem:[#allocation2 + $0x7c] ss:$8 sm:$0x7] }
 0x4b7   :  { %3204 = vmatprep.subr.mxu0 %v7494_v39  ;;  %5415 = vmatprep.subr.mxu1 %v8116_v43 }
 0x4b8   :  { %3205 = vmatpush1.msra.mxu0 %v7498_v22  ;;  %5416 = vmatpush3.msra.mxu1 %v7501_v30 }
 0x4b9   :  { %3206 = vmatprep.subr.mxu0 %v7504_v20  ;;  %5417 = vmatprep.subr.mxu1 %v8116_v43  ;;  %v7542_v20 = vld [vmem:[#allocation2 + $0x64] ss:$8 sm:$0x7] }
 0x4ba   :  { %3207 = vmatpush1.msra.mxu0 %v7508_v23  ;;  %5418 = vmatpush3.msra.mxu1 %v7511_v11  ;;  %v7536_v11 = vld [vmem:[#allocation2 + $0x1c] ss:$8 sm:$0x7] }
 0x4bb   :  { %3208 = vmatprep.subr.mxu0 %v7514_v8  ;;  %5419 = vmatprep.subr.mxu1 %v8116_v43  ;;  %v7538_v23 = vld [vmem:[#allocation2 + $0x34] ss:$8 sm:$0x7] }
 0x4bc   :  { %3209 = vmatpush1.msra.mxu0 %v7518_v57  ;;  %3242 = vmatprep.mubr.f32.mxu0 %v8116_v43 }
 0x4bd   :  { %5420 = vmatpush3.msra.mxu1 %v7522_v56  ;;  %5421 = vmatprep.mubr.msk.f32.mxu1 %vm6360_vm0, %v8116_v43 }
 0x4be   :  { %3768 = vmatprep.subr.mxu0 %v7264_v38  ;;  %5424 = vmatprep.subr.mxu1 %v8116_v43  ;;  %v7540_v38 = vld [vmem:[#allocation2 + $0x4c] ss:$8 sm:$0x7] }
 0x55d   :  { %v2654_v7 = vpop.f32.mrf.mxu0  ;;  %v7529_v59 = vpop.f32.mrf.mxu1 }
 0x55e   :  { %v2730_v42 = vcombine.high %v2654_v7, %v2654_v7  ;;  %v2737_v24 = vrot.slane %v2654_v7, %v6623_v54 }
 0x55f   :  { %v5388_v2 = vpop.f32.mrf.mxu1  ;;  %v2656_v39 = vpop.f32.mrf.mxu0 }
 0x560   :  { %v2744_v57 = vrot.slane %v2730_v42, %v6623_v54  ;;  %v2745_v8 = vcombine.high %v2737_v24, %v2737_v24  ;;  %v2753_v56 = vrot.slane %v2737_v24, %v6623_v54  ;;  %v7548_v42 = vld [vmem:[#allocation2 + $0x94] ss:$8 sm:$0x7]  ;;  %v2868_v5 = vcombine.high %v2656_v39, %v2656_v39 }
 0x562   :  { %v2746_v30 = vcombine.high %v2744_v57, %v2744_v57  ;;  %v2760_v22 = vrot.slane %v2744_v57, %v6623_v54  ;;  %v2767_v7 = vrot.slane %v2745_v8, %v6623_v54  ;;  %v2775_v2 = vcombine.high %v2753_v56, %v2753_v56 }
 0x563   :  { %v2787_v24 = vadd.f32 %v2753_v56, %v7532_v21 }
 0x564   :  { %v2774_v17 = vrot.slane %v2746_v30, %v6623_v54  ;;  %v2776_v13 = vcombine.high %v2760_v22, %v2760_v22  ;;  %v2777_v16 = vcombine.high %v2767_v7, %v2767_v7  ;;  %v2788_v10 = vadd.f32 %v2767_v7, %v7536_v11 }
 0x565   :  { %v2789_v57 = vadd.f32 %v2775_v2, %v7538_v23  ;;  %v2791_v8 = vadd.f32 %v2760_v22, %v7542_v20  ;;  %v5014_v58 = vmul.f32 -1.442695, %v2787_v24  ;;  %v2875_v2 = vrot.slane %v2656_v39, %v6623_v54 }
 0x566   :  { %v2778_v15 = vcombine.high %v2774_v17, %v2774_v17  ;;  %v2790_v45 = vadd.f32 %v2777_v16, %v7540_v38  ;;  %v2792_v32 = vadd.f32 %v2774_v17, %v7546_v47  ;;  %v2793_v56 = vadd.f32 %v2776_v13, %v7548_v42 }
 0x567   :  { %5822 = vpow2.f32 %v5014_v58  ;;  %v5015_v30 = vmul.f32 -1.442695, %v2788_v10  ;;  %v5016_v28 = vmul.f32 -1.442695, %v2789_v57  ;;  %v5018_v50 = vmul.f32 -1.442695, %v2791_v8 }
 0x568   :  { %v2794_v7 = vadd.f32 %v2778_v15, %v7553_v52  ;;  %v5017_v27 = vmul.f32 -1.442695, %v2790_v45  ;;  %v5019_v22 = vmul.f32 -1.442695, %v2792_v32  ;;  %v5020_v24 = vmul.f32 -1.442695, %v2793_v56 }
 0x569   :  { %5824 = vpow2.f32 %v5015_v30  ;;  %v2882_v16 = vrot.slane %v2868_v5, %v6623_v54  ;;  %v2852_v58 = vrot.slane %v7536_v11, 1  ;;  %v2853_v10 = vrot.slane %v7538_v23, 1 }
 0x56a   :  { %5826 = vpow2.f32 %v5016_v28  ;;  %v5021_v17 = vmul.f32 -1.442695, %v2794_v7  ;;  %v2855_v45 = vrot.slane %v7542_v20, 1  ;;  %v2883_v15 = vcombine.high %v2875_v2, %v2875_v2 }
 0x56b   :  { %5828 = vpow2.f32 %v5017_v27  ;;  %v2891_v13 = vrot.slane %v2875_v2, %v6623_v54  ;;  %v2854_v28 = vrot.slane %v7540_v38, 1  ;;  %v2898_v32 = vrot.slane %v2882_v16, %v6623_v54 }
 0x56c   :  { %5830 = vpow2.f32 %v5018_v50  ;;  %v2884_v39 = vcombine.high %v2882_v16, %v2882_v16  ;;  %v2905_v27 = vrot.slane %v2883_v15, %v6623_v54 }
 0x56d   :  { %5832 = vpow2.f32 %v5019_v22  ;;  %v2913_v5 = vcombine.high %v2891_v13, %v2891_v13  ;;  %v2925_v57 = vadd.f32 %v2891_v13, %v2851_v55  ;;  %v2929_v30 = vadd.f32 %v2898_v32, %v2855_v45 }
 0x56e   :  { %5834 = vpow2.f32 %v5020_v24  ;;  %v2915_v8 = vcombine.high %v2905_v27, %v2905_v27  ;;  %v2926_v56 = vadd.f32 %v2905_v27, %v2852_v58  ;;  %v2912_v49 = vrot.slane %v2884_v39, %v6623_v54 }
 0x56f   :  { %5836 = vpow2.f32 %v5021_v17  ;;  %v2927_v50 = vadd.f32 %v2913_v5, %v2853_v10  ;;  %v5022_v7 = vmul.f32 -1.442695, %v2925_v57  ;;  %v2856_v24 = vrot.slane %v7546_v47, 1  ;;  %v7577_v10 = vld [vmem:[%s8004_s2] ss:$0 sm:$0xff] }
 0x570   :  { %v2928_v2 = vadd.f32 %v2915_v8, %v2854_v28  ;;  %v5023_v22 = vmul.f32 -1.442695, %v2926_v56  ;;  %v5026_v15 = vmul.f32 -1.442695, %v2929_v30  ;;  %v2857_v55 = vrot.slane %v7548_v42, 1 }
 0x571   :  { %v5024_v1 = vmul.f32 -1.442695, %v2927_v50  ;;  %5838 = vpow2.f32 %v5022_v7  ;;  %v2914_v17 = vcombine.high %v2898_v32, %v2898_v32  ;;  %v2981_v45 = vadd.f32 %v7577_v10, %v7529_v59 }
 0x572   :  { %5840 = vpow2.f32 %v5023_v22  ;;  %v5025_v16 = vmul.f32 -1.442695, %v2928_v2  ;;  %v2858_v13 = vrot.slane %v7553_v52, 1  ;;  %v2916_v28 = vcombine.high %v2912_v49, %v2912_v49 }
 0x573   :  { %5842 = vpow2.f32 %v5024_v1  ;;  %v2930_v32 = vadd.f32 %v2912_v49, %v2856_v24  ;;  %v2931_v8 = vadd.f32 %v2914_v17, %v2857_v55  ;;  %v2983_v30 = vcombine.high %v2981_v45, %v2981_v45 }
 0x574   :  { %v5823_v46 = vpop.eup %5822  ;;  %5844 = vpow2.f32 %v5025_v16  ;;  %v2932_v59 = vadd.f32 %v2916_v28, %v2858_v13  ;;  %v2990_v22 = vrot.slane %v2981_v45, %v6623_v54 }
 0x575   :  { %v2819_v53 = vadd.f32 1.0, %v5823_v46  ;;  %v5028_v24 = vmul.f32 -1.442695, %v2931_v8 }
 0x576   :  { %v5825_v58 = vpop.eup %5824  ;;  %v5029_v55 = vmul.f32 -1.442695, %v2932_v59  ;;  %v2998_v17 = vcombine.high %v2990_v22, %v2990_v22  ;;  %v3051_v59 = vrot.slane %v7540_v38, 2 }
 0x577   :  { %v5827_v39 = vpop.eup %5826  ;;  %v2820_v27 = vadd.f32 1.0, %v5825_v58  ;;  %5846 = vrcp.f32 %v2819_v53  ;;  %v5027_v58 = vmul.f32 -1.442695, %v2930_v32 }
 0x578   :  { %v5829_v46 = vpop.eup %5828  ;;  %v2821_v5 = vadd.f32 1.0, %v5827_v39  ;;  %5848 = vpow2.f32 %v5026_v15  ;;  %v2997_v15 = vrot.slane %v2983_v30, %v6623_v54  ;;  %v3050_v30 = vrot.slane %v7538_v23, 2 }
 0x579   :  { %v5831_v1 = vpop.eup %5830  ;;  %v2822_v57 = vadd.f32 1.0, %v5829_v46  ;;  %5850 = vrcp.f32 %v2820_v27  ;;  %v3006_v46 = vrot.slane %v2990_v22, %v6623_v54 }
 0x57a   :  { %v5833_v56 = vpop.eup %5832  ;;  %v2823_v50 = vadd.f32 1.0, %v5831_v1  ;;  %5852 = vrcp.f32 %v2821_v5  ;;  %v2999_v45 = vcombine.high %v2997_v15, %v2997_v15  ;;  %v3048_v1 = vrot.slane %v7532_v21, 2 }
 0x57b   :  { %v5835_v7 = vpop.eup %5834  ;;  %v2824_v2 = vadd.f32 1.0, %v5833_v56  ;;  %5854 = vrcp.f32 %v2822_v57  ;;  %v3020_v57 = vrot.slane %v2998_v17, %v6623_v54  ;;  %v3013_v22 = vrot.slane %v2997_v15, %v6623_v54 }
 0x57c   :  { %v5837_v16 = vpop.eup %5836  ;;  %v2825_v53 = vadd.f32 1.0, %v5835_v7  ;;  %5856 = vrcp.f32 %v2823_v50  ;;  %v3049_v50 = vrot.slane %v7536_v11, 2  ;;  %v3027_v21 = vrot.slane %v2999_v45, %v6623_v54 }
 0x57d   :  { %v2826_v49 = vadd.f32 1.0, %v5837_v16  ;;  %5858 = vrcp.f32 %v2824_v2  ;;  %v3052_v16 = vrot.slane %v7542_v20, 2  ;;  %v3030_v11 = vcombine.high %v3020_v57, %v3020_v57 }
 0x57e   :  { %5860 = vrcp.f32 %v2825_v53  ;;  %v5839_v39 = vpop.eup %5838  ;;  %v3054_v20 = vrot.slane %v7548_v42, 2 }
 0x57f   :  { %5862 = vrcp.f32 %v2826_v49  ;;  %v5841_v13 = vpop.eup %5840  ;;  %v2957_v28 = vadd.f32 1.0, %v5839_v39  ;;  %v3028_v49 = vcombine.high %v3006_v46, %v3006_v46  ;;  %v3053_v39 = vrot.slane %v7546_v47, 2 }
 0x580   :  { %5864 = vpow2.f32 %v5027_v58  ;;  %v5843_v27 = vpop.eup %5842  ;;  %v2958_v5 = vadd.f32 1.0, %v5841_v13 }
 0x581   :  { %5866 = vpow2.f32 %v5028_v24  ;;  %v5845_v32 = vpop.eup %5844  ;;  %v2959_v8 = vadd.f32 1.0, %v5843_v27 }
 0x582   :  { %5868 = vpow2.f32 %v5029_v55  ;;  %v2960_v7 = vadd.f32 1.0, %v5845_v32 }
 0x583   :  { %5870 = vrcp.f32 %v2957_v28  ;;  %v3055_v28 = vrot.slane %v7553_v52, 2 }
 0x584   :  { %v5847_v56 = vpop.eup %5846  ;;  %5872 = vrcp.f32 %v2958_v5  ;;  %v3029_v5 = vcombine.high %v3013_v22, %v3013_v22 }
 0x585   :  { %v5849_v2 = vpop.eup %5848  ;;  %v3040_v53 = vmul.f32 %v5847_v56, %v3006_v46  ;;  %5874 = vrcp.f32 %v2959_v8 }
 0x586   :  { %v5851_v58 = vpop.eup %5850  ;;  %v2961_v24 = vadd.f32 1.0, %v5849_v2  ;;  %5876 = vrcp.f32 %v2960_v7 }
 0x587   :  { %v5853_v55 = vpop.eup %5852  ;;  %v3041_v17 = vmul.f32 %v5851_v58, %v3020_v57  ;;  %v3064_v23 = vadd.f32 %v3048_v1, %v3040_v53  ;;  %v3031_v57 = vcombine.high %v3027_v21, %v3027_v21 }
 0x588   :  { %v5855_v38 = vpop.eup %5854  ;;  %v3042_v13 = vmul.f32 %v5853_v55, %v3028_v49 }
 0x589   :  { %v5857_v15 = vpop.eup %5856  ;;  %v3043_v27 = vmul.f32 %v5855_v38, %v3030_v11  ;;  %v3065_v45 = vadd.f32 %v3049_v50, %v3041_v17  ;;  %5878 = vtanh.f32 %v3064_v23 }
 0x58a   :  { %v5859_v46 = vpop.eup %5858  ;;  %v3044_v32 = vmul.f32 %v5857_v15, %v3013_v22  ;;  %v3066_v56 = vadd.f32 %v3050_v30, %v3042_v13  ;;  %5880 = vrcp.f32 %v2961_v24 }
 0x58b   :  { %v5861_v1 = vpop.eup %5860  ;;  %v3045_v8 = vmul.f32 %v5859_v46, %v3027_v21  ;;  %v3067_v2 = vadd.f32 %v3051_v59, %v3043_v27  ;;  %5882 = vtanh.f32 %v3065_v45 }
 0x58c   :  { %v5863_v47 = vpop.eup %5862  ;;  %v3046_v42 = vmul.f32 %v5861_v1, %v3029_v5  ;;  %v3068_v53 = vadd.f32 %v3052_v16, %v3044_v32  ;;  %5884 = vtanh.f32 %v3066_v56 }
 0x58d   :  { %v5865_v7 = vpop.eup %5864  ;;  %v3047_v58 = vmul.f32 %v5863_v47, %v3031_v57  ;;  %v3069_v52 = vadd.f32 %v3053_v39, %v3045_v8  ;;  %5886 = vtanh.f32 %v3067_v2 }
 0x58e   :  { %v5867_v50 = vpop.eup %5866  ;;  %v3070_v49 = vadd.f32 %v3054_v20, %v3046_v42  ;;  %5888 = vtanh.f32 %v3068_v53  ;;  %v2962_v55 = vadd.f32 1.0, %v5865_v7 }
 0x58f   :  { %v5869_v22 = vpop.eup %5868  ;;  %v3071_v30 = vadd.f32 %v3055_v28, %v3047_v58  ;;  %5890 = vtanh.f32 %v3069_v52  ;;  %v2963_v24 = vadd.f32 1.0, %v5867_v50 }
 0x590   :  { %5892 = vtanh.f32 %v3070_v49  ;;  %v2964_v21 = vadd.f32 1.0, %v5869_v22  ;;  %v5871_v59 = vpop.eup %5870 }
 0x591   :  { %5894 = vtanh.f32 %v3071_v30  ;;  %v5873_v11 = vpop.eup %5872 }
 0x592   :  { %5896 = vrcp.f32 %v2962_v55  ;;  %v5875_v16 = vpop.eup %5874 }
 0x593   :  { %5898 = vrcp.f32 %v2963_v24  ;;  %v5877_v17 = vpop.eup %5876 }
 0x594   :  { %5900 = vrcp.f32 %v2964_v21 }
 0x596   :  { %v5879_v23 = vpop.eup %5878 }
 0x597   :  { %v5881_v38 = vpop.eup %5880  ;;  %v3080_v20 = vsub.f32 %v7344_v35, %v5879_v23 }
 0x598   :  { %v5883_v39 = vpop.eup %5882 }
 0x599   :  { %v5885_v13 = vpop.eup %5884  ;;  %v3081_v15 = vsub.f32 %v7337_v4, %v5883_v39  ;;  %v3088_v1 = vmul.f32 %v5871_v59, %v3080_v20 }
 0x59a   :  { %v5887_v28 = vpop.eup %5886  ;;  %v3082_v27 = vsub.f32 %v7340_v9, %v5885_v13 }
 0x59b   :  { %v5889_v45 = vpop.eup %5888  ;;  %v3083_v46 = vsub.f32 %v7342_v62, %v5887_v28  ;;  %v3089_v5 = vmul.f32 %v5873_v11, %v3081_v15  ;;  %v7610_v50 = vadd.f32 %v5879_v23, %v3088_v1  ;;  %v8252_v1 = vld [vmem:[#allocation36_spill] sm:$0xff] }
 0x59c   :  { %v5891_v32 = vpop.eup %5890  ;;  %v3084_v56 = vsub.f32 %v7348_v0, %v5889_v45  ;;  %v3090_v57 = vmul.f32 %v5875_v16, %v3082_v27  ;;  %v8246_v27 = vld [vmem:[#allocation25_spill] sm:$0xff] }
 0x59d   :  { %v5893_v8 = vpop.eup %5892  ;;  %v3085_v2 = vsub.f32 %v7350_v36, %v5891_v32  ;;  %v3091_v47 = vmul.f32 %v5877_v17, %v3083_v46  ;;  %v7603_v53 = vadd.f32 %v5883_v39, %v3089_v5  ;;  %v8248_v46 = vld [vmem:[#allocation34_spill] sm:$0xff]  ;;  %v8249_v5 = vld [vmem:[#allocation28_spill] sm:$0xff] }
 0x59e   :  { %v5895_v35 = vpop.eup %5894  ;;  %v3086_v42 = vsub.f32 %v7354_v31, %v5893_v8  ;;  %v3092_v4 = vmul.f32 %v5881_v38, %v3084_v56  ;;  %v7606_v62 = vadd.f32 %v5885_v13, %v3090_v57  ;;  %v8251_v56 = vld [vmem:[#allocation35_spill] sm:$0xff]  ;;  %v8253_v57 = vld [vmem:[#allocation37_spill] sm:$0xff] }
 0x59f   :  { %v5897_v9 = vpop.eup %5896  ;;  %v3087_v7 = vsub.f32 %v7356_v48, %v5895_v35  ;;  %v7608_v58 = vadd.f32 %v5887_v28, %v3091_v47  ;;  %v3128_v48 = vcombine.low %v7610_v50, %v7603_v53 }
 0x5a0   :  { %v5899_v0 = vpop.eup %5898  ;;  %v3093_v52 = vmul.f32 %v5897_v9, %v3085_v2  ;;  %v7614_v22 = vadd.f32 %v5889_v45, %v3092_v4  ;;  %v8247_v45 = vld [vmem:[#allocation27_spill] sm:$0xff]  ;;  %v6240_v2 = vld [vmem:[#allocation5 + $0x170] sm:$0xff] }
 0x5a1   :  { %v5901_v49 = vpop.eup %5900  ;;  %v3094_v36 = vmul.f32 %v5899_v0, %v3086_v42  ;;  %v3129_v55 = vcombine.low %v7606_v62, %v7608_v58  ;;  %v3138_v17 = vrot.slane %v3128_v48, %v6623_v54  ;;  %v7713_v48 = vld [vmem:[#allocation2 + $0x65] ss:$8 sm:$0x7] }
 0x5a2   :  { %v3095_v31 = vmul.f32 %v5901_v49, %v3087_v7  ;;  %v7616_v30 = vadd.f32 %v5891_v32, %v3093_v52  ;;  %v8250_v32 = vld [vmem:[#allocation30_spill] sm:$0xff] }
 0x5a3   :  { %v7620_v24 = vadd.f32 %v5893_v8, %v3094_v36  ;;  %v3145_v11 = vrot.slane %v3129_v55, %v6623_v54  ;;  %v8254_v8 = vld [vmem:[#allocation38_spill] sm:$0xff] }
 0x5a4   :  { %v7622_v21 = vadd.f32 %v5895_v35, %v3095_v31  ;;  %v3130_v59 = vcombine.low %v7614_v22, %v7616_v30  ;;  %v7703_v7 = vld [vmem:[#allocation2 + $0x5] ss:$8 sm:$0x7] }
 0x5a5   :  { %v3160_v39 = vcombine.low %v3138_v17, %v3145_v11  ;;  %v7707_v36 = vld [vmem:[#allocation2 + $0x1d] ss:$8 sm:$0x7] }
 0x5a6   :  { %v3131_v16 = vcombine.low %v7620_v24, %v7622_v21  ;;  %v3152_v23 = vrot.slane %v3130_v59, %v6623_v54  ;;  %v7709_v55 = vld [vmem:[#allocation2 + $0x35] ss:$8 sm:$0x7] }
 0x5a7   :  { %v3168_v13 = vrot.slane %v3160_v39, %v6623_v54  ;;  %v7711_v31 = vld [vmem:[#allocation2 + $0x4d] ss:$8 sm:$0x7] }
 0x5a8   :  { %v3159_v38 = vrot.slane %v3131_v16, %v6623_v54  ;;  %v7719_v39 = vld [vmem:[#allocation2 + $0x95] ss:$8 sm:$0x7] }
 0x5aa   :  { %v3161_v20 = vcombine.low %v3152_v23, %v3159_v38  ;;  %v7717_v38 = vld [vmem:[#allocation2 + $0x7d] ss:$8 sm:$0x7] }
 0x5ac   :  { %v3175_v15 = vrot.slane %v3161_v20, %v6623_v54 }
 0x5ae   :  { %v3176_v28 = vcombine.low %v3168_v13, %v3175_v15 }
 0x5b0   :  { %3243 = vmatmul.mubr.f32.vlgmr.msra.gmra.mxu0 %v3176_v28  ;;  %5422 = vmatmul.mubr.f32.vlgmr.msra.gmra.mxu1 %v3176_v28 }
 0x5b1   :  { %3769 = vmatpush1.msra.mxu0 %v7368_v33  ;;  %5425 = vmatpush3.msra.mxu1 %v7371_v19  ;;  %v8227_v33 = vld [vmem:[#allocation20_spill] sm:$0xff]  ;;  %v8228_v19 = vld [vmem:[#allocation11_spill] sm:$0xff] }
 0x5b2   :  { %3770 = vmatprep.subr.mxu0 %v7374_v12  ;;  %5426 = vmatprep.subr.mxu1 %v8116_v43  ;;  %v8229_v12 = vld [vmem:[#allocation12_spill] sm:$0xff] }
 0x5b3   :  { %3771 = vmatpush1.msra.mxu0 %v7378_v40  ;;  %5427 = vmatpush3.msra.mxu1 %v7381_v44  ;;  %v8230_v40 = vld [vmem:[#allocation23_spill] sm:$0xff]  ;;  %v8231_v44 = vld [vmem:[#allocation13_spill] sm:$0xff] }
 0x5b4   :  { %3772 = vmatprep.subr.mxu0 %v7384_v60  ;;  %5428 = vmatprep.subr.mxu1 %v8116_v43  ;;  %v8232_v60 = vld [vmem:[#allocation14_spill] sm:$0xff] }
 0x5b5   :  { %3773 = vmatpush1.msra.mxu0 %v7388_v14  ;;  %5429 = vmatpush3.msra.mxu1 %v7391_v41  ;;  %v8233_v14 = vld [vmem:[#allocation26_spill] sm:$0xff]  ;;  %v8234_v41 = vld [vmem:[#allocation15_spill] sm:$0xff] }
 0x5b6   :  { %3774 = vmatprep.subr.mxu0 %v7394_v3  ;;  %5430 = vmatprep.subr.mxu1 %v8116_v43  ;;  %v8235_v3 = vld [vmem:[#allocation16_spill] sm:$0xff] }
 0x5b7   :  { %3775 = vmatpush1.msra.mxu0 %v7398_v63  ;;  %5431 = vmatpush3.msra.mxu1 %v7401_v18  ;;  %v8236_v63 = vld [vmem:[#allocation29_spill] sm:$0xff] }
 0x5b8   :  { %3776 = vmatprep.subr.mxu0 %v7404_v34  ;;  %5432 = vmatprep.subr.mxu1 %v8116_v43  ;;  %v8237_v18 = vld [vmem:[#allocation17_spill] sm:$0xff]  ;;  %v8238_v34 = vld [vmem:[#allocation18_spill] sm:$0xff] }
 0x5b9   :  { %3777 = vmatpush1.msra.mxu0 %v7408_v26  ;;  %5433 = vmatpush3.msra.mxu1 %v7411_v51  ;;  %v8239_v26 = vld [vmem:[#allocation31_spill] sm:$0xff] }
 0x5ba   :  { %3778 = vmatprep.subr.mxu0 %v7414_v37  ;;  %5434 = vmatprep.subr.mxu1 %v8116_v43  ;;  %v8240_v51 = vld [vmem:[#allocation19_spill] sm:$0xff]  ;;  %v8241_v37 = vld [vmem:[#allocation21_spill] sm:$0xff] }
 0x5bb   :  { %3779 = vmatpush1.msra.mxu0 %v7418_v25  ;;  %5435 = vmatpush3.msra.mxu1 %v7421_v29  ;;  %v8242_v25 = vld [vmem:[#allocation32_spill] sm:$0xff]  ;;  %v8243_v29 = vld [vmem:[#allocation22_spill] sm:$0xff] }
 0x5bc   :  { %3780 = vmatprep.subr.mxu0 %v7424_v6  ;;  %5436 = vmatprep.subr.mxu1 %v8116_v43  ;;  %v8244_v6 = vld [vmem:[#allocation24_spill] sm:$0xff] }
 0x5bd   :  { %3781 = vmatpush1.msra.mxu0 %v7428_v61  ;;  %5437 = vmatpush3.msra.mxu1 %v8227_v33  ;;  %v8245_v61 = vld [vmem:[#allocation33_spill] sm:$0xff] }
 0x5be   :  { %3782 = vmatprep.subr.mxu0 %v8228_v19  ;;  %5438 = vmatprep.subr.mxu1 %v8116_v43  ;;  %v7724_v19 = vld [vmem:[#allocation2 + $0xad] ss:$8 sm:$0x7] }
 0x5bf   :  { %3783 = vmatpush1.msra.mxu0 %v8229_v12  ;;  %5439 = vmatpush3.msra.mxu1 %v8230_v40 }
 0x5c0   :  { %3784 = vmatprep.subr.mxu0 %v8231_v44  ;;  %5440 = vmatprep.subr.mxu1 %v8116_v43 }
 0x5c1   :  { %3785 = vmatpush1.msra.mxu0 %v8232_v60  ;;  %5441 = vmatpush3.msra.mxu1 %v8233_v14 }
 0x5c2   :  { %3786 = vmatprep.subr.mxu0 %v8234_v41  ;;  %5442 = vmatprep.subr.mxu1 %v8116_v43 }
 0x5c3   :  { %3787 = vmatpush1.msra.mxu0 %v8235_v3  ;;  %5443 = vmatpush3.msra.mxu1 %v8236_v63 }
 0x5c4   :  { %3788 = vmatprep.subr.mxu0 %v8237_v18  ;;  %5444 = vmatprep.subr.mxu1 %v8116_v43 }
 0x5c5   :  { %3789 = vmatpush1.msra.mxu0 %v8238_v34  ;;  %5445 = vmatpush3.msra.mxu1 %v8239_v26 }
 0x5c6   :  { %3790 = vmatprep.subr.mxu0 %v8240_v51  ;;  %5446 = vmatprep.subr.mxu1 %v8116_v43 }
 0x5c7   :  { %3791 = vmatpush1.msra.mxu0 %v8241_v37  ;;  %5447 = vmatpush3.msra.mxu1 %v8242_v25 }
 0x5c8   :  { %3792 = vmatprep.subr.mxu0 %v8243_v29  ;;  %5448 = vmatprep.subr.mxu1 %v8116_v43 }
 0x5c9   :  { %3793 = vmatpush1.msra.mxu0 %v8244_v6  ;;  %5449 = vmatpush3.msra.mxu1 %v8245_v61  ;;  %v3441_v61 = vrot.slane %v7703_v7, 1 }
 0x5ca   :  { %3794 = vmatprep.subr.mxu0 %v8246_v27  ;;  %5450 = vmatprep.subr.mxu1 %v8116_v43 }
 0x5cb   :  { %3795 = vmatpush1.msra.mxu0 %v8247_v45  ;;  %5451 = vmatpush3.msra.mxu1 %v8248_v46  ;;  %v3442_v46 = vrot.slane %v7707_v36, 1 }
 0x5cc   :  { %3796 = vmatprep.subr.mxu0 %v8249_v5  ;;  %5452 = vmatprep.subr.mxu1 %v8116_v43  ;;  %v3443_v5 = vrot.slane %v7709_v55, 1 }
 0x5cd   :  { %3797 = vmatpush1.msra.mxu0 %v8250_v32  ;;  %5453 = vmatpush3.msra.mxu1 %v8251_v56  ;;  %v3445_v32 = vrot.slane %v7713_v48, 1 }
 0x5ce   :  { %3798 = vmatprep.subr.mxu0 %v8252_v1  ;;  %5454 = vmatprep.subr.mxu1 %v8116_v43 }
 0x5cf   :  { %3799 = vmatpush1.msra.mxu0 %v8253_v57  ;;  %3832 = vmatprep.mubr.f32.mxu0 %v8116_v43  ;;  %v3444_v57 = vrot.slane %v7711_v31, 1 }
 0x5d0   :  { %5455 = vmatpush3.msra.mxu1 %v8254_v8  ;;  %5456 = vmatprep.mubr.msk.f32.mxu1 %vm6360_vm0, %v8116_v43 }
 0x5d1   :  { %4358 = vmatprep.subr.mxu0 %v6240_v2  ;;  %5459 = vmatprep.subr.mxu1 %v8116_v43 }
 0x670   :  { %v3244_v47 = vpop.f32.mrf.mxu0  ;;  %v7700_v35 = vpop.f32.mrf.mxu1 }
 0x671   :  { %v3320_v42 = vcombine.high %v3244_v47, %v3244_v47  ;;  %v3327_v4 = vrot.slane %v3244_v47, %v6623_v54 }
 0x672   :  { %v5423_v9 = vpop.f32.mrf.mxu1  ;;  %v3246_v23 = vpop.f32.mrf.mxu0 }
 0x673   :  { %v3334_v0 = vrot.slane %v3320_v42, %v6623_v54  ;;  %v3335_v52 = vcombine.high %v3327_v4, %v3327_v4  ;;  %v3343_v49 = vrot.slane %v3327_v4, %v6623_v54  ;;  %v3458_v60 = vcombine.high %v3246_v23, %v3246_v23 }
 0x674   :  { %v3465_v25 = vrot.slane %v3246_v23, %v6623_v54 }
 0x675   :  { %v3336_v59 = vcombine.high %v3334_v0, %v3334_v0  ;;  %v3350_v11 = vrot.slane %v3334_v0, %v6623_v54  ;;  %v3357_v16 = vrot.slane %v3335_v52, %v6623_v54  ;;  %v3365_v17 = vcombine.high %v3343_v49, %v3343_v49 }
 0x676   :  { %v3377_v20 = vadd.f32 %v3343_v49, %v7703_v7  ;;  %v3472_v27 = vrot.slane %v3458_v60, %v6623_v54  ;;  %v3473_v56 = vcombine.high %v3465_v25, %v3465_v25  ;;  %v3481_v1 = vrot.slane %v3465_v25, %v6623_v54 }
 0x677   :  { %v3364_v13 = vrot.slane %v3336_v59, %v6623_v54  ;;  %v3366_v15 = vcombine.high %v3350_v11, %v3350_v11  ;;  %v3367_v28 = vcombine.high %v3357_v16, %v3357_v16  ;;  %v3378_v33 = vadd.f32 %v3357_v16, %v7707_v36 }
 0x678   :  { %v3379_v12 = vadd.f32 %v3365_v17, %v7709_v55  ;;  %v3381_v40 = vadd.f32 %v3350_v11, %v7713_v48  ;;  %v5030_v44 = vmul.f32 -1.442695, %v3377_v20  ;;  %v3488_v8 = vrot.slane %v3472_v27, %v6623_v54 }
 0x679   :  { %v3368_v14 = vcombine.high %v3364_v13, %v3364_v13  ;;  %v3380_v41 = vadd.f32 %v3367_v28, %v7711_v31  ;;  %v3382_v3 = vadd.f32 %v3364_v13, %v7717_v38  ;;  %v3383_v63 = vadd.f32 %v3366_v15, %v7719_v39 }
 0x67a   :  { %5902 = vpow2.f32 %v5030_v44  ;;  %v5031_v18 = vmul.f32 -1.442695, %v3378_v33  ;;  %v5032_v34 = vmul.f32 -1.442695, %v3379_v12  ;;  %v5034_v37 = vmul.f32 -1.442695, %v3381_v40 }
 0x67b   :  { %v3384_v26 = vadd.f32 %v3368_v14, %v7724_v19  ;;  %v5033_v51 = vmul.f32 -1.442695, %v3380_v41  ;;  %v5035_v29 = vmul.f32 -1.442695, %v3382_v3  ;;  %v5036_v6 = vmul.f32 -1.442695, %v3383_v63 }
 0x67c   :  { %5904 = vpow2.f32 %v5031_v18  ;;  %v3474_v2 = vcombine.high %v3472_v27, %v3472_v27  ;;  %v3495_v47 = vrot.slane %v3473_v56, %v6623_v54  ;;  %v3503_v42 = vcombine.high %v3481_v1, %v3481_v1 }
 0x67d   :  { %5906 = vpow2.f32 %v5032_v34  ;;  %v5037_v45 = vmul.f32 -1.442695, %v3384_v26  ;;  %v3515_v4 = vadd.f32 %v3481_v1, %v3441_v61  ;;  %v3519_v49 = vadd.f32 %v3488_v8, %v3445_v32 }
 0x67e   :  { %5908 = vpow2.f32 %v5033_v51  ;;  %v3505_v9 = vcombine.high %v3495_v47, %v3495_v47  ;;  %v3516_v0 = vadd.f32 %v3495_v47, %v3442_v46  ;;  %v3517_v52 = vadd.f32 %v3503_v42, %v3443_v5 }
 0x67f   :  { %5910 = vpow2.f32 %v5034_v37  ;;  %v5038_v59 = vmul.f32 -1.442695, %v3515_v4  ;;  %v3502_v11 = vrot.slane %v3474_v2, %v6623_v54  ;;  %v3446_v13 = vrot.slane %v7717_v38, 1 }
 0x680   :  { %5912 = vpow2.f32 %v5035_v29  ;;  %v3518_v16 = vadd.f32 %v3505_v9, %v3444_v57  ;;  %v5039_v17 = vmul.f32 -1.442695, %v3516_v0  ;;  %v5040_v23 = vmul.f32 -1.442695, %v3517_v52 }
 0x681   :  { %5914 = vpow2.f32 %v5036_v6  ;;  %v5042_v28 = vmul.f32 -1.442695, %v3519_v49  ;;  %v3447_v12 = vrot.slane %v7719_v39, 1  ;;  %v3504_v40 = vcombine.high %v3488_v8, %v3488_v8 }
 0x682   :  { %5916 = vpow2.f32 %v5037_v45  ;;  %v5041_v15 = vmul.f32 -1.442695, %v3518_v16  ;;  %v3571_v60 = vadd.f32 %v7577_v10, %v7700_v35  ;;  %v3448_v14 = vrot.slane %v7724_v19, 1 }
 0x683   :  { %5918 = vpow2.f32 %v5038_v59  ;;  %v3506_v41 = vcombine.high %v3502_v11, %v3502_v11  ;;  %v3520_v26 = vadd.f32 %v3502_v11, %v3446_v13  ;;  %v3521_v25 = vadd.f32 %v3504_v40, %v3447_v12 }
 0x684   :  { %5920 = vpow2.f32 %v5039_v17  ;;  %v3573_v61 = vcombine.high %v3571_v60, %v3571_v60  ;;  %v3580_v45 = vrot.slane %v3571_v60, %v6623_v54  ;;  %v3638_v11 = vrot.slane %v7703_v7, 2 }
 0x685   :  { %5922 = vpow2.f32 %v5040_v23  ;;  %v3522_v10 = vadd.f32 %v3506_v41, %v3448_v14  ;;  %v5043_v32 = vmul.f32 -1.442695, %v3520_v26  ;;  %v5044_v1 = vmul.f32 -1.442695, %v3521_v25 }
 0x686   :  { %5924 = vpow2.f32 %v5041_v15  ;;  %v3587_v57 = vrot.slane %v3573_v61, %v6623_v54  ;;  %v3588_v2 = vcombine.high %v3580_v45, %v3580_v45  ;;  %v3596_v52 = vrot.slane %v3580_v45, %v6623_v54 }
 0x687   :  { %v5903_v20 = vpop.eup %5902  ;;  %v5045_v8 = vmul.f32 -1.442695, %v3522_v10  ;;  %v3640_v13 = vrot.slane %v7709_v55, 2  ;;  %v3641_v15 = vrot.slane %v7711_v31, 2  ;;  %v3642_v12 = vrot.slane %v7713_v48, 2 }
 0x688   :  { %v3409_v33 = vadd.f32 1.0, %v5903_v20  ;;  %v3589_v0 = vcombine.high %v3587_v57, %v3587_v57  ;;  %v3610_v16 = vrot.slane %v3588_v2, %v6623_v54  ;;  %v3639_v20 = vrot.slane %v7707_v36, 2 }
 0x689   :  { %v5905_v44 = vpop.eup %5904  ;;  %v3603_v40 = vrot.slane %v3587_v57, %v6623_v54  ;;  %v3618_v14 = vcombine.high %v3596_v52, %v3596_v52  ;;  %v3644_v48 = vrot.slane %v7719_v39, 2 }
 0x68a   :  { %v5907_v3 = vpop.eup %5906  ;;  %v3410_v63 = vadd.f32 1.0, %v5905_v44  ;;  %5926 = vrcp.f32 %v3409_v33  ;;  %v3617_v7 = vrot.slane %v3589_v0, %v6623_v54  ;;  %v3620_v36 = vcombine.high %v3610_v16, %v3610_v16 }
 0x68b   :  { %v5909_v18 = vpop.eup %5908  ;;  %v3411_v34 = vadd.f32 1.0, %v5907_v3  ;;  %5928 = vpow2.f32 %v5042_v28 }
 0x68c   :  { %v5911_v51 = vpop.eup %5910  ;;  %v3412_v37 = vadd.f32 1.0, %v5909_v18  ;;  %5930 = vrcp.f32 %v3410_v63  ;;  %v3643_v18 = vrot.slane %v7717_v38, 2 }
 0x68d   :  { %v5913_v29 = vpop.eup %5912  ;;  %v3413_v6 = vadd.f32 1.0, %v5911_v51  ;;  %5932 = vrcp.f32 %v3411_v34  ;;  %v3645_v51 = vrot.slane %v7724_v19, 2 }
 0x68e   :  { %v5915_v35 = vpop.eup %5914  ;;  %v3414_v27 = vadd.f32 1.0, %v5913_v29  ;;  %5934 = vrcp.f32 %v3412_v37 }
 0x68f   :  { %v5917_v46 = vpop.eup %5916  ;;  %v3415_v5 = vadd.f32 1.0, %v5915_v35  ;;  %5936 = vrcp.f32 %v3413_v6  ;;  %v3619_v6 = vcombine.high %v3603_v40, %v3603_v40 }
 0x690   :  { %v3416_v56 = vadd.f32 1.0, %v5917_v46  ;;  %5938 = vrcp.f32 %v3414_v27  ;;  %v5919_v47 = vpop.eup %5918  ;;  %v3621_v27 = vcombine.high %v3617_v7, %v3617_v7 }
 0x691   :  { %5940 = vrcp.f32 %v3415_v5  ;;  %v5921_v42 = vpop.eup %5920  ;;  %v3547_v4 = vadd.f32 1.0, %v5919_v47 }
 0x692   :  { %5942 = vrcp.f32 %v3416_v56  ;;  %v5923_v9 = vpop.eup %5922  ;;  %v3548_v49 = vadd.f32 1.0, %v5921_v42 }
 0x693   :  { %5944 = vpow2.f32 %v5043_v32  ;;  %v5925_v59 = vpop.eup %5924  ;;  %v3549_v17 = vadd.f32 1.0, %v5923_v9 }
 0x694   :  { %5946 = vpow2.f32 %v5044_v1  ;;  %v3550_v28 = vadd.f32 1.0, %v5925_v59 }
 0x695   :  { %5948 = vpow2.f32 %v5045_v8 }
 0x696   :  { %5950 = vrcp.f32 %v3547_v4 }
 0x697   :  { %v5927_v23 = vpop.eup %5926  ;;  %5952 = vrcp.f32 %v3548_v49 }
 0x698   :  { %v5929_v33 = vpop.eup %5928  ;;  %v3630_v44 = vmul.f32 %v5927_v23, %v3596_v52  ;;  %5954 = vrcp.f32 %v3549_v17 }
 0x699   :  { %v5931_v60 = vpop.eup %5930  ;;  %v3551_v41 = vadd.f32 1.0, %v5929_v33  ;;  %5956 = vrcp.f32 %v3550_v28 }
 0x69a   :  { %v5933_v3 = vpop.eup %5932  ;;  %v3631_v63 = vmul.f32 %v5931_v60, %v3610_v16  ;;  %v3654_v55 = vadd.f32 %v3638_v11, %v3630_v44 }
 0x69b   :  { %v5935_v31 = vpop.eup %5934  ;;  %v3632_v34 = vmul.f32 %v5933_v3, %v3618_v14 }
 0x69c   :  { %v5937_v26 = vpop.eup %5936  ;;  %v3633_v37 = vmul.f32 %v5935_v31, %v3620_v36  ;;  %v3655_v25 = vadd.f32 %v3639_v20, %v3631_v63  ;;  %5958 = vtanh.f32 %v3654_v55 }
 0x69d   :  { %v5939_v29 = vpop.eup %5938  ;;  %v3634_v61 = vmul.f32 %v5937_v26, %v3603_v40  ;;  %v3656_v10 = vadd.f32 %v3640_v13, %v3632_v34  ;;  %5960 = vrcp.f32 %v3551_v41 }
 0x69e   :  { %v5941_v35 = vpop.eup %5940  ;;  %v3635_v45 = vmul.f32 %v5939_v29, %v3617_v7  ;;  %v3657_v46 = vadd.f32 %v3641_v15, %v3633_v37  ;;  %5962 = vtanh.f32 %v3655_v25 }
 0x69f   :  { %v5943_v38 = vpop.eup %5942  ;;  %v3636_v39 = vmul.f32 %v5941_v35, %v3619_v6  ;;  %v3658_v5 = vadd.f32 %v3642_v12, %v3634_v61  ;;  %5964 = vtanh.f32 %v3656_v10 }
 0x6a0   :  { %v5945_v32 = vpop.eup %5944  ;;  %v3637_v56 = vmul.f32 %v5943_v38, %v3621_v27  ;;  %v3659_v19 = vadd.f32 %v3643_v18, %v3635_v45  ;;  %5966 = vtanh.f32 %v3657_v46 }
 0x6a1   :  { %v5947_v1 = vpop.eup %5946  ;;  %v3660_v57 = vadd.f32 %v3644_v48, %v3636_v39  ;;  %5968 = vtanh.f32 %v3658_v5  ;;  %v3552_v8 = vadd.f32 1.0, %v5945_v32 }
 0x6a2   :  { %v5949_v2 = vpop.eup %5948  ;;  %v3661_v47 = vadd.f32 %v3645_v51, %v3637_v56  ;;  %5970 = vtanh.f32 %v3659_v19  ;;  %v3553_v42 = vadd.f32 1.0, %v5947_v1  ;;  %v6241_v56 = vld [vmem:[#allocation5 + $0x168] sm:$0xff]  ;;  %v6242_v19 = vld [vmem:[#allocation5 + $0x178] sm:$0xff] }
 0x6a3   :  { %5972 = vtanh.f32 %v3660_v57  ;;  %v3554_v4 = vadd.f32 1.0, %v5949_v2  ;;  %v5951_v9 = vpop.eup %5950  ;;  %v6243_v1 = vld [vmem:[#allocation5 + $0x158] sm:$0xff]  ;;  %v6244_v57 = vld [vmem:[#allocation5 + $0x150] sm:$0xff]  ;;  %v6246_v2 = vld [vmem:[#allocation5 + $0x140] sm:$0xff] }
 0x6a4   :  { %5974 = vtanh.f32 %v3661_v47  ;;  %v5953_v0 = vpop.eup %5952  ;;  %v6247_v47 = vld [vmem:[#allocation5 + $0x138] sm:$0xff] }
 0x6a5   :  { %5976 = vrcp.f32 %v3552_v8  ;;  %v5955_v52 = vpop.eup %5954  ;;  %v6245_v8 = vld [vmem:[#allocation5 + $0x160] sm:$0xff] }
 0x6a6   :  { %5978 = vrcp.f32 %v3553_v42  ;;  %v5957_v49 = vpop.eup %5956  ;;  %v6248_v42 = vld [vmem:[#allocation5 + $0x148] sm:$0xff] }
 0x6a7   :  { %5980 = vrcp.f32 %v3554_v4  ;;  %v6249_v4 = vld [vmem:[#allocation5 + $0x128] sm:$0xff] }
 0x6a9   :  { %v5959_v59 = vpop.eup %5958 }
 0x6aa   :  { %v5961_v11 = vpop.eup %5960  ;;  %v3670_v17 = vsub.f32 %v7610_v50, %v5959_v59 }
 0x6ab   :  { %v5963_v16 = vpop.eup %5962 }
 0x6ac   :  { %v5965_v23 = vpop.eup %5964  ;;  %v3671_v20 = vsub.f32 %v7603_v53, %v5963_v16  ;;  %v3678_v60 = vmul.f32 %v5951_v9, %v3670_v17  ;;  %v6250_v9 = vld [vmem:[#allocation5 + $0x120] sm:$0xff] }
 0x6ad   :  { %v5967_v13 = vpop.eup %5966  ;;  %v3672_v15 = vsub.f32 %v7606_v62, %v5965_v23  ;;  %v6257_v17 = vld [vmem:[#allocation5 + $0x100] sm:$0xff] }
 0x6ae   :  { %v5969_v28 = vpop.eup %5968  ;;  %v3673_v33 = vsub.f32 %v7608_v58, %v5967_v13  ;;  %v3679_v12 = vmul.f32 %v5953_v0, %v3671_v20  ;;  %v7776_v48 = vadd.f32 %v5959_v59, %v3678_v60  ;;  %v6251_v0 = vld [vmem:[#allocation5 + $0x130] sm:$0xff]  ;;  %v6254_v59 = vld [vmem:[#allocation5 + $0x118] sm:$0xff] }
 0x6af   :  { %v5971_v40 = vpop.eup %5970  ;;  %v3674_v44 = vsub.f32 %v7614_v22, %v5969_v28  ;;  %v3680_v7 = vmul.f32 %v5955_v52, %v3672_v15  ;;  %v6252_v52 = vld [vmem:[#allocation5 + $0x110] sm:$0xff]  ;;  %v6259_v20 = vld [vmem:[#allocation5 + $0xd8] sm:$0xff]  ;;  %v6261_v15 = vld [vmem:[#allocation5 + $0xc8] sm:$0xff] }
 0x6b0   :  { %v5973_v14 = vpop.eup %5972  ;;  %v3675_v41 = vsub.f32 %v7616_v30, %v5971_v40  ;;  %v3681_v3 = vmul.f32 %v5957_v49, %v3673_v33  ;;  %v7769_v63 = vadd.f32 %v5963_v16, %v3679_v12  ;;  %v6253_v49 = vld [vmem:[#allocation5 + $0x108] sm:$0xff]  ;;  %v6256_v16 = vld [vmem:[#allocation5 + $0xf0] sm:$0xff]  ;;  %v6267_v60 = vld [vmem:[#allocation5 + $0x98] sm:$0xff] }
 0x6b1   :  { %v5975_v50 = vpop.eup %5974  ;;  %v3676_v36 = vsub.f32 %v7620_v24, %v5973_v14  ;;  %v3682_v53 = vmul.f32 %v5961_v11, %v3674_v44  ;;  %v7772_v58 = vadd.f32 %v5965_v23, %v3680_v7  ;;  %v6255_v11 = vld [vmem:[#allocation5 + $0xf8] sm:$0xff]  ;;  %v6258_v23 = vld [vmem:[#allocation5 + $0xe0] sm:$0xff]  ;;  %v6263_v33 = vld [vmem:[#allocation5 + $0xd0] sm:$0xff] }
 0x6b2   :  { %v5977_v62 = vpop.eup %5976  ;;  %v3677_v55 = vsub.f32 %v7622_v21, %v5975_v50  ;;  %v7774_v31 = vadd.f32 %v5967_v13, %v3681_v3  ;;  %v3718_v21 = vcombine.low %v7776_v48, %v7769_v63  ;;  %v6260_v13 = vld [vmem:[#allocation5 + $0xe8] sm:$0xff]  ;;  %v6264_v12 = vld [vmem:[#allocation5 + $0xb0] sm:$0xff]  ;;  %v6266_v44 = vld [vmem:[#allocation5 + $0xb8] sm:$0xff] }
 0x6b3   :  { %v5979_v22 = vpop.eup %5978  ;;  %v3683_v18 = vmul.f32 %v5977_v62, %v3675_v41  ;;  %v7780_v51 = vadd.f32 %v5969_v28, %v3682_v53  ;;  %v6262_v28 = vld [vmem:[#allocation5 + $0xc0] sm:$0xff]  ;;  %v6268_v7 = vld [vmem:[#allocation5 + $0x90] sm:$0xff]  ;;  %v6271_v3 = vld [vmem:[#allocation5 + $0x78] sm:$0xff] }
 0x6b4   :  { %v5981_v34 = vpop.eup %5980  ;;  %v3684_v30 = vmul.f32 %v5979_v22, %v3676_v36  ;;  %v3719_v26 = vcombine.low %v7772_v58, %v7774_v31  ;;  %v3728_v35 = vrot.slane %v3718_v21, %v6623_v54  ;;  %v6270_v41 = vld [vmem:[#allocation5 + $0x80] sm:$0xff]  ;;  %v6273_v36 = vld [vmem:[#allocation5 + $0x68] sm:$0xff]  ;;  %v6275_v62 = vld [vmem:[#allocation5 + $0x70] sm:$0xff] }
 0x6b5   :  { %v3685_v24 = vmul.f32 %v5981_v34, %v3677_v55  ;;  %v7782_v37 = vadd.f32 %v5971_v40, %v3683_v18  ;;  %v6265_v40 = vld [vmem:[#allocation5 + $0xa8] sm:$0xff]  ;;  %v6274_v53 = vld [vmem:[#allocation5 + $0x60] sm:$0xff]  ;;  %v6276_v55 = vld [vmem:[#allocation5 + $0x50] sm:$0xff] }
 0x6b6   :  { %v7786_v25 = vadd.f32 %v5973_v14, %v3684_v30  ;;  %v3735_v61 = vrot.slane %v3719_v26, %v6623_v54  ;;  %v6269_v14 = vld [vmem:[#allocation5 + $0xa0] sm:$0xff]  ;;  %v6277_v22 = vld [vmem:[#allocation5 + $0x48] sm:$0xff]  ;;  %v6278_v18 = vld [vmem:[#allocation5 + $0x58] sm:$0xff] }
 0x6b7   :  { %v7788_v29 = vadd.f32 %v5975_v50, %v3685_v24  ;;  %v3720_v6 = vcombine.low %v7780_v51, %v7782_v37  ;;  %v6272_v50 = vld [vmem:[#allocation5 + $0x88] sm:$0xff]  ;;  %v6279_v34 = vld [vmem:[#allocation5 + $0x38] sm:$0xff]  ;;  %v6280_v30 = vld [vmem:[#allocation5 + $0x30] sm:$0xff] }
 0x6b8   :  { %v3750_v46 = vcombine.low %v3728_v35, %v3735_v61  ;;  %v6281_v26 = vld [vmem:[#allocation5 + $0x40] sm:$0xff]  ;;  %v6283_v21 = vld [vmem:[#allocation5 + $0x18] sm:$0xff]  ;;  %v6285_v61 = vld [vmem:[#allocation5 + $0x8] sm:$0xff] }
 0x6b9   :  { %v3721_v10 = vcombine.low %v7786_v25, %v7788_v29  ;;  %v3742_v27 = vrot.slane %v3720_v6, %v6623_v54  ;;  %v6282_v24 = vld [vmem:[#allocation5 + $0x20] sm:$0xff]  ;;  %v6284_v6 = vld [vmem:[#allocation5 + $0x28] sm:$0xff]  ;;  %v6287_v35 = vld [vmem:[#allocation5 + $0x10] sm:$0xff] }
 0x6ba   :  { %v3758_v39 = vrot.slane %v3750_v46, %v6623_v54 }
 0x6bb   :  { %v3749_v45 = vrot.slane %v3721_v10, %v6623_v54  ;;  %v6286_v10 = vld [vmem:[#allocation5] sm:$0xff] }
 0x6bd   :  { %v3751_v38 = vcombine.low %v3742_v27, %v3749_v45 }
 0x6bf   :  { %v3765_v5 = vrot.slane %v3751_v38, %v6623_v54 }
 0x6c1   :  { %v3766_v32 = vcombine.low %v3758_v39, %v3765_v5  ;;  %v7821_v5 = vld [vmem:[#allocation2 + $0x6] ss:$8 sm:$0x7] }
 0x6c3   :  { %3833 = vmatmul.mubr.f32.vlgmr.msra.gmra.mxu0 %v3766_v32  ;;  %5457 = vmatmul.mubr.f32.vlgmr.msra.gmra.mxu1 %v3766_v32 }
 0x6c4   :  { %4359 = vmatpush1.msra.mxu0 %v6241_v56  ;;  %5460 = vmatpush3.msra.mxu1 %v6242_v19 }
 0x6c5   :  { %4360 = vmatprep.subr.mxu0 %v6243_v1  ;;  %5461 = vmatprep.subr.mxu1 %v8116_v43  ;;  %v7825_v1 = vld [vmem:[#allocation2 + $0x1e] ss:$8 sm:$0x7] }
 0x6c6   :  { %4361 = vmatpush1.msra.mxu0 %v6244_v57  ;;  %5462 = vmatpush3.msra.mxu1 %v6245_v8  ;;  %v7827_v57 = vld [vmem:[#allocation2 + $0x36] ss:$8 sm:$0x7] }
 0x6c7   :  { %4362 = vmatprep.subr.mxu0 %v6246_v2  ;;  %5463 = vmatprep.subr.mxu1 %v8116_v43  ;;  %v7829_v8 = vld [vmem:[#allocation2 + $0x4e] ss:$8 sm:$0x7] }
 0x6c8   :  { %4363 = vmatpush1.msra.mxu0 %v6247_v47  ;;  %5464 = vmatpush3.msra.mxu1 %v6248_v42 }
 0x6c9   :  { %4364 = vmatprep.subr.mxu0 %v6249_v4  ;;  %5465 = vmatprep.subr.mxu1 %v8116_v43 }
 0x6ca   :  { %4365 = vmatpush1.msra.mxu0 %v6250_v9  ;;  %5466 = vmatpush3.msra.mxu1 %v6251_v0  ;;  %v7835_v0 = vld [vmem:[#allocation2 + $0x7e] ss:$8 sm:$0x7] }
 0x6cb   :  { %4366 = vmatprep.subr.mxu0 %v6252_v52  ;;  %5467 = vmatprep.subr.mxu1 %v8116_v43  ;;  %v7837_v52 = vld [vmem:[#allocation2 + $0x96] ss:$8 sm:$0x7] }
 0x6cc   :  { %4367 = vmatpush1.msra.mxu0 %v6253_v49  ;;  %5468 = vmatpush3.msra.mxu1 %v6254_v59 }
 0x6cd   :  { %4368 = vmatprep.subr.mxu0 %v6255_v11  ;;  %5469 = vmatprep.subr.mxu1 %v8116_v43 }
 0x6ce   :  { %4369 = vmatpush1.msra.mxu0 %v6256_v16  ;;  %5470 = vmatpush3.msra.mxu1 %v6257_v17 }
 0x6cf   :  { %4370 = vmatprep.subr.mxu0 %v6258_v23  ;;  %5471 = vmatprep.subr.mxu1 %v8116_v43  ;;  %v7842_v23 = vld [vmem:[#allocation2 + $0xae] ss:$8 sm:$0x7] }
 0x6d0   :  { %4371 = vmatpush1.msra.mxu0 %v6259_v20  ;;  %5472 = vmatpush3.msra.mxu1 %v6260_v13 }
 0x6d1   :  { %4372 = vmatprep.subr.mxu0 %v6261_v15  ;;  %5473 = vmatprep.subr.mxu1 %v8116_v43 }
 0x6d2   :  { %4373 = vmatpush1.msra.mxu0 %v6262_v28  ;;  %5474 = vmatpush3.msra.mxu1 %v6263_v33 }
 0x6d3   :  { %4374 = vmatprep.subr.mxu0 %v6264_v12  ;;  %5475 = vmatprep.subr.mxu1 %v8116_v43 }
 0x6d4   :  { %4375 = vmatpush1.msra.mxu0 %v6265_v40  ;;  %5476 = vmatpush3.msra.mxu1 %v6266_v44 }
 0x6d5   :  { %4376 = vmatprep.subr.mxu0 %v6267_v60  ;;  %5477 = vmatprep.subr.mxu1 %v8116_v43 }
 0x6d6   :  { %4377 = vmatpush1.msra.mxu0 %v6268_v7  ;;  %5478 = vmatpush3.msra.mxu1 %v6269_v14 }
 0x6d7   :  { %4378 = vmatprep.subr.mxu0 %v6270_v41  ;;  %5479 = vmatprep.subr.mxu1 %v8116_v43 }
 0x6d8   :  { %4379 = vmatpush1.msra.mxu0 %v6271_v3  ;;  %5480 = vmatpush3.msra.mxu1 %v6272_v50 }
 0x6d9   :  { %4380 = vmatprep.subr.mxu0 %v6273_v36  ;;  %5481 = vmatprep.subr.mxu1 %v8116_v43 }
 0x6da   :  { %4381 = vmatpush1.msra.mxu0 %v6274_v53  ;;  %5482 = vmatpush3.msra.mxu1 %v6275_v62  ;;  %v4031_v62 = vrot.slane %v7821_v5, 1 }
 0x6db   :  { %4382 = vmatprep.subr.mxu0 %v6276_v55  ;;  %5483 = vmatprep.subr.mxu1 %v8116_v43 }
 0x6dc   :  { %4383 = vmatpush1.msra.mxu0 %v6277_v22  ;;  %5484 = vmatpush3.msra.mxu1 %v6278_v18  ;;  %v4032_v18 = vrot.slane %v7825_v1, 1 }
 0x6dd   :  { %4384 = vmatprep.subr.mxu0 %v6279_v34  ;;  %5485 = vmatprep.subr.mxu1 %v8116_v43  ;;  %v4033_v34 = vrot.slane %v7827_v57, 1 }
 0x6de   :  { %4385 = vmatpush1.msra.mxu0 %v6280_v30  ;;  %5486 = vmatpush3.msra.mxu1 %v6281_v26 }
 0x6df   :  { %4386 = vmatprep.subr.mxu0 %v6282_v24  ;;  %5487 = vmatprep.subr.mxu1 %v8116_v43 }
 0x6e0   :  { %4387 = vmatpush1.msra.mxu0 %v6283_v21  ;;  %5488 = vmatpush3.msra.mxu1 %v6284_v6  ;;  %v4034_v21 = vrot.slane %v7829_v8, 1 }
 0x6e1   :  { %4388 = vmatprep.subr.mxu0 %v6285_v61  ;;  %5489 = vmatprep.subr.mxu1 %v8116_v43 }
 0x6e2   :  { %4389 = vmatpush1.msra.mxu0 %v6286_v10  ;;  %4422 = vmatprep.mubr.f32.mxu0 %v8116_v43 }
 0x6e3   :  { %5490 = vmatpush3.msra.mxu1 %v6287_v35  ;;  %5491 = vmatprep.mubr.msk.f32.mxu1 %vm6360_vm0, %v8116_v43  ;;  %v7831_v43 = vld [vmem:[#allocation2 + $0x66] ss:$8 sm:$0x7] }
 0x6e4   :  { %v4035_v30 = vrot.slane %v7831_v43, 1 }
 0x783   :  { %v3834_v27 = vpop.f32.mrf.mxu0  ;;  %v7818_v45 = vpop.f32.mrf.mxu1 }
 0x784   :  { %v3910_v46 = vcombine.high %v3834_v27, %v3834_v27  ;;  %v3917_v38 = vrot.slane %v3834_v27, %v6623_v54 }
 0x785   :  { %v5458_v39 = vpop.f32.mrf.mxu1  ;;  %v3836_v9 = vpop.f32.mrf.mxu0 }
 0x786   :  { %v3924_v32 = vrot.slane %v3910_v46, %v6623_v54  ;;  %v3925_v56 = vcombine.high %v3917_v38, %v3917_v38  ;;  %v3933_v19 = vrot.slane %v3917_v38, %v6623_v54  ;;  %v4048_v28 = vcombine.high %v3836_v9, %v3836_v9 }
 0x787   :  { %v4055_v50 = vrot.slane %v3836_v9, %v6623_v54  ;;  %v4036_v9 = vrot.slane %v7835_v0, 1 }
 0x788   :  { %v3926_v2 = vcombine.high %v3924_v32, %v3924_v32  ;;  %v3940_v47 = vrot.slane %v3924_v32, %v6623_v54  ;;  %v3947_v42 = vrot.slane %v3925_v56, %v6623_v54  ;;  %v3955_v4 = vcombine.high %v3933_v19, %v3933_v19 }
 0x789   :  { %v3967_v49 = vadd.f32 %v3933_v19, %v7821_v5  ;;  %v4062_v55 = vrot.slane %v4048_v28, %v6623_v54  ;;  %v4063_v26 = vcombine.high %v4055_v50, %v4055_v50  ;;  %v4071_v24 = vrot.slane %v4055_v50, %v6623_v54 }
 0x78a   :  { %v3954_v59 = vrot.slane %v3926_v2, %v6623_v54  ;;  %v3956_v11 = vcombine.high %v3940_v47, %v3940_v47  ;;  %v3957_v16 = vcombine.high %v3947_v42, %v3947_v42  ;;  %v3968_v17 = vadd.f32 %v3947_v42, %v7825_v1 }
 0x78b   :  { %v3969_v20 = vadd.f32 %v3955_v4, %v7827_v57  ;;  %v3971_v13 = vadd.f32 %v3940_v47, %v7831_v43  ;;  %v5046_v15 = vmul.f32 -1.442695, %v3967_v49  ;;  %v4078_v6 = vrot.slane %v4062_v55, %v6623_v54 }
 0x78c   :  { %v3958_v33 = vcombine.high %v3954_v59, %v3954_v59  ;;  %v3970_v12 = vadd.f32 %v3957_v16, %v7829_v8  ;;  %v3972_v40 = vadd.f32 %v3954_v59, %v7835_v0  ;;  %v3973_v44 = vadd.f32 %v3956_v11, %v7837_v52 }
 0x78d   :  { %5982 = vpow2.f32 %v5046_v15  ;;  %v5047_v60 = vmul.f32 -1.442695, %v3968_v17  ;;  %v5048_v7 = vmul.f32 -1.442695, %v3969_v20  ;;  %v5050_v3 = vmul.f32 -1.442695, %v3971_v13 }
 0x78e   :  { %v3974_v14 = vadd.f32 %v3958_v33, %v7842_v23  ;;  %v5049_v41 = vmul.f32 -1.442695, %v3970_v12  ;;  %v5051_v36 = vmul.f32 -1.442695, %v3972_v40  ;;  %v5052_v53 = vmul.f32 -1.442695, %v3973_v44 }
 0x78f   :  { %5984 = vpow2.f32 %v5047_v60  ;;  %v4064_v61 = vcombine.high %v4062_v55, %v4062_v55  ;;  %v4085_v10 = vrot.slane %v4063_v26, %v6623_v54  ;;  %v4093_v35 = vcombine.high %v4071_v24, %v4071_v24  ;;  %v7866_v13 = vld [vmem:[%s8004_s2] ss:$0 sm:$0xff]  ;;  %s6362_s2 = smov [#allocation7]  }
 0x790   :  { %5986 = vpow2.f32 %v5048_v7  ;;  %v5053_v22 = vmul.f32 -1.442695, %v3974_v14  ;;  %v4105_v27 = vadd.f32 %v4071_v24, %v4031_v62  ;;  %v4109_v32 = vadd.f32 %v4078_v6, %v4035_v30  ;;  %s4939_s30 = sshll.u32 %s6362_s2, 4  ;;  %s4940_s30 = int_to_ptr.vmem [resolvable:$true] %s4939_s30 }
 0x791   :  { %5988 = vpow2.f32 %v5049_v41  ;;  %v4095_v46 = vcombine.high %v4085_v10, %v4085_v10  ;;  %v4106_v38 = vadd.f32 %v4085_v10, %v4032_v18  ;;  %v4107_v39 = vadd.f32 %v4093_v35, %v4033_v34  ;;  %s6329_s4 = scalar_lea.vmem %s4940_s30, 128  ;;  %p6334_p11 = scmp.lt.s32.totalorder %s4940_s30, %s4940_s30 }
 0x792   :  { %5990 = vpow2.f32 %v5050_v3  ;;  %v5054_v56 = vmul.f32 -1.442695, %v4105_v27  ;;  %v4092_v19 = vrot.slane %v4064_v61, %v6623_v54  ;;  %v5058_v59 = vmul.f32 -1.442695, %v4109_v32  ;;  %p6330_p10 = scmp.ne.s32.totalorder %s4940_s30, %s6329_s4  ;;  %p6335_p12 = scmp.lt.s32.totalorder %s6329_s4, %s6329_s4 }
 0x793   :  { %5992 = vpow2.f32 %v5051_v36  ;;  %v4108_v2 = vadd.f32 %v4095_v46, %v4034_v21  ;;  %v5055_v47 = vmul.f32 -1.442695, %v4106_v38  ;;  %v5056_v42 = vmul.f32 -1.442695, %v4107_v39 }
 0x794   :  { %5994 = vpow2.f32 %v5052_v53  ;;  %v4037_v16 = vrot.slane %v7837_v52, 1  ;;  %v4094_v17 = vcombine.high %v4078_v6, %v4078_v6  ;;  %v4161_v15 = vadd.f32 %v7866_v13, %v7818_v45  ;;  %p6336_p13 = por %p6335_p12, %p6334_p11 }
 0x795   :  { %5996 = vpow2.f32 %v5053_v22  ;;  %v5057_v49 = vmul.f32 -1.442695, %v4108_v2  ;;  %v4038_v28 = vrot.slane %v7842_v23, 1  ;;  %v4096_v33 = vcombine.high %v4092_v19, %v4092_v19 }
 0x796   :  { %5998 = vpow2.f32 %v5054_v56  ;;  %v4110_v7 = vadd.f32 %v4092_v19, %v4036_v9  ;;  %v4111_v3 = vadd.f32 %v4094_v17, %v4037_v16  ;;  %v4163_v53 = vcombine.high %v4161_v15, %v4161_v15  ;;  %p6337_p0 = pnand %p6336_p13, %p6330_p10 }
 0x797   :  { %6000 = vpow2.f32 %v5055_v47  ;;  %v4112_v45 = vadd.f32 %v4096_v33, %v4038_v28  ;;  %v4170_v22 = vrot.slane %v4161_v15, %v6623_v54  ;;  %v4228_v19 = vrot.slane %v7821_v5, 2 }
 0x798   :  { %6002 = vpow2.f32 %v5056_v42  ;;  %v5059_v30 = vmul.f32 -1.442695, %v4110_v7  ;;  %v5060_v24 = vmul.f32 -1.442695, %v4111_v3  ;;  %v4177_v21 = vrot.slane %v4163_v53, %v6623_v54 }
 0x799   :  { %6004 = vpow2.f32 %v5057_v49  ;;  %v5061_v6 = vmul.f32 -1.442695, %v4112_v45  ;;  %v4178_v61 = vcombine.high %v4170_v22, %v4170_v22  ;;  %v4186_v39 = vrot.slane %v4170_v22, %v6623_v54 }
 0x79a   :  { %v5983_v4 = vpop.eup %5982  ;;  %v4179_v38 = vcombine.high %v4177_v21, %v4177_v21  ;;  %v4230_v9 = vrot.slane %v7827_v57, 2  ;;  %v4231_v49 = vrot.slane %v7829_v8, 2  ;;  %v4232_v16 = vrot.slane %v7831_v43, 2 }
 0x79b   :  { %v3999_v11 = vadd.f32 1.0, %v5983_v4  ;;  %v4200_v2 = vrot.slane %v4178_v61, %v6623_v54  ;;  %v4229_v4 = vrot.slane %v7825_v1, 2  ;;  %v4193_v17 = vrot.slane %v4177_v21, %v6623_v54 }
 0x79c   :  { %v5985_v20 = vpop.eup %5984  ;;  %v4207_v5 = vrot.slane %v4179_v38, %v6623_v54  ;;  %v4208_v28 = vcombine.high %v4186_v39, %v4186_v39  ;;  %v4234_v43 = vrot.slane %v7837_v52, 2 }
 0x79d   :  { %v5987_v12 = vpop.eup %5986  ;;  %v4000_v40 = vadd.f32 1.0, %v5985_v20  ;;  %6006 = vrcp.f32 %v3999_v11  ;;  %v4210_v1 = vcombine.high %v4200_v2, %v4200_v2 }
 0x79e   :  { %v5989_v44 = vpop.eup %5988  ;;  %v4001_v60 = vadd.f32 1.0, %v5987_v12  ;;  %6008 = vpow2.f32 %v5058_v59 }
 0x79f   :  { %v5991_v14 = vpop.eup %5990  ;;  %v4002_v41 = vadd.f32 1.0, %v5989_v44  ;;  %6010 = vrcp.f32 %v4000_v40  ;;  %v4233_v44 = vrot.slane %v7835_v0, 2 }
 0x7a0   :  { %v5993_v50 = vpop.eup %5992  ;;  %v4003_v36 = vadd.f32 1.0, %v5991_v14  ;;  %6012 = vrcp.f32 %v4001_v60  ;;  %v4235_v14 = vrot.slane %v7842_v23, 2 }
 0x7a1   :  { %v5995_v62 = vpop.eup %5994  ;;  %v4004_v55 = vadd.f32 1.0, %v5993_v50  ;;  %6014 = vrcp.f32 %v4002_v41 }
 0x7a2   :  { %v5997_v18 = vpop.eup %5996  ;;  %v4005_v34 = vadd.f32 1.0, %v5995_v62  ;;  %6016 = vrcp.f32 %v4003_v36  ;;  %v4209_v36 = vcombine.high %v4193_v17, %v4193_v17 }
 0x7a3   :  { %v4006_v26 = vadd.f32 1.0, %v5997_v18  ;;  %6018 = vrcp.f32 %v4004_v55  ;;  %v5999_v10 = vpop.eup %5998  ;;  %v4211_v55 = vcombine.high %v4207_v5, %v4207_v5 }
 0x7a4   :  { %6020 = vrcp.f32 %v4005_v34  ;;  %v6001_v35 = vpop.eup %6000  ;;  %v4137_v27 = vadd.f32 1.0, %v5999_v10 }
 0x7a5   :  { %6022 = vrcp.f32 %v4006_v26  ;;  %v6003_v46 = vpop.eup %6002  ;;  %v4138_v32 = vadd.f32 1.0, %v6001_v35 }
 0x7a6   :  { %6024 = vpow2.f32 %v5059_v30  ;;  %v6005_v56 = vpop.eup %6004  ;;  %v4139_v47 = vadd.f32 1.0, %v6003_v46 }
 0x7a7   :  { %6026 = vpow2.f32 %v5060_v24  ;;  %v4140_v59 = vadd.f32 1.0, %v6005_v56 }
 0x7a8   :  { %6028 = vpow2.f32 %v5061_v6 }
 0x7a9   :  { %6030 = vrcp.f32 %v4137_v27 }
 0x7aa   :  { %v6007_v42 = vpop.eup %6006  ;;  %6032 = vrcp.f32 %v4138_v32 }
 0x7ab   :  { %v6009_v11 = vpop.eup %6008  ;;  %v4220_v20 = vmul.f32 %v6007_v42, %v4186_v39  ;;  %6034 = vrcp.f32 %v4139_v47 }
 0x7ac   :  { %v6011_v15 = vpop.eup %6010  ;;  %v4141_v33 = vadd.f32 1.0, %v6009_v11  ;;  %6036 = vrcp.f32 %v4140_v59 }
 0x7ad   :  { %v6013_v12 = vpop.eup %6012  ;;  %v4221_v40 = vmul.f32 %v6011_v15, %v4200_v2  ;;  %v4244_v57 = vadd.f32 %v4228_v19, %v4220_v20 }
 0x7ae   :  { %v6015_v8 = vpop.eup %6014  ;;  %v4222_v60 = vmul.f32 %v6013_v12, %v4208_v28 }
 0x7af   :  { %v6017_v7 = vpop.eup %6016  ;;  %v4223_v41 = vmul.f32 %v6015_v8, %v4210_v1  ;;  %v4245_v3 = vadd.f32 %v4229_v4, %v4221_v40  ;;  %6038 = vtanh.f32 %v4244_v57 }
 0x7b0   :  { %v6019_v50 = vpop.eup %6018  ;;  %v4224_v53 = vmul.f32 %v6017_v7, %v4193_v17  ;;  %v4246_v45 = vadd.f32 %v4230_v9, %v4222_v60  ;;  %6040 = vrcp.f32 %v4141_v33 }
 0x7b1   :  { %v6021_v62 = vpop.eup %6020  ;;  %v4225_v22 = vmul.f32 %v6019_v50, %v4207_v5  ;;  %v4247_v18 = vadd.f32 %v4231_v49, %v4223_v41  ;;  %6042 = vtanh.f32 %v4245_v3 }
 0x7b2   :  { %v6023_v0 = vpop.eup %6022  ;;  %v4226_v52 = vmul.f32 %v6021_v62, %v4209_v36  ;;  %v4248_v34 = vadd.f32 %v4232_v16, %v4224_v53  ;;  %6044 = vtanh.f32 %v4246_v45 }
 0x7b3   :  { %v6025_v30 = vpop.eup %6024  ;;  %v4227_v26 = vmul.f32 %v6023_v0, %v4211_v55  ;;  %v4249_v23 = vadd.f32 %v4233_v44, %v4225_v22  ;;  %6046 = vtanh.f32 %v4247_v18 }
 0x7b4   :  { %v6027_v24 = vpop.eup %6026  ;;  %v4250_v21 = vadd.f32 %v4234_v43, %v4226_v52  ;;  %6048 = vtanh.f32 %v4248_v34  ;;  %v4142_v6 = vadd.f32 1.0, %v6025_v30 }
 0x7b5   :  { %v6029_v61 = vpop.eup %6028  ;;  %v4251_v10 = vadd.f32 %v4235_v14, %v4227_v26  ;;  %6050 = vtanh.f32 %v4249_v23  ;;  %v4143_v35 = vadd.f32 1.0, %v6027_v24 }
 0x7b6   :  { %6052 = vtanh.f32 %v4250_v21  ;;  %v4144_v27 = vadd.f32 1.0, %v6029_v61  ;;  %v6031_v46 = vpop.eup %6030  ;;  %v7926_v61 = vld [vmem:[#allocation2 + $0x7] ss:$8 sm:$0x7] }
 0x7b7   :  { %6054 = vtanh.f32 %v4251_v10  ;;  %v6033_v38 = vpop.eup %6032 }
 0x7b8   :  { %6056 = vrcp.f32 %v4142_v6  ;;  %v6035_v39 = vpop.eup %6034 }
 0x7b9   :  { %6058 = vrcp.f32 %v4143_v35  ;;  %v6037_v32 = vpop.eup %6036 }
 0x7ba   :  { %6060 = vrcp.f32 %v4144_v27 }
 0x7bc   :  { %v6039_v56 = vpop.eup %6038 }
 0x7bd   :  { %v6041_v19 = vpop.eup %6040  ;;  %v4260_v47 = vsub.f32 %v7776_v48, %v6039_v56 }
 0x7be   :  { %v6043_v2 = vpop.eup %6042 }
 0x7bf   :  { %v6045_v42 = vpop.eup %6044  ;;  %v4261_v4 = vsub.f32 %v7769_v63, %v6043_v2  ;;  %v4268_v15 = vmul.f32 %v6031_v46, %v4260_v47  ;;  %v7930_v46 = vld [vmem:[#allocation2 + $0x1f] ss:$8 sm:$0x7] }
 0x7c0   :  { %v6047_v9 = vpop.eup %6046  ;;  %v4262_v49 = vsub.f32 %v7772_v58, %v6045_v42 }
 0x7c1   :  { %v6049_v59 = vpop.eup %6048  ;;  %v4263_v11 = vsub.f32 %v7774_v31, %v6047_v9  ;;  %v4269_v16 = vmul.f32 %v6033_v38, %v4261_v4  ;;  %v7899_v43 = vadd.f32 %v6039_v56, %v4268_v15  ;;  %v7932_v38 = vld [vmem:[#allocation2 + $0x37] ss:$8 sm:$0x7] }
 0x7c2   :  { %v6051_v17 = vpop.eup %6050  ;;  %v4264_v20 = vsub.f32 %v7780_v51, %v6049_v59  ;;  %v4270_v5 = vmul.f32 %v6035_v39, %v4262_v49  ;;  %v7934_v39 = vld [vmem:[#allocation2 + $0x4f] ss:$8 sm:$0x7] }
 0x7c3   :  { %v6053_v28 = vpop.eup %6052  ;;  %v4265_v33 = vsub.f32 %v7782_v37, %v6051_v17  ;;  %v4271_v12 = vmul.f32 %v6037_v32, %v4263_v11  ;;  %v7892_v40 = vadd.f32 %v6043_v2, %v4269_v16  ;;  %v7936_v32 = vld [vmem:[#allocation2 + $0x67] ss:$8 sm:$0x7] }
 0x7c4   :  { %v6055_v48 = vpop.eup %6054  ;;  %v4266_v1 = vsub.f32 %v7786_v25, %v6053_v28  ;;  %v4272_v63 = vmul.f32 %v6041_v19, %v4264_v20  ;;  %v7895_v31 = vadd.f32 %v6045_v42, %v4270_v5  ;;  %v7940_v4 = vld [vmem:[#allocation2 + $0x7f] ss:$8 sm:$0x7] }
 0x7c5   :  { %v6057_v58 = vpop.eup %6056  ;;  %v4267_v57 = vsub.f32 %v7788_v29, %v6055_v48  ;;  %v7897_v8 = vadd.f32 %v6047_v9, %v4271_v12  ;;  %v4308_v29 = vcombine.low %v7899_v43, %v7892_v40  ;;  %v7942_v9 = vld [vmem:[#allocation2 + $0x97] ss:$8 sm:$0x7] }
 0x7c6   :  { %v6059_v51 = vpop.eup %6058  ;;  %v4273_v44 = vmul.f32 %v6057_v58, %v4265_v33  ;;  %v7903_v14 = vadd.f32 %v6049_v59, %v4272_v63  ;;  %v7947_v20 = vld [vmem:[#allocation2 + $0xaf] ss:$8 sm:$0x7] }
 0x7c7   :  { %v6061_v60 = vpop.eup %6060  ;;  %v4274_v37 = vmul.f32 %v6059_v51, %v4266_v1  ;;  %v4309_v7 = vcombine.low %v7895_v31, %v7897_v8  ;;  %v4318_v62 = vrot.slane %v4308_v29, %v6623_v54  ;;  %v4621_v29 = vrot.slane %v7926_v61, 1 }
 0x7c8   :  { %v4275_v25 = vmul.f32 %v6061_v60, %v4267_v57  ;;  %v7905_v41 = vadd.f32 %v6051_v17, %v4273_v44 }
 0x7c9   :  { %v7909_v3 = vadd.f32 %v6053_v28, %v4274_v37  ;;  %v4325_v53 = vrot.slane %v4309_v7, %v6623_v54 }
 0x7ca   :  { %v7911_v50 = vadd.f32 %v6055_v48, %v4275_v25  ;;  %v4310_v36 = vcombine.low %v7903_v14, %v7905_v41 }
 0x7cb   :  { %v4340_v18 = vcombine.low %v4318_v62, %v4325_v53  ;;  %v4623_v62 = vrot.slane %v7932_v38, 1 }
 0x7cc   :  { %v4311_v45 = vcombine.low %v7909_v3, %v7911_v50  ;;  %v4332_v55 = vrot.slane %v4310_v36, %v6623_v54 }
 0x7cd   :  { %v4348_v52 = vrot.slane %v4340_v18, %v6623_v54 }
 0x7ce   :  { %v4339_v22 = vrot.slane %v4311_v45, %v6623_v54  ;;  %v4622_v45 = vrot.slane %v7930_v46, 1 }
 0x7d0   :  { %v4341_v0 = vcombine.low %v4332_v55, %v4339_v22  ;;  %v4625_v55 = vrot.slane %v7936_v32, 1 }
 0x7d2   :  { %v4355_v34 = vrot.slane %v4341_v0, %v6623_v54  ;;  %v4624_v0 = vrot.slane %v7934_v39, 1 }
 0x7d4   :  { %v4356_v30 = vcombine.low %v4348_v52, %v4355_v34 }
 0x7d6   :  { %4423 = vmatmul.mubr.f32.vlgmr.msra.gmra.mxu0 %v4356_v30  ;;  %5492 = vmatmul.mubr.f32.vlgmr.msra.gmra.mxu1 %v4356_v30 }
 0x896   :  { %v4424_v26 = vpop.f32.mrf.mxu0  ;;  %v7923_v23 = vpop.f32.mrf.mxu1 }
 0x897   :  { %v4500_v24 = vcombine.high %v4424_v26, %v4424_v26  ;;  %v4507_v21 = vrot.slane %v4424_v26, %v6623_v54 }
 0x898   :  { %v5493_v6 = vpop.f32.mrf.mxu1  ;;  %v4426_v42 = vpop.f32.mrf.mxu0 }
 0x899   :  { %v4514_v10 = vrot.slane %v4500_v24, %v6623_v54  ;;  %v4515_v35 = vcombine.high %v4507_v21, %v4507_v21  ;;  %v4523_v27 = vrot.slane %v4507_v21, %v6623_v54  ;;  %v4638_v33 = vcombine.high %v4426_v42, %v4426_v42 }
 0x89a   :  { %v4645_v37 = vrot.slane %v4426_v42, %v6623_v54 }
 0x89b   :  { %v4516_v56 = vcombine.high %v4514_v10, %v4514_v10  ;;  %v4530_v19 = vrot.slane %v4514_v10, %v6623_v54  ;;  %v4537_v2 = vrot.slane %v4515_v35, %v6623_v54  ;;  %v4545_v47 = vcombine.high %v4523_v27, %v4523_v27 }
 0x89c   :  { %v4557_v49 = vadd.f32 %v4523_v27, %v7926_v61  ;;  %v4652_v36 = vrot.slane %v4638_v33, %v6623_v54  ;;  %v4653_v22 = vcombine.high %v4645_v37, %v4645_v37  ;;  %v4661_v18 = vrot.slane %v4645_v37, %v6623_v54 }
 0x89d   :  { %v4544_v59 = vrot.slane %v4516_v56, %v6623_v54  ;;  %v4546_v11 = vcombine.high %v4530_v19, %v4530_v19  ;;  %v4547_v16 = vcombine.high %v4537_v2, %v4537_v2  ;;  %v4558_v17 = vadd.f32 %v4537_v2, %v7930_v46 }
 0x89e   :  { %v4559_v15 = vadd.f32 %v4545_v47, %v7932_v38  ;;  %v4561_v5 = vadd.f32 %v4530_v19, %v7936_v32  ;;  %v5062_v28 = vmul.f32 -1.442695, %v4557_v49  ;;  %v4668_v52 = vrot.slane %v4652_v36, %v6623_v54 }
 0x89f   :  { %v4548_v12 = vcombine.high %v4544_v59, %v4544_v59  ;;  %v4560_v48 = vadd.f32 %v4547_v16, %v7934_v39  ;;  %v4562_v1 = vadd.f32 %v4544_v59, %v7940_v4  ;;  %v4563_v63 = vadd.f32 %v4546_v11, %v7942_v9 }
 0x8a0   :  { %6062 = vpow2.f32 %v5062_v28  ;;  %v5063_v58 = vmul.f32 -1.442695, %v4558_v17  ;;  %v5064_v57 = vmul.f32 -1.442695, %v4559_v15  ;;  %v5066_v60 = vmul.f32 -1.442695, %v4561_v5 }
 0x8a1   :  { %v4564_v51 = vadd.f32 %v4548_v12, %v7947_v20  ;;  %v5065_v44 = vmul.f32 -1.442695, %v4560_v48  ;;  %v5067_v7 = vmul.f32 -1.442695, %v4562_v1  ;;  %v5068_v25 = vmul.f32 -1.442695, %v4563_v63 }
 0x8a2   :  { %6064 = vpow2.f32 %v5063_v58  ;;  %v4654_v34 = vcombine.high %v4652_v36, %v4652_v36  ;;  %v4675_v30 = vrot.slane %v4653_v22, %v6623_v54  ;;  %v4683_v26 = vcombine.high %v4661_v18, %v4661_v18 }
 0x8a3   :  { %6066 = vpow2.f32 %v5064_v57  ;;  %v5069_v53 = vmul.f32 -1.442695, %v4564_v51  ;;  %v4695_v24 = vadd.f32 %v4661_v18, %v4621_v29  ;;  %v4699_v35 = vadd.f32 %v4668_v52, %v4625_v55 }
 0x8a4   :  { %6068 = vpow2.f32 %v5065_v44  ;;  %v4685_v21 = vcombine.high %v4675_v30, %v4675_v30  ;;  %v4696_v6 = vadd.f32 %v4675_v30, %v4622_v45  ;;  %v4697_v10 = vadd.f32 %v4683_v26, %v4623_v62 }
 0x8a5   :  { %6070 = vpow2.f32 %v5066_v60  ;;  %v5070_v27 = vmul.f32 -1.442695, %v4695_v24  ;;  %v4682_v56 = vrot.slane %v4654_v34, %v6623_v54  ;;  %v4626_v49 = vrot.slane %v7940_v4, 1 }
 0x8a6   :  { %6072 = vpow2.f32 %v5067_v7  ;;  %v4698_v19 = vadd.f32 %v4685_v21, %v4624_v0  ;;  %v5071_v2 = vmul.f32 -1.442695, %v4696_v6  ;;  %v5072_v47 = vmul.f32 -1.442695, %v4697_v10 }
 0x8a7   :  { %6074 = vpow2.f32 %v5068_v25  ;;  %v5074_v11 = vmul.f32 -1.442695, %v4699_v35  ;;  %v4627_v17 = vrot.slane %v7942_v9, 1  ;;  %v4684_v15 = vcombine.high %v4668_v52, %v4668_v52 }
 0x8a8   :  { %6076 = vpow2.f32 %v5069_v53  ;;  %v5073_v59 = vmul.f32 -1.442695, %v4698_v19  ;;  %v4751_v28 = vadd.f32 %v7866_v13, %v7923_v23  ;;  %v4628_v33 = vrot.slane %v7947_v20, 1 }
 0x8a9   :  { %6078 = vpow2.f32 %v5070_v27  ;;  %v4686_v12 = vcombine.high %v4682_v56, %v4682_v56  ;;  %v4700_v57 = vadd.f32 %v4682_v56, %v4626_v49  ;;  %v4701_v60 = vadd.f32 %v4684_v15, %v4627_v17 }
 0x8aa   :  { %6080 = vpow2.f32 %v5071_v2  ;;  %v4753_v25 = vcombine.high %v4751_v28, %v4751_v28  ;;  %v4760_v36 = vrot.slane %v4751_v28, %v6623_v54  ;;  %v4818_v27 = vrot.slane %v7926_v61, 2 }
 0x8ab   :  { %6082 = vpow2.f32 %v5072_v47  ;;  %v4702_v13 = vadd.f32 %v4686_v12, %v4628_v33  ;;  %v5075_v62 = vmul.f32 -1.442695, %v4700_v57  ;;  %v5076_v22 = vmul.f32 -1.442695, %v4701_v60 }
 0x8ac   :  { %6084 = vpow2.f32 %v5073_v59  ;;  %v4767_v18 = vrot.slane %v4753_v25, %v6623_v54  ;;  %v4768_v52 = vcombine.high %v4760_v36, %v4760_v36  ;;  %v4776_v6 = vrot.slane %v4760_v36, %v6623_v54 }
 0x8ad   :  { %v6063_v42 = vpop.eup %6062  ;;  %v5077_v0 = vmul.f32 -1.442695, %v4702_v13  ;;  %v4819_v47 = vrot.slane %v7930_v46, 2  ;;  %v4821_v49 = vrot.slane %v7934_v39, 2  ;;  %v4825_v57 = vrot.slane %v7947_v20, 2 }
 0x8ae   :  { %v4589_v16 = vadd.f32 1.0, %v6063_v42  ;;  %v4769_v21 = vcombine.high %v4767_v18, %v4767_v18  ;;  %v4790_v56 = vrot.slane %v4768_v52, %v6623_v54  ;;  %v4820_v42 = vrot.slane %v7932_v38, 2 }
 0x8af   :  { %v6065_v5 = vpop.eup %6064  ;;  %v4783_v17 = vrot.slane %v4767_v18, %v6623_v54  ;;  %v4798_v28 = vcombine.high %v4776_v6, %v4776_v6 }
 0x8b0   :  { %v6067_v48 = vpop.eup %6066  ;;  %v4590_v1 = vadd.f32 1.0, %v6065_v5  ;;  %6086 = vrcp.f32 %v4589_v16  ;;  %v4822_v16 = vrot.slane %v7936_v32, 2  ;;  %v4797_v61 = vrot.slane %v4769_v21, %v6623_v54 }
 0x8b1   :  { %v6069_v63 = vpop.eup %6068  ;;  %v4591_v58 = vadd.f32 1.0, %v6067_v48  ;;  %6088 = vpow2.f32 %v5074_v11  ;;  %v4800_v46 = vcombine.high %v4790_v56, %v4790_v56  ;;  %v4824_v32 = vrot.slane %v7942_v9, 2 }
 0x8b2   :  { %v6071_v51 = vpop.eup %6070  ;;  %v4592_v44 = vadd.f32 1.0, %v6069_v63  ;;  %6090 = vrcp.f32 %v4590_v1  ;;  %v4823_v1 = vrot.slane %v7940_v4, 2 }
 0x8b3   :  { %v6073_v37 = vpop.eup %6072  ;;  %v4593_v7 = vadd.f32 1.0, %v6071_v51  ;;  %6092 = vrcp.f32 %v4591_v58 }
 0x8b4   :  { %v6075_v23 = vpop.eup %6074  ;;  %v4594_v29 = vadd.f32 1.0, %v6073_v37  ;;  %6094 = vrcp.f32 %v4592_v44  ;;  %v4799_v37 = vcombine.high %v4783_v17, %v4783_v17 }
 0x8b5   :  { %v6077_v53 = vpop.eup %6076  ;;  %v4595_v45 = vadd.f32 1.0, %v6075_v23  ;;  %6096 = vrcp.f32 %v4593_v7  ;;  %v4801_v23 = vcombine.high %v4797_v61, %v4797_v61 }
 0x8b6   :  { %v4596_v55 = vadd.f32 1.0, %v6077_v53  ;;  %6098 = vrcp.f32 %v4594_v29  ;;  %v6079_v34 = vpop.eup %6078 }
 0x8b7   :  { %6100 = vrcp.f32 %v4595_v45  ;;  %v6081_v30 = vpop.eup %6080  ;;  %v4727_v26 = vadd.f32 1.0, %v6079_v34 }
 0x8b8   :  { %6102 = vrcp.f32 %v4596_v55  ;;  %v6083_v24 = vpop.eup %6082  ;;  %v4728_v10 = vadd.f32 1.0, %v6081_v30 }
 0x8b9   :  { %6104 = vpow2.f32 %v5075_v62  ;;  %v6085_v35 = vpop.eup %6084  ;;  %v4729_v19 = vadd.f32 1.0, %v6083_v24 }
 0x8ba   :  { %6106 = vpow2.f32 %v5076_v22  ;;  %v4730_v59 = vadd.f32 1.0, %v6085_v35 }
 0x8bb   :  { %6108 = vpow2.f32 %v5077_v0 }
 0x8bc   :  { %6110 = vrcp.f32 %v4727_v26 }
 0x8bd   :  { %v6087_v2 = vpop.eup %6086  ;;  %6112 = vrcp.f32 %v4728_v10 }
 0x8be   :  { %v6089_v11 = vpop.eup %6088  ;;  %v4810_v15 = vmul.f32 %v6087_v2, %v4776_v6  ;;  %6114 = vrcp.f32 %v4729_v19 }
 0x8bf   :  { %v6091_v5 = vpop.eup %6090  ;;  %v4731_v33 = vadd.f32 1.0, %v6089_v11  ;;  %6116 = vrcp.f32 %v4730_v59 }
 0x8c0   :  { %v6093_v12 = vpop.eup %6092  ;;  %v4811_v48 = vmul.f32 %v6091_v5, %v4790_v56  ;;  %v4834_v38 = vadd.f32 %v4818_v27, %v4810_v15 }
 0x8c1   :  { %v6095_v39 = vpop.eup %6094  ;;  %v4812_v63 = vmul.f32 %v6093_v12, %v4798_v28 }
 0x8c2   :  { %v6097_v58 = vpop.eup %6096  ;;  %v4813_v51 = vmul.f32 %v6095_v39, %v4800_v46  ;;  %v4835_v44 = vadd.f32 %v4819_v47, %v4811_v48  ;;  %6118 = vtanh.f32 %v4834_v38 }
 0x8c3   :  { %v6099_v60 = vpop.eup %6098  ;;  %v4814_v7 = vmul.f32 %v6097_v58, %v4783_v17  ;;  %v4836_v25 = vadd.f32 %v4820_v42, %v4812_v63  ;;  %6120 = vrcp.f32 %v4731_v33 }
 0x8c4   :  { %v6101_v13 = vpop.eup %6100  ;;  %v4815_v29 = vmul.f32 %v6099_v60, %v4797_v61  ;;  %v4837_v36 = vadd.f32 %v4821_v49, %v4813_v51  ;;  %6122 = vtanh.f32 %v4835_v44 }
 0x8c5   :  { %v6103_v4 = vpop.eup %6102  ;;  %v4816_v9 = vmul.f32 %v6101_v13, %v4799_v37  ;;  %v4838_v53 = vadd.f32 %v4822_v16, %v4814_v7  ;;  %6124 = vtanh.f32 %v4836_v25 }
 0x8c6   :  { %v6105_v45 = vpop.eup %6104  ;;  %v4817_v62 = vmul.f32 %v6103_v4, %v4801_v23  ;;  %v4839_v20 = vadd.f32 %v4823_v1, %v4815_v29  ;;  %6126 = vtanh.f32 %v4837_v36 }
 0x8c7   :  { %v6107_v55 = vpop.eup %6106  ;;  %v4840_v22 = vadd.f32 %v4824_v32, %v4816_v9  ;;  %6128 = vtanh.f32 %v4838_v53  ;;  %v4732_v18 = vadd.f32 1.0, %v6105_v45 }
 0x8c8   :  { %v6109_v0 = vpop.eup %6108  ;;  %v4841_v52 = vadd.f32 %v4825_v57, %v4817_v62  ;;  %6130 = vtanh.f32 %v4839_v20  ;;  %v4733_v34 = vadd.f32 1.0, %v6107_v55 }
 0x8c9   :  { %6132 = vtanh.f32 %v4840_v22  ;;  %v4734_v30 = vadd.f32 1.0, %v6109_v0  ;;  %v6111_v26 = vpop.eup %6110 }
 0x8ca   :  { %6134 = vtanh.f32 %v4841_v52  ;;  %v6113_v24 = vpop.eup %6112 }
 0x8cb   :  { %6136 = vrcp.f32 %v4732_v18  ;;  %v6115_v21 = vpop.eup %6114 }
 0x8cc   :  { %6138 = vrcp.f32 %v4733_v34  ;;  %v6117_v6 = vpop.eup %6116 }
 0x8cd   :  { %6140 = vrcp.f32 %v4734_v30 }
 0x8cf   :  { %v6119_v10 = vpop.eup %6118 }
 0x8d0   :  { %v6121_v35 = vpop.eup %6120  ;;  %v4850_v56 = vsub.f32 %v7899_v43, %v6119_v10 }
 0x8d1   :  { %v6123_v27 = vpop.eup %6122 }
 0x8d2   :  { %v6125_v19 = vpop.eup %6124  ;;  %v4851_v2 = vsub.f32 %v7892_v40, %v6123_v27  ;;  %v4858_v15 = vmul.f32 %v6111_v26, %v4850_v56 }
 0x8d3   :  { %v6127_v47 = vpop.eup %6126  ;;  %v4852_v42 = vsub.f32 %v7895_v31, %v6125_v19 }
 0x8d4   :  { %v6129_v49 = vpop.eup %6128  ;;  %v4853_v59 = vsub.f32 %v7897_v8, %v6127_v47  ;;  %v4859_v11 = vmul.f32 %v6113_v24, %v4851_v2  ;;  %v4866_v32 = vadd.f32 %v6119_v10, %v4858_v15 }
 0x8d5   :  { %v6131_v16 = vpop.eup %6130  ;;  %v4854_v17 = vsub.f32 %v7903_v14, %v6129_v49  ;;  %v4860_v5 = vmul.f32 %v6115_v21, %v4852_v42 }
 0x8d6   :  { %v6133_v61 = vpop.eup %6132  ;;  %v4855_v28 = vsub.f32 %v7905_v41, %v6131_v16  ;;  %v4861_v33 = vmul.f32 %v6117_v6, %v4853_v59  ;;  %v4867_v46 = vadd.f32 %v6123_v27, %v4859_v11 }
 0x8d7   :  { %v6135_v43 = vpop.eup %6134  ;;  %v4856_v12 = vsub.f32 %v7909_v3, %v6133_v61  ;;  %v4862_v40 = vmul.f32 %v6121_v35, %v4854_v17  ;;  %v4868_v38 = vadd.f32 %v6125_v19, %v4860_v5 }
 0x8d8   :  { %v6137_v48 = vpop.eup %6136  ;;  %v4857_v31 = vsub.f32 %v7911_v50, %v6135_v43  ;;  %v4869_v8 = vadd.f32 %v6127_v47, %v4861_v33  ;;  %v4882_v44 = vcombine.low %v4866_v32, %v4867_v46 }
 0x8d9   :  { %v6139_v39 = vpop.eup %6138  ;;  %v4863_v1 = vmul.f32 %v6137_v48, %v4855_v28  ;;  %v4870_v51 = vadd.f32 %v6129_v49, %v4862_v40 }
 0x8da   :  { %v6141_v14 = vpop.eup %6140  ;;  %v4864_v63 = vmul.f32 %v6139_v39, %v4856_v12  ;;  %v4883_v58 = vcombine.low %v4868_v38, %v4869_v8  ;;  %v4892_v50 = vrot.slane %v4882_v44, %v6623_v54 }
 0x8db   :  { %v4865_v57 = vmul.f32 %v6141_v14, %v4857_v31  ;;  %v4871_v41 = vadd.f32 %v6131_v16, %v4863_v1 }
 0x8dc   :  { %v4872_v60 = vadd.f32 %v6133_v61, %v4864_v63  ;;  %v4899_v7 = vrot.slane %v4883_v58, %v6623_v54 }
 0x8dd   :  { %v4873_v37 = vadd.f32 %v6135_v43, %v4865_v57  ;;  %v4884_v3 = vcombine.low %v4870_v51, %v4871_v41 }
 0x8de   :  { %v4914_v29 = vcombine.low %v4892_v50, %v4899_v7 }
 0x8df   :  { %v4885_v25 = vcombine.low %v4872_v60, %v4873_v37  ;;  %v4906_v13 = vrot.slane %v4884_v3, %v6623_v54 }
 0x8e0   :  { %v4922_v4 = vrot.slane %v4914_v29, %v6623_v54 }
 0x8e1   :  { %v4913_v23 = vrot.slane %v4885_v25, %v6623_v54 }
 0x8e3   :  { %v4915_v36 = vcombine.low %v4906_v13, %v4913_v23 }
 0x8e5   :  { %v4929_v9 = vrot.slane %v4915_v36, %v6623_v54 }
 0x8e7   :  { %v4930_v53 = vcombine.low %v4922_v4, %v4929_v9 }
 0x8e9   :  { %4932 = vst [vmem:[#allocation7] sm:$0xff] %v4930_v53 }
 0x8ea   :  { %6340 = shalt.err (!%p6337_p0)
}
 0x8eb   :  { %4942 = dma.vmem_to_hbm [thread:$0]  %s4940_s30, 128, %s8005_s3, [#allocation4]  }
 0x8ec   :  { %6353 = dma.done.wait [#allocation4], 128  }
 0x8ed   :  { %6354 = vsyncadd [#allocation4], 4294967168 }
 0x8ee   :  { %4946 = vsyncpa [#allocation3], 1 }
 0x8ef   :  { %4947 = vsyncpa [#allocation6], 1 }
 0x8f0   :  { %4948 = vsyncpa [#allocation4], 1 }

</bundles_post_ra>
